<compile_context>
chip_gen: v6e
topology: v6e:2x2x1
jax: 0.10.0
libtpu: 0.0.40
codegen_flags: <defaults>
</compile_context>

<pallas_src>
import functools
import math

import jax
import jax.numpy as jnp
from jax.experimental import pallas as pl
from jax.experimental.pallas import tpu as pltpu


# ----------------------- generation-keyed tiling budget ----------------------

try:
    _VMEM_CAP = int(pltpu.get_tpu_info().vmem_capacity_bytes)
except Exception:  # conservative default (v7x-sized) if the query is unavailable
    _VMEM_CAP = 64 * 1024 * 1024

_VMEM_LIMIT = min(96 * 1024 * 1024, (_VMEM_CAP * 3) // 4)   # ~96MiB v5e/v6e, ~48MiB v7x
_DEFAULT_TM = 512 if _VMEM_CAP > 100 * 1024 * 1024 else 256
_DEFAULT_TN = _DEFAULT_TM


def _round_up(x, m):
    return ((x + m - 1) // m) * m


def _pad_to(x, shape):
    pads = [(0, t - s) for s, t in zip(x.shape, shape)]
    if all(p == (0, 0) for p in pads):
        return x
    return jnp.pad(x, pads)


def _pick_tile(total, cap):
    """Largest multiple of 128 that divides `total` (itself a 128-multiple), <= cap."""
    best = 128
    t = 128
    while t <= min(total, cap):
        if total % t == 0:
            best = t
        t += 128
    return best


# --------------------------- fused matmul kernel ----------------------------

_INV_SQRT2 = 0.7071067811865476
_ERF_P = 0.3275911
_ERF_A = (0.254829592, -0.284496736, 1.421413741, -1.453152027, 1.061405429)


def _gelu_erf(x):
    # erf-based GELU (pytorch_pretrained_bert `gelu`): 0.5*x*(1+erf(x/sqrt(2))),
    # erf via Abramowitz&Stegun 7.1.26 (|err| < 1.5e-7) with Mosaic-supported ops.
    z = x * _INV_SQRT2
    az = jnp.abs(z)
    t = 1.0 / (1.0 + _ERF_P * az)
    a1, a2, a3, a4, a5 = _ERF_A
    poly = t * (a1 + t * (a2 + t * (a3 + t * (a4 + t * a5))))
    erf_abs = 1.0 - poly * jnp.exp(-az * az)
    erf = jnp.where(z >= 0.0, erf_abs, -erf_abs)
    return 0.5 * x * (1.0 + erf)


def _matmul_kernel(a_ref, b_ref, bias_ref, o_ref, acc_ref, *, activation):
    @pl.when(pl.program_id(2) == 0)
    def _():
        acc_ref[...] = jnp.zeros_like(acc_ref)

    acc_ref[...] += jnp.dot(a_ref[...], b_ref[...],
                            preferred_element_type=jnp.float32)

    @pl.when(pl.program_id(2) == pl.num_programs(2) - 1)
    def _():
        acc = acc_ref[...] + bias_ref[...]
        if activation == "relu":
            acc = jnp.maximum(acc, 0.0)
        elif activation == "gelu":
            acc = _gelu_erf(acc)
        o_ref[...] = acc.astype(o_ref.dtype)


def pallas_matmul(a, b, bias=None, activation=None, *, out_dtype=jnp.float32,
                  tm=None, tn=None, tk=None):
    """o = act(a @ b + bias). bf16 MXU operands, f32 accumulation, out_dtype store."""
    M, K = a.shape
    K2, N = b.shape
    assert K == K2
    Mp = _round_up(M, 8)
    Np = _round_up(N, 128)
    Kp = _round_up(K, 128)
    tm = min(tm or _DEFAULT_TM, Mp)
    tn = tn or _pick_tile(Np, _DEFAULT_TN)
    tk = tk or _pick_tile(Kp, 512)
    Mp = _round_up(Mp, tm)

    ap = _pad_to(a, (Mp, Kp)).astype(jnp.bfloat16)
    bp = _pad_to(b, (Kp, Np)).astype(jnp.bfloat16)
    if bias is None:
        biasp = jnp.zeros((1, Np), jnp.float32)
    else:
        biasp = _pad_to(bias.reshape(1, N).astype(jnp.float32), (1, Np))

    out = pl.pallas_call(
        functools.partial(_matmul_kernel, activation=activation),
        out_shape=jax.ShapeDtypeStruct((Mp, Np), out_dtype),
        grid=(Mp // tm, Np // tn, Kp // tk),
        in_specs=[
            pl.BlockSpec((tm, tk), lambda i, j, k: (i, k)),
            pl.BlockSpec((tk, tn), lambda i, j, k: (k, j)),
            pl.BlockSpec((1, tn), lambda i, j, k: (0, j)),
        ],
        out_specs=pl.BlockSpec((tm, tn), lambda i, j, k: (i, j)),
        scratch_shapes=[pltpu.VMEM((tm, tn), jnp.float32)],
        compiler_params=pltpu.CompilerParams(
            dimension_semantics=("parallel", "parallel", "arbitrary"),
            vmem_limit_bytes=_VMEM_LIMIT),
    )(ap, bp, biasp)
    return out[:M, :N]


# ---------------- fused matmul + bias + residual + LayerNorm -----------------


def _matmul_add_ln_kernel(a_ref, b_ref, bias_ref, res_ref, g_ref, beta_ref,
                          o_ref, acc_ref, *, eps, n_valid):
    @pl.when(pl.program_id(1) == 0)
    def _():
        acc_ref[...] = jnp.zeros_like(acc_ref)

    acc_ref[...] += jnp.dot(a_ref[...], b_ref[...],
                            preferred_element_type=jnp.float32)

    @pl.when(pl.program_id(1) == pl.num_programs(1) - 1)
    def _():
        x = acc_ref[...] + bias_ref[...] + res_ref[...].astype(jnp.float32)
        n_pad = x.shape[-1]
        if n_valid == n_pad:
            mean = jnp.mean(x, axis=-1, keepdims=True)
            var = jnp.mean(jnp.square(x - mean), axis=-1, keepdims=True)
        else:
            # mean/var only over the true columns; padded cols are zero on input
            # and zeroed on output via zero-padded gamma/beta.
            mask = (jax.lax.broadcasted_iota(jnp.int32, (1, n_pad), 1)
                    < n_valid).astype(jnp.float32)
            inv_n = 1.0 / float(n_valid)
            mean = jnp.sum(x * mask, axis=-1, keepdims=True) * inv_n
            var = jnp.sum(jnp.square((x - mean) * mask),
                          axis=-1, keepdims=True) * inv_n
        y = (x - mean) * jax.lax.rsqrt(var + eps)
        o_ref[...] = (y * g_ref[...] + beta_ref[...]).astype(o_ref.dtype)


def pallas_matmul_add_ln(a, b, bias, residual, gamma, beta, *, eps=1e-12,
                         out_dtype=jnp.float32, tm=None, tk=None):
    """o = LayerNorm(a @ b + bias + residual); LN fused into the matmul epilogue."""
    M, K = a.shape
    K2, N = b.shape
    assert K == K2 and residual.shape == (M, N)
    Mp = _round_up(M, 8)
    Np = _round_up(N, 128)
    Kp = _round_up(K, 128)
    tm = min(tm or _DEFAULT_TM, Mp)
    tk = tk or _pick_tile(Kp, 512)
    Mp = _round_up(Mp, tm)

    ap = _pad_to(a, (Mp, Kp)).astype(jnp.bfloat16)
    bp = _pad_to(b, (Kp, Np)).astype(jnp.bfloat16)
    rp = _pad_to(residual, (Mp, Np))                      # native dtype; upcast in-kernel
    biasp = _pad_to(bias.reshape(1, N).astype(jnp.float32), (1, Np))
    gp = _pad_to(gamma.reshape(1, N).astype(jnp.float32), (1, Np))
    betap = _pad_to(beta.reshape(1, N).astype(jnp.float32), (1, Np))

    out = pl.pallas_call(
        functools.partial(_matmul_add_ln_kernel, eps=eps, n_valid=N),
        out_shape=jax.ShapeDtypeStruct((Mp, Np), out_dtype),
        grid=(Mp // tm, Kp // tk),
        in_specs=[
            pl.BlockSpec((tm, tk), lambda i, k: (i, k)),
            pl.BlockSpec((tk, Np), lambda i, k: (k, 0)),
            pl.BlockSpec((1, Np), lambda i, k: (0, 0)),
            pl.BlockSpec((tm, Np), lambda i, k: (i, 0)),
            pl.BlockSpec((1, Np), lambda i, k: (0, 0)),
            pl.BlockSpec((1, Np), lambda i, k: (0, 0)),
        ],
        out_specs=pl.BlockSpec((tm, Np), lambda i, k: (i, 0)),
        scratch_shapes=[pltpu.VMEM((tm, Np), jnp.float32)],
        compiler_params=pltpu.CompilerParams(
            dimension_semantics=("parallel", "arbitrary"),
            vmem_limit_bytes=_VMEM_LIMIT),
    )(ap, bp, biasp, rp, gp, betap)
    return out[:M, :N]


# ------------------------------ LayerNorm kernel -----------------------------


def _ln_kernel(x_ref, g_ref, b_ref, o_ref, *, eps):
    x = x_ref[...].astype(jnp.float32)
    mean = jnp.mean(x, axis=-1, keepdims=True)
    var = jnp.mean(jnp.square(x - mean), axis=-1, keepdims=True)
    y = (x - mean) * jax.lax.rsqrt(var + eps)
    o_ref[...] = (y * g_ref[...] + b_ref[...]).astype(o_ref.dtype)


def pallas_layernorm(x, gamma, beta, eps=1e-12, *, tm=None):
    """Row-tiled LayerNorm over the last dim (native-dtype input, f32 math)."""
    M, H = x.shape
    Mp = _round_up(M, 8)
    tm = min(tm or 512, Mp)
    Mp = _round_up(Mp, tm)
    xp = _pad_to(x, (Mp, H))
    g = gamma.reshape(1, H).astype(jnp.float32)
    b = beta.reshape(1, H).astype(jnp.float32)
    out = pl.pallas_call(
        functools.partial(_ln_kernel, eps=eps),
        out_shape=jax.ShapeDtypeStruct((Mp, H), jnp.float32),
        grid=(Mp // tm,),
        in_specs=[pl.BlockSpec((tm, H), lambda i: (i, 0)),
                  pl.BlockSpec((1, H), lambda i: (0, 0)),
                  pl.BlockSpec((1, H), lambda i: (0, 0))],
        out_specs=pl.BlockSpec((tm, H), lambda i: (i, 0)),
        compiler_params=pltpu.CompilerParams(
            dimension_semantics=("parallel",), vmem_limit_bytes=_VMEM_LIMIT),
    )(xp, g, b)
    return out[:M]


# ----------------------- cross-attention (NO softmax) ------------------------


def _cross_attn_kernel(q_ref, k_ref, v_ref, qk_ref, h_ref, acc_ref, *, scale):
    # NOTE: the reference module applies NO softmax here -- qk is used directly.
    s2 = pl.program_id(1)

    @pl.when(s2 == 0)
    def _():
        acc_ref[...] = jnp.zeros_like(acc_ref)

    q = q_ref[0]   # [S1p, Ap] bf16
    k = k_ref[0]   # [ts2, Ap] bf16
    v = v_ref[0]   # [ts2, Ap] bf16
    qk = jax.lax.dot_general(q, k, (((1,), (1,)), ((), ())),
                             preferred_element_type=jnp.float32) * scale
    qk_ref[0] = qk.astype(qk_ref.dtype)
    acc_ref[...] += jnp.dot(qk.astype(v.dtype), v,
                            preferred_element_type=jnp.float32)

    @pl.when(s2 == pl.num_programs(1) - 1)
    def _():
        h_ref[0] = acc_ref[...].astype(h_ref.dtype)


def pallas_cross_attention(q, k, v, attn_size):
    """q:[B,S1,Ap] k,v:[B,S2,Ap] (A pre-padded, zero lanes beyond attn_size).
    Returns (qk [B,S1,S2] f32, hiddens [B,S1,Ap] bf16) -- NO softmax (matches module).
    Tiled over S2 with a VMEM f32 accumulator for hiddens."""
    B, S1, Ap = q.shape
    _, S2, _ = k.shape
    S1p = _round_up(S1, 8)
    S2p = _round_up(S2, 128)
    ts2 = _pick_tile(S2p, 512)
    scale = 1.0 / math.sqrt(float(attn_size))
    qp = _pad_to(q, (B, S1p, Ap)).astype(jnp.bfloat16)
    kp = _pad_to(k, (B, S2p, Ap)).astype(jnp.bfloat16)
    vp = _pad_to(v, (B, S2p, Ap)).astype(jnp.bfloat16)
    qk, h = pl.pallas_call(
        functools.partial(_cross_attn_kernel, scale=scale),
        out_shape=(jax.ShapeDtypeStruct((B, S1p, S2p), jnp.float32),
                   jax.ShapeDtypeStruct((B, S1p, Ap), jnp.bfloat16)),
        grid=(B, S2p // ts2),
        in_specs=[
            pl.BlockSpec((1, S1p, Ap), lambda b, s: (b, 0, 0)),
            pl.BlockSpec((1, ts2, Ap), lambda b, s: (b, s, 0)),
            pl.BlockSpec((1, ts2, Ap), lambda b, s: (b, s, 0)),
        ],
        out_specs=(pl.BlockSpec((1, S1p, ts2), lambda b, s: (b, 0, s)),
                   pl.BlockSpec((1, S1p, Ap), lambda b, s: (b, 0, 0))),
        scratch_shapes=[pltpu.VMEM((S1p, Ap), jnp.float32)],
        compiler_params=pltpu.CompilerParams(
            dimension_semantics=("parallel", "arbitrary"),
            vmem_limit_bytes=_VMEM_LIMIT),
    )(qp, kp, vp)
    return qk[:, :S1, :S2], h[:, :S1, :]


# ------------------------ BERT self-attention kernel -------------------------


def _self_attn_kernel(q_ref, k_ref, v_ref, m_ref, o_ref, *, scale):
    q = q_ref[0, 0]   # [Sp, dh] bf16
    k = k_ref[0, 0]
    v = v_ref[0, 0]
    mask = m_ref[0]   # [1, Sp] additive f32 (padded keys = -1e9)
    s = jax.lax.dot_general(q, k, (((1,), (1,)), ((), ())),
                            preferred_element_type=jnp.float32)
    s = s * scale + mask
    s = s - jnp.max(s, axis=-1, keepdims=True)
    p = jnp.exp(s)
    p = p * pl.reciprocal(jnp.sum(p, axis=-1, keepdims=True), approx=True)
    o_ref[0, 0] = jnp.dot(p.astype(v.dtype), v,
                          preferred_element_type=jnp.float32).astype(o_ref.dtype)


def pallas_self_attention(q, k, v, mask, *, scale):
    """q,k,v: [B, nh, S, dh]; mask: [B, 1, S] additive. Returns [B, nh, S, dh] bf16.

    dh is NOT padded (block last dim = full dh); grid is (B, nh) so both v7x
    TensorCores get work and per-step VMEM is one head."""
    # TODO(synk): flash-style key tiling for long sequences; all keys fit VMEM here.
    B, nh, S, dh = q.shape
    Sp = _round_up(S, 8)
    qp = _pad_to(q, (B, nh, Sp, dh)).astype(jnp.bfloat16)
    kp = _pad_to(k, (B, nh, Sp, dh)).astype(jnp.bfloat16)
    vp = _pad_to(v, (B, nh, Sp, dh)).astype(jnp.bfloat16)
    mp = jnp.pad(mask.astype(jnp.float32), ((0, 0), (0, 0), (0, Sp - S)),
                 constant_values=-1e9)
    out = pl.pallas_call(
        functools.partial(_self_attn_kernel, scale=scale),
        out_shape=jax.ShapeDtypeStruct((B, nh, Sp, dh), jnp.bfloat16),
        grid=(B, nh),
        in_specs=[
            pl.BlockSpec((1, 1, Sp, dh), lambda b, h: (b, h, 0, 0)),
            pl.BlockSpec((1, 1, Sp, dh), lambda b, h: (b, h, 0, 0)),
            pl.BlockSpec((1, 1, Sp, dh), lambda b, h: (b, h, 0, 0)),
            pl.BlockSpec((1, 1, Sp), lambda b, h: (b, 0, 0)),
        ],
        out_specs=pl.BlockSpec((1, 1, Sp, dh), lambda b, h: (b, h, 0, 0)),
        compiler_params=pltpu.CompilerParams(
            dimension_semantics=("parallel", "parallel"),
            vmem_limit_bytes=_VMEM_LIMIT),
    )(qp, kp, vp, mp)
    return out[:, :, :S, :]


# -------------------------------- glue helpers --------------------------------


def pre_resnet(params, image_nchw):
    """Image backbone (pre_resnet = resnet152 minus avgpool/fc) -- stand-in."""
    # TODO(synk): full ResNet-152 trunk (maxpool + 50 bottleneck stages) is not
    # reimplemented; a strided 1x1 projection to 2048 channels stands in for it.
    B, C, H, W = image_nchw.shape
    patches = jax.lax.conv_general_dilated_patches(
        image_nchw, filter_shape=(7, 7), window_strides=(2, 2),
        padding=((3, 3), (3, 3)),
        dimension_numbers=("NCHW", "OIHW", "NCHW"))          # [B, C*49, Ho, Wo]
    _, CK, Ho, Wo = patches.shape
    patches = patches.transpose(0, 2, 3, 1).reshape(B * Ho * Wo, CK)
    patches = patches.astype(jnp.bfloat16)
    w_stem = params["conv1_w"].reshape(64, -1).T              # [C*49, 64]
    feat = pallas_matmul(patches, w_stem, activation="relu")  # [B*Ho*Wo, 64] f32
    feat = feat.reshape(B, Ho, Wo, 64).transpose(0, 3, 1, 2)  # NCHW
    feat = feat[:, :, ::4, ::4]                               # stand-in downsample
    B2, C2, H2, W2 = feat.shape
    flat = feat.transpose(0, 2, 3, 1).reshape(B2 * H2 * W2, C2).astype(jnp.bfloat16)
    proj = pallas_matmul(flat, params["proj_w"], activation="relu")  # [., 2048]
    proj = proj.reshape(B2, H2, W2, -1).transpose(0, 3, 1, 2)        # NCHW [B,2048,h,w]
    return proj


def bert_embeddings(params, input_ids, token_type_ids):
    B, S = input_ids.shape
    we = params["word_emb"][input_ids]
    pe = params["pos_emb"][:S][None, :, :]
    te = params["type_emb"][token_type_ids]
    emb = we + pe + te
    H = emb.shape[-1]
    out = pallas_layernorm(emb.reshape(B * S, H),
                           params["emb_ln_g"], params["emb_ln_b"])
    return out.reshape(B, S, H)


def cross_attention(params, txt_emb, img_emb, attn_size):
    B, S1, H = txt_emb.shape
    _, S2, IH = img_emb.shape
    Ap = _round_up(attn_size, 128)
    txt_flat = txt_emb.reshape(B * S1, H).astype(jnp.bfloat16)
    img_flat = img_emb.reshape(B * S2, IH).astype(jnp.bfloat16)

    # Fused projections; each sub-block pre-padded to Ap=256 lanes so the splits
    # land on 128-lane boundaries (free views, no re-padding downstream).
    txt_proj = pallas_matmul(txt_flat, params["W_txt_cat"], out_dtype=jnp.bfloat16)
    q_t, k_t, v_t, q_i = jnp.split(txt_proj, 4, axis=-1)     # each [B*S1, Ap]
    img_proj = pallas_matmul(img_flat, params["W_img_cat"], out_dtype=jnp.bfloat16)
    k_i, v_i = jnp.split(img_proj, 2, axis=-1)               # each [B*S2, Ap]

    r1 = lambda t: t.reshape(B, S1, Ap)
    r2 = lambda t: t.reshape(B, S2, Ap)

    _, h_txt = pallas_cross_attention(r1(q_t), r1(k_t), r1(v_t), attn_size)
    img_qk, h_img = pallas_cross_attention(r1(q_i), r2(k_i), r2(v_i), attn_size)

    hid = (h_txt + h_img).reshape(B * S1, Ap)                 # bf16, zero pad lanes
    out = pallas_matmul(hid, params["hiddenmm2embs_w"], params["hiddenmm2embs_b"])
    return out.reshape(B, S1, H), img_qk


def bert_layer(lp, x, B, S, mask, num_heads):
    """x: [B*S, H] f32 hidden state. Returns [B*S, H] f32."""
    M, H = x.shape
    dh = H // num_heads
    x_bf = x.astype(jnp.bfloat16)                             # one cast per layer

    qkv = pallas_matmul(x_bf, lp["qkv_w"], lp["qkv_b"], out_dtype=jnp.bfloat16)
    q, k, v = jnp.split(qkv, 3, axis=-1)

    def heads(t):
        return t.reshape(B, S, num_heads, dh).transpose(0, 2, 1, 3)   # [B,nh,S,dh]

    ctx = pallas_self_attention(heads(q), heads(k), heads(v), mask,
                                scale=1.0 / math.sqrt(float(dh)))
    ctx = ctx.transpose(0, 2, 1, 3).reshape(M, H)             # bf16

    # attention-output projection with fused bias + residual + LayerNorm.
    x1 = pallas_matmul_add_ln(ctx, lp["ao_w"], lp["ao_b"], x_bf,
                              lp["ao_ln_g"], lp["ao_ln_b"],
                              out_dtype=jnp.bfloat16)

    inter = pallas_matmul(x1, lp["i_w"], lp["i_b"], activation="gelu",
                          out_dtype=jnp.bfloat16)

    # FFN-output projection with fused bias + residual + LayerNorm; f32 result
    # because it is the returned hidden state.
    x2 = pallas_matmul_add_ln(inter, lp["o_w"], lp["o_b"], x1,
                              lp["o_ln_g"], lp["o_ln_b"],
                              out_dtype=jnp.float32)
    return x2


def pretrained_encoder_tir_forward(params, image, expression, cfg):
    """Equivalent of PretrainedEncoderTIR.forward -> (all_hidden_states, visual_qk)."""
    img_feature = pre_resnet(params, image)                    # [B, 2048, h, w] NCHW

    input_ids = expression
    B, S = input_ids.shape
    attention_mask = jnp.ones_like(input_ids)
    token_type_ids = jnp.zeros_like(input_ids)
    ext_mask = (1.0 - attention_mask.astype(jnp.float32)) * -10000.0   # [B, S]

    ling = bert_embeddings(params, input_ids, token_type_ids)          # [B,S,H] f32

    # Raw .view(B, -1, 2048) of the NCHW feature map (exact PyTorch semantics).
    visual_embedding = img_feature.reshape(B, -1, cfg["img_hidden_size"])

    vl_part, visual_qk = cross_attention(params, ling, visual_embedding,
                                         cfg["attn_size"])
    vl = vl_part + ling                                                 # [B,S,H] f32

    mask = ext_mask[:, None, :]                                         # [B,1,S]

    all_layers = []
    h2d = vl.reshape(B * S, cfg["hidden_size"])
    for lp in params["layers"]:
        h2d = bert_layer(lp, h2d, B, S, mask, cfg["num_heads"])
        all_layers.append(h2d.reshape(B, S, cfg["hidden_size"]))
    return all_layers, visual_qk


# ------------------------------- parameter init -------------------------------


def init_params(key, cfg):
    H = cfg["hidden_size"]
    A = cfg["attn_size"]
    Ap = _round_up(A, 128)
    IH = cfg["img_hidden_size"]
    I = cfg["intermediate_size"]
    keys = iter(jax.random.split(key, 256))

    def n(shape, scale=0.02):
        return jax.random.normal(next(keys), shape, jnp.float32) * scale

    def z(*shape):
        return jnp.zeros(shape, jnp.float32)

    def bf(x):
        return x.astype(jnp.bfloat16)

    def padA(w):                        # pad last dim A -> Ap with zero columns
        return _pad_to(w, (w.shape[0], Ap))

    # cross-attention params (randn / 100 in the module), pre-fused + pre-padded.
    W_q_txt, W_k_txt, W_v_txt = n((H, A), 0.01), n((H, A), 0.01), n((H, A), 0.01)
    W_q_img = n((H, A), 0.01)
    W_k_img, W_v_img = n((IH, A), 0.01), n((IH, A), 0.01)

    params = {
        # resnet stand-in (weights stored bf16 -> no per-forward cast pass)
        "conv1_w": bf(n((64, 3, 7, 7), 0.05)),
        "proj_w": bf(n((64, IH), 0.05)),
        # BERT embeddings
        "word_emb": n((cfg["vocab_size"], H)),
        "pos_emb": n((cfg["max_position"], H)),
        "type_emb": n((cfg["type_vocab_size"], H)),
        "emb_ln_g": jnp.ones((H,), jnp.float32),
        "emb_ln_b": z(H),
        # fused + lane-padded cross-attention projection weights
        "W_txt_cat": bf(jnp.concatenate(
            [padA(W_q_txt), padA(W_k_txt), padA(W_v_txt), padA(W_q_img)], axis=1)),
        "W_img_cat": bf(jnp.concatenate([padA(W_k_img), padA(W_v_img)], axis=1)),
        "hiddenmm2embs_w": bf(_pad_to(n((A, H)), (Ap, H))),   # zero rows beyond A
        "hiddenmm2embs_b": z(H),
        "layers": [],
    }
    for _ in range(cfg["num_layers"]):
        q_w, k_w, v_w = n((H, H)), n((H, H)), n((H, H))
        params["layers"].append({
            "qkv_w": bf(jnp.concatenate([q_w, k_w, v_w], axis=1)),   # [H, 3H]
            "qkv_b": z(3 * H),
            "ao_w": bf(n((H, H))), "ao_b": z(H),
            "ao_ln_g": jnp.ones((H,), jnp.float32), "ao_ln_b": z(H),
            "i_w": bf(n((H, I))), "i_b": z(I),
            "o_w": bf(n((I, H))), "o_b": z(H),
            "o_ln_g": jnp.ones((H,), jnp.float32), "o_ln_b": z(H),
        })
    return params


# ------------------------------------ main ------------------------------------


if __name__ == "__main__":
    cfg = {
        # scaled-down BERT config; attn_size / img_hidden_size are the module's
        # hard-coded 200 / 2048.
        "vocab_size": 100,
        "hidden_size": 32,
        "num_layers": 2,
        "num_heads": 4,
        "intermediate_size": 64,
        "max_position": 64,
        "type_vocab_size": 2,
        "attn_size": 200,
        "img_hidden_size": 2048,
    }

    root = jax.random.PRNGKey(0)
    k_param, k_img, k_txt = jax.random.split(root, 3)
    params = init_params(k_param, cfg)

    # Inputs: image NCHW (PyTorch layout), expression = token ids.
    image = jax.random.normal(k_img, (2, 3, 16, 16), jnp.float32)
    expression = jax.random.randint(k_txt, (2, 8), 0, cfg["vocab_size"], dtype=jnp.int32)

    forward = jax.jit(functools.partial(pretrained_encoder_tir_forward, cfg=cfg))
    all_hidden_states, visual_qk = forward(params, image, expression)

    jax.block_until_ready(all_hidden_states)
    jax.block_until_ready(visual_qk)

    assert len(all_hidden_states) == cfg["num_layers"]
    assert all_hidden_states[-1].shape == (2, 8, cfg["hidden_size"])
    assert all_hidden_states[-1].dtype == jnp.float32
    assert visual_qk.shape == (2, 8, 4)
    print("KERNEL_OK")
</pallas_src>

<mosaic_0001>
module attributes {stable_mosaic.version = 11 : i64} {
  func.func @_matmul_kernel(%arg0: i32, %arg1: i32, %arg2: i32, %arg3: memref<16x128xbf16, #tpu.memory_space<vmem>>, %arg4: memref<128x256xbf16, #tpu.memory_space<vmem>>, %arg5: memref<1x256xf32, #tpu.memory_space<vmem>>, %arg6: memref<16x256xbf16, #tpu.memory_space<vmem>>, %arg7: memref<16x256xf32, #tpu.memory_space<vmem>>) attributes {dimension_semantics = [#tpu.dimension_semantics<parallel>, #tpu.dimension_semantics<parallel>, #tpu.dimension_semantics<arbitrary>], iteration_bounds = array<i64: 1, 4, 1>, scalar_prefetch = 0 : i64, scratch_operands = 1 : i64, tpu.core_type = #tpu.core_type<tc>, window_params = [{transform_indices = @transform_0, window_bounds = array<i64: 16, 128>}, {transform_indices = @transform_1, window_bounds = array<i64: 128, 256>}, {transform_indices = @transform_2, window_bounds = array<i64: 1, 256>}, {transform_indices = @transform_3, window_bounds = array<i64: 16, 256>}]} {
    %c0_i32 = arith.constant 0 : i32
    %0 = arith.cmpi eq, %arg2, %c0_i32 : i32
    %1 = arith.extui %0 : i1 to i32
    %c0_i32_0 = arith.constant 0 : i32
    %2 = arith.cmpi ne, %1, %c0_i32_0 : i32
    scf.if %2 {
      %cst_10 = arith.constant 0.000000e+00 : f32
      %12 = vector.broadcast %cst_10 : f32 to vector<16x256xf32>
      %c0_11 = arith.constant 0 : index
      %c0_12 = arith.constant 0 : index
      %13 = vector.load %arg7[%c0_11, %c0_12] : memref<16x256xf32, #tpu.memory_space<vmem>>, vector<16x256xf32>
      tpu.vector_store %arg7[%c0_11, %c0_12], %12 {strides = array<i32>} : memref<16x256xf32, #tpu.memory_space<vmem>>, vector<16x256xf32>,
    } else {
    }
    %c0 = arith.constant 0 : index
    %c0_1 = arith.constant 0 : index
    %3 = vector.load %arg7[%c0, %c0_1] : memref<16x256xf32, #tpu.memory_space<vmem>>, vector<16x256xf32>
    %c0_2 = arith.constant 0 : index
    %c0_3 = arith.constant 0 : index
    %4 = vector.load %arg3[%c0_2, %c0_3] : memref<16x128xbf16, #tpu.memory_space<vmem>>, vector<16x128xbf16>
    %c0_4 = arith.constant 0 : index
    %c0_5 = arith.constant 0 : index
    %5 = vector.load %arg4[%c0_4, %c0_5] : memref<128x256xbf16, #tpu.memory_space<vmem>>, vector<128x256xbf16>
    %cst = arith.constant dense<0.000000e+00> : vector<16x256xf32>
    %6 = tpu.matmul %4, %5, %cst {dimension_numbers = #tpu.dot_dimension_numbers<[1], [0], [0], [1], [0, 0, 1, 1], [], []>} : vector<16x128xbf16>, vector<128x256xbf16>, vector<16x256xf32> -> vector<16x256xf32>
    %7 = arith.addf %3, %6 : vector<16x256xf32>
    %c0_6 = arith.constant 0 : index
    %c0_7 = arith.constant 0 : index
    %8 = vector.load %arg7[%c0_6, %c0_7] : memref<16x256xf32, #tpu.memory_space<vmem>>, vector<16x256xf32>
    tpu.vector_store %arg7[%c0_6, %c0_7], %7 {strides = array<i32>} : memref<16x256xf32, #tpu.memory_space<vmem>>, vector<16x256xf32>,
    %c0_i32_8 = arith.constant 0 : i32
    %9 = arith.cmpi eq, %arg2, %c0_i32_8 : i32
    %10 = arith.extui %9 : i1 to i32
    %c0_i32_9 = arith.constant 0 : i32
    %11 = arith.cmpi ne, %10, %c0_i32_9 : i32
    scf.if %11 {
      %c0_10 = arith.constant 0 : index
      %c0_11 = arith.constant 0 : index
      %12 = vector.load %arg7[%c0_10, %c0_11] : memref<16x256xf32, #tpu.memory_space<vmem>>, vector<16x256xf32>
      %c0_12 = arith.constant 0 : index
      %c0_13 = arith.constant 0 : index
      %13 = vector.load %arg5[%c0_12, %c0_13] : memref<1x256xf32, #tpu.memory_space<vmem>>, vector<1x256xf32>
      %14 = vector.broadcast %13 : vector<1x256xf32> to vector<16x256xf32>
      %15 = arith.addf %12, %14 : vector<16x256xf32>
      %16 = arith.truncf %15 : vector<16x256xf32> to vector<16x256xbf16>
      %c0_14 = arith.constant 0 : index
      %c0_15 = arith.constant 0 : index
      %17 = vector.load %arg6[%c0_14, %c0_15] : memref<16x256xbf16, #tpu.memory_space<vmem>>, vector<16x256xbf16>
      tpu.vector_store %arg6[%c0_14, %c0_15], %16 {strides = array<i32>} : memref<16x256xbf16, #tpu.memory_space<vmem>>, vector<16x256xbf16>,
    } else {
    }
    return
  }
  func.func @transform_0(%arg0: i32, %arg1: i32, %arg2: i32) -> (i32, i32) {
    %c0_i32 = arith.constant 0 : i32
    return %arg0, %arg2 : i32, i32
  }
  func.func @transform_1(%arg0: i32, %arg1: i32, %arg2: i32) -> (i32, i32) {
    %c0_i32 = arith.constant 0 : i32
    return %arg2, %arg1 : i32, i32
  }
  func.func @transform_2(%arg0: i32, %arg1: i32, %arg2: i32) -> (i32, i32) {
    %c0_i32 = arith.constant 0 : i32
    %c0_i32_0 = arith.constant 0 : i32
    return %c0_i32, %arg1 : i32, i32
  }
  func.func @transform_3(%arg0: i32, %arg1: i32, %arg2: i32) -> (i32, i32) {
    %c0_i32 = arith.constant 0 : i32
    return %arg0, %arg1 : i32, i32
  }
}

module attributes {stable_mosaic.version = 11 : i64} {
  func.func @_ln_kernel(%arg0: i32, %arg1: memref<16x32xf32, #tpu.memory_space<vmem>>, %arg2: memref<1x32xf32, #tpu.memory_space<vmem>>, %arg3: memref<1x32xf32, #tpu.memory_space<vmem>>, %arg4: memref<16x32xf32, #tpu.memory_space<vmem>>) attributes {dimension_semantics = [#tpu.dimension_semantics<parallel>], iteration_bounds = array<i64: 1>, scalar_prefetch = 0 : i64, scratch_operands = 0 : i64, tpu.core_type = #tpu.core_type<tc>, window_params = [{transform_indices = @transform_0, window_bounds = array<i64: 16, 32>}, {pipeline_mode = #tpu.pipeline_mode<synchronous>, transform_indices = @transform_1, window_bounds = array<i64: 1, 32>}, {pipeline_mode = #tpu.pipeline_mode<synchronous>, transform_indices = @transform_2, window_bounds = array<i64: 1, 32>}, {transform_indices = @transform_3, window_bounds = array<i64: 16, 32>}]} {
    %c0 = arith.constant 0 : index
    %c0_0 = arith.constant 0 : index
    %0 = vector.load %arg1[%c0, %c0_0] : memref<16x32xf32, #tpu.memory_space<vmem>>, vector<16x32xf32>
    %cst = arith.constant dense<0.000000e+00> : vector<16xf32>
    %1 = vector.multi_reduction <add>, %0, %cst [1] : vector<16x32xf32> to vector<16xf32>
    %2 = vector.shape_cast %1 : vector<16xf32> to vector<16x1xf32>
    %cst_1 = arith.constant 3.200000e+01 : f32
    %3 = vector.broadcast %cst_1 : f32 to vector<16x1xf32>
    %4 = arith.divf %2, %3 : vector<16x1xf32>
    %5 = vector.broadcast %4 : vector<16x1xf32> to vector<16x32xf32>
    %6 = arith.subf %0, %5 : vector<16x32xf32>
    %7 = arith.mulf %6, %6 : vector<16x32xf32>
    %cst_2 = arith.constant dense<0.000000e+00> : vector<16xf32>
    %8 = vector.multi_reduction <add>, %7, %cst_2 [1] : vector<16x32xf32> to vector<16xf32>
    %9 = vector.shape_cast %8 : vector<16xf32> to vector<16x1xf32>
    %cst_3 = arith.constant 3.200000e+01 : f32
    %10 = vector.broadcast %cst_3 : f32 to vector<16x1xf32>
    %11 = arith.divf %9, %10 : vector<16x1xf32>
    %12 = vector.broadcast %4 : vector<16x1xf32> to vector<16x32xf32>
    %13 = arith.subf %0, %12 : vector<16x32xf32>
    %cst_4 = arith.constant 9.99999996E-13 : f32
    %14 = vector.broadcast %cst_4 : f32 to vector<16x1xf32>
    %15 = arith.addf %11, %14 : vector<16x1xf32>
    %16 = math.rsqrt %15 : vector<16x1xf32>
    %17 = vector.broadcast %16 : vector<16x1xf32> to vector<16x32xf32>
    %18 = arith.mulf %13, %17 : vector<16x32xf32>
    %c0_5 = arith.constant 0 : index
    %c0_6 = arith.constant 0 : index
    %19 = vector.load %arg2[%c0_5, %c0_6] : memref<1x32xf32, #tpu.memory_space<vmem>>, vector<1x32xf32>
    %20 = vector.broadcast %19 : vector<1x32xf32> to vector<16x32xf32>
    %21 = arith.mulf %18, %20 : vector<16x32xf32>
    %c0_7 = arith.constant 0 : index
    %c0_8 = arith.constant 0 : index
    %22 = vector.load %arg3[%c0_7, %c0_8] : memref<1x32xf32, #tpu.memory_space<vmem>>, vector<1x32xf32>
    %23 = vector.broadcast %22 : vector<1x32xf32> to vector<16x32xf32>
    %24 = arith.addf %21, %23 : vector<16x32xf32>
    %c0_9 = arith.constant 0 : index
    %c0_10 = arith.constant 0 : index
    %25 = vector.load %arg4[%c0_9, %c0_10] : memref<16x32xf32, #tpu.memory_space<vmem>>, vector<16x32xf32>
    tpu.vector_store %arg4[%c0_9, %c0_10], %24 {strides = array<i32>} : memref<16x32xf32, #tpu.memory_space<vmem>>, vector<16x32xf32>,
    return
  }
  func.func @transform_0(%arg0: i32) -> (i32, i32) {
    %c0_i32 = arith.constant 0 : i32
    %c0_i32_0 = arith.constant 0 : i32
    return %arg0, %c0_i32 : i32, i32
  }
  func.func @transform_1(%arg0: i32) -> (i32, i32) {
    %c0_i32 = arith.constant 0 : i32
    %c0_i32_0 = arith.constant 0 : i32
    %c0_i32_1 = arith.constant 0 : i32
    return %c0_i32, %c0_i32_0 : i32, i32
  }
  func.func @transform_2(%arg0: i32) -> (i32, i32) {
    %c0_i32 = arith.constant 0 : i32
    %c0_i32_0 = arith.constant 0 : i32
    %c0_i32_1 = arith.constant 0 : i32
    return %c0_i32, %c0_i32_0 : i32, i32
  }
  func.func @transform_3(%arg0: i32) -> (i32, i32) {
    %c0_i32 = arith.constant 0 : i32
    %c0_i32_0 = arith.constant 0 : i32
    return %arg0, %c0_i32 : i32, i32
  }
}

module attributes {stable_mosaic.version = 11 : i64} {
  func.func @_cross_attn_kernel(%arg0: i32, %arg1: i32, %arg2: memref<1x8x256xbf16, #tpu.memory_space<vmem>>, %arg3: memref<1x128x256xbf16, #tpu.memory_space<vmem>>, %arg4: memref<1x128x256xbf16, #tpu.memory_space<vmem>>, %arg5: memref<1x8x128xf32, #tpu.memory_space<vmem>>, %arg6: memref<1x8x256xbf16, #tpu.memory_space<vmem>>, %arg7: memref<8x256xf32, #tpu.memory_space<vmem>>) attributes {dimension_semantics = [#tpu.dimension_semantics<parallel>, #tpu.dimension_semantics<arbitrary>], iteration_bounds = array<i64: 2, 1>, scalar_prefetch = 0 : i64, scratch_operands = 1 : i64, tpu.core_type = #tpu.core_type<tc>, window_params = [{transform_indices = @transform_0, window_bounds = array<i64: 1, 8, 256>}, {transform_indices = @transform_1, window_bounds = array<i64: 1, 128, 256>}, {transform_indices = @transform_2, window_bounds = array<i64: 1, 128, 256>}, {transform_indices = @transform_3, window_bounds = array<i64: 1, 8, 128>}, {transform_indices = @transform_4, window_bounds = array<i64: 1, 8, 256>}]} {
    %c0_i32 = arith.constant 0 : i32
    %0 = arith.cmpi eq, %arg1, %c0_i32 : i32
    %1 = arith.extui %0 : i1 to i32
    %c0_i32_0 = arith.constant 0 : i32
    %2 = arith.cmpi ne, %1, %c0_i32_0 : i32
    scf.if %2 {
      %cst_20 = arith.constant 0.000000e+00 : f32
      %23 = vector.broadcast %cst_20 : f32 to vector<8x256xf32>
      %c0_21 = arith.constant 0 : index
      %c0_22 = arith.constant 0 : index
      %24 = vector.load %arg7[%c0_21, %c0_22] : memref<8x256xf32, #tpu.memory_space<vmem>>, vector<8x256xf32>
      tpu.vector_store %arg7[%c0_21, %c0_22], %23 {strides = array<i32>} : memref<8x256xf32, #tpu.memory_space<vmem>>, vector<8x256xf32>,
    } else {
    }
    %c0 = arith.constant 0 : index
    %c0_1 = arith.constant 0 : index
    %c0_2 = arith.constant 0 : index
    %3 = vector.load %arg2[%c0, %c0_1, %c0_2] : memref<1x8x256xbf16, #tpu.memory_space<vmem>>, vector<1x8x256xbf16>
    %4 = vector.shape_cast %3 : vector<1x8x256xbf16> to vector<8x256xbf16>
    %c0_3 = arith.constant 0 : index
    %c0_4 = arith.constant 0 : index
    %c0_5 = arith.constant 0 : index
    %5 = vector.load %arg3[%c0_3, %c0_4, %c0_5] : memref<1x128x256xbf16, #tpu.memory_space<vmem>>, vector<1x128x256xbf16>
    %6 = vector.shape_cast %5 : vector<1x128x256xbf16> to vector<128x256xbf16>
    %c0_6 = arith.constant 0 : index
    %c0_7 = arith.constant 0 : index
    %c0_8 = arith.constant 0 : index
    %7 = vector.load %arg4[%c0_6, %c0_7, %c0_8] : memref<1x128x256xbf16, #tpu.memory_space<vmem>>, vector<1x128x256xbf16>
    %8 = vector.shape_cast %7 : vector<1x128x256xbf16> to vector<128x256xbf16>
    %cst = arith.constant dense<0.000000e+00> : vector<8x128xf32>
    %9 = tpu.matmul %4, %6, %cst {dimension_numbers = #tpu.dot_dimension_numbers<[1], [1], [0], [0], [0, 0, 1, 0], [], []>} : vector<8x256xbf16>, vector<128x256xbf16>, vector<8x128xf32> -> vector<8x128xf32>
    %cst_9 = arith.constant 0.0707106814 : f32
    %10 = vector.broadcast %cst_9 : f32 to vector<8x128xf32>
    %11 = arith.mulf %9, %10 : vector<8x128xf32>
    %c0_10 = arith.constant 0 : index
    %c0_11 = arith.constant 0 : index
    %c0_12 = arith.constant 0 : index
    %12 = vector.load %arg5[%c0_10, %c0_11, %c0_12] : memref<1x8x128xf32, #tpu.memory_space<vmem>>, vector<1x8x128xf32>
    %13 = vector.shape_cast %12 : vector<1x8x128xf32> to vector<8x128xf32>
    %14 = vector.shape_cast %11 : vector<8x128xf32> to vector<1x8x128xf32>
    tpu.vector_store %arg5[%c0_10, %c0_11, %c0_12], %14 {strides = array<i32>} : memref<1x8x128xf32, #tpu.memory_space<vmem>>, vector<1x8x128xf32>,
    %c0_13 = arith.constant 0 : index
    %c0_14 = arith.constant 0 : index
    %15 = vector.load %arg7[%c0_13, %c0_14] : memref<8x256xf32, #tpu.memory_space<vmem>>, vector<8x256xf32>
    %16 = arith.truncf %11 : vector<8x128xf32> to vector<8x128xbf16>
    %cst_15 = arith.constant dense<0.000000e+00> : vector<8x256xf32>
    %17 = tpu.matmul %16, %8, %cst_15 {dimension_numbers = #tpu.dot_dimension_numbers<[1], [0], [0], [1], [0, 0, 1, 1], [], []>} : vector<8x128xbf16>, vector<128x256xbf16>, vector<8x256xf32> -> vector<8x256xf32>
    %18 = arith.addf %15, %17 : vector<8x256xf32>
    %c0_16 = arith.constant 0 : index
    %c0_17 = arith.constant 0 : index
    %19 = vector.load %arg7[%c0_16, %c0_17] : memref<8x256xf32, #tpu.memory_space<vmem>>, vector<8x256xf32>
    tpu.vector_store %arg7[%c0_16, %c0_17], %18 {strides = array<i32>} : memref<8x256xf32, #tpu.memory_space<vmem>>, vector<8x256xf32>,
    %c0_i32_18 = arith.constant 0 : i32
    %20 = arith.cmpi eq, %arg1, %c0_i32_18 : i32
    %21 = arith.extui %20 : i1 to i32
    %c0_i32_19 = arith.constant 0 : i32
    %22 = arith.cmpi ne, %21, %c0_i32_19 : i32
    scf.if %22 {
      %c0_20 = arith.constant 0 : index
      %c0_21 = arith.constant 0 : index
      %23 = vector.load %arg7[%c0_20, %c0_21] : memref<8x256xf32, #tpu.memory_space<vmem>>, vector<8x256xf32>
      %24 = arith.truncf %23 : vector<8x256xf32> to vector<8x256xbf16>
      %c0_22 = arith.constant 0 : index
      %c0_23 = arith.constant 0 : index
      %c0_24 = arith.constant 0 : index
      %25 = vector.load %arg6[%c0_22, %c0_23, %c0_24] : memref<1x8x256xbf16, #tpu.memory_space<vmem>>, vector<1x8x256xbf16>
      %26 = vector.shape_cast %25 : vector<1x8x256xbf16> to vector<8x256xbf16>
      %27 = vector.shape_cast %24 : vector<8x256xbf16> to vector<1x8x256xbf16>
      tpu.vector_store %arg6[%c0_22, %c0_23, %c0_24], %27 {strides = array<i32>} : memref<1x8x256xbf16, #tpu.memory_space<vmem>>, vector<1x8x256xbf16>,
    } else {
    }
    return
  }
  func.func @transform_0(%arg0: i32, %arg1: i32) -> (i32, i32, i32) {
    %c0_i32 = arith.constant 0 : i32
    %c0_i32_0 = arith.constant 0 : i32
    %c0_i32_1 = arith.constant 0 : i32
    return %arg0, %c0_i32, %c0_i32_0 : i32, i32, i32
  }
  func.func @transform_1(%arg0: i32, %arg1: i32) -> (i32, i32, i32) {
    %c0_i32 = arith.constant 0 : i32
    %c0_i32_0 = arith.constant 0 : i32
    return %arg0, %arg1, %c0_i32 : i32, i32, i32
  }
  func.func @transform_2(%arg0: i32, %arg1: i32) -> (i32, i32, i32) {
    %c0_i32 = arith.constant 0 : i32
    %c0_i32_0 = arith.constant 0 : i32
    return %arg0, %arg1, %c0_i32 : i32, i32, i32
  }
  func.func @transform_3(%arg0: i32, %arg1: i32) -> (i32, i32, i32) {
    %c0_i32 = arith.constant 0 : i32
    %c0_i32_0 = arith.constant 0 : i32
    return %arg0, %c0_i32, %arg1 : i32, i32, i32
  }
  func.func @transform_4(%arg0: i32, %arg1: i32) -> (i32, i32, i32) {
    %c0_i32 = arith.constant 0 : i32
    %c0_i32_0 = arith.constant 0 : i32
    %c0_i32_1 = arith.constant 0 : i32
    return %arg0, %c0_i32, %c0_i32_0 : i32, i32, i32
  }
}

module attributes {stable_mosaic.version = 11 : i64} {
  func.func @_matmul_kernel(%arg0: i32, %arg1: i32, %arg2: i32, %arg3: memref<128x256xbf16, #tpu.memory_space<vmem>>, %arg4: memref<256x128xbf16, #tpu.memory_space<vmem>>, %arg5: memref<1x128xf32, #tpu.memory_space<vmem>>, %arg6: memref<128x128xf32, #tpu.memory_space<vmem>>, %arg7: memref<128x128xf32, #tpu.memory_space<vmem>>) attributes {dimension_semantics = [#tpu.dimension_semantics<parallel>, #tpu.dimension_semantics<parallel>, #tpu.dimension_semantics<arbitrary>], iteration_bounds = array<i64: 1, 1, 1>, scalar_prefetch = 0 : i64, scratch_operands = 1 : i64, tpu.core_type = #tpu.core_type<tc>, window_params = [{transform_indices = @transform_0, window_bounds = array<i64: 128, 256>}, {transform_indices = @transform_1, window_bounds = array<i64: 256, 128>}, {transform_indices = @transform_2, window_bounds = array<i64: 1, 128>}, {transform_indices = @transform_3, window_bounds = array<i64: 128, 128>}]} {
    %c0_i32 = arith.constant 0 : i32
    %0 = arith.cmpi eq, %arg2, %c0_i32 : i32
    %1 = arith.extui %0 : i1 to i32
    %c0_i32_0 = arith.constant 0 : i32
    %2 = arith.cmpi ne, %1, %c0_i32_0 : i32
    scf.if %2 {
      %cst_10 = arith.constant 0.000000e+00 : f32
      %12 = vector.broadcast %cst_10 : f32 to vector<128x128xf32>
      %c0_11 = arith.constant 0 : index
      %c0_12 = arith.constant 0 : index
      %13 = vector.load %arg7[%c0_11, %c0_12] : memref<128x128xf32, #tpu.memory_space<vmem>>, vector<128x128xf32>
      tpu.vector_store %arg7[%c0_11, %c0_12], %12 {strides = array<i32>} : memref<128x128xf32, #tpu.memory_space<vmem>>, vector<128x128xf32>,
    } else {
    }
    %c0 = arith.constant 0 : index
    %c0_1 = arith.constant 0 : index
    %3 = vector.load %arg7[%c0, %c0_1] : memref<128x128xf32, #tpu.memory_space<vmem>>, vector<128x128xf32>
    %c0_2 = arith.constant 0 : index
    %c0_3 = arith.constant 0 : index
    %4 = vector.load %arg3[%c0_2, %c0_3] : memref<128x256xbf16, #tpu.memory_space<vmem>>, vector<128x256xbf16>
    %c0_4 = arith.constant 0 : index
    %c0_5 = arith.constant 0 : index
    %5 = vector.load %arg4[%c0_4, %c0_5] : memref<256x128xbf16, #tpu.memory_space<vmem>>, vector<256x128xbf16>
    %cst = arith.constant dense<0.000000e+00> : vector<128x128xf32>
    %6 = tpu.matmul %4, %5, %cst {dimension_numbers = #tpu.dot_dimension_numbers<[1], [0], [0], [1], [0, 0, 1, 1], [], []>} : vector<128x256xbf16>, vector<256x128xbf16>, vector<128x128xf32> -> vector<128x128xf32>
    %7 = arith.addf %3, %6 : vector<128x128xf32>
    %c0_6 = arith.constant 0 : index
    %c0_7 = arith.constant 0 : index
    %8 = vector.load %arg7[%c0_6, %c0_7] : memref<128x128xf32, #tpu.memory_space<vmem>>, vector<128x128xf32>
    tpu.vector_store %arg7[%c0_6, %c0_7], %7 {strides = array<i32>} : memref<128x128xf32, #tpu.memory_space<vmem>>, vector<128x128xf32>,
    %c0_i32_8 = arith.constant 0 : i32
    %9 = arith.cmpi eq, %arg2, %c0_i32_8 : i32
    %10 = arith.extui %9 : i1 to i32
    %c0_i32_9 = arith.constant 0 : i32
    %11 = arith.cmpi ne, %10, %c0_i32_9 : i32
    scf.if %11 {
      %c0_10 = arith.constant 0 : index
      %c0_11 = arith.constant 0 : index
      %12 = vector.load %arg7[%c0_10, %c0_11] : memref<128x128xf32, #tpu.memory_space<vmem>>, vector<128x128xf32>
      %c0_12 = arith.constant 0 : index
      %c0_13 = arith.constant 0 : index
      %13 = vector.load %arg5[%c0_12, %c0_13] : memref<1x128xf32, #tpu.memory_space<vmem>>, vector<1x128xf32>
      %14 = vector.broadcast %13 : vector<1x128xf32> to vector<128x128xf32>
      %15 = arith.addf %12, %14 : vector<128x128xf32>
      %cst_14 = arith.constant 0.000000e+00 : f32
      %16 = vector.broadcast %cst_14 : f32 to vector<128x128xf32>
      %17 = arith.maximumf %15, %16 : vector<128x128xf32>
      %c0_15 = arith.constant 0 : index
      %c0_16 = arith.constant 0 : index
      %18 = vector.load %arg6[%c0_15, %c0_16] : memref<128x128xf32, #tpu.memory_space<vmem>>, vector<128x128xf32>
      tpu.vector_store %arg6[%c0_15, %c0_16], %17 {strides = array<i32>} : memref<128x128xf32, #tpu.memory_space<vmem>>, vector<128x128xf32>,
    } else {
    }
    return
  }
  func.func @transform_0(%arg0: i32, %arg1: i32, %arg2: i32) -> (i32, i32) {
    %c0_i32 = arith.constant 0 : i32
    return %arg0, %arg2 : i32, i32
  }
  func.func @transform_1(%arg0: i32, %arg1: i32, %arg2: i32) -> (i32, i32) {
    %c0_i32 = arith.constant 0 : i32
    return %arg2, %arg1 : i32, i32
  }
  func.func @transform_2(%arg0: i32, %arg1: i32, %arg2: i32) -> (i32, i32) {
    %c0_i32 = arith.constant 0 : i32
    %c0_i32_0 = arith.constant 0 : i32
    return %c0_i32, %arg1 : i32, i32
  }
  func.func @transform_3(%arg0: i32, %arg1: i32, %arg2: i32) -> (i32, i32) {
    %c0_i32 = arith.constant 0 : i32
    return %arg0, %arg1 : i32, i32
  }
}

module attributes {stable_mosaic.version = 11 : i64} {
  func.func @_matmul_kernel(%arg0: i32, %arg1: i32, %arg2: i32, %arg3: memref<8x128xbf16, #tpu.memory_space<vmem>>, %arg4: memref<128x256xbf16, #tpu.memory_space<vmem>>, %arg5: memref<1x256xf32, #tpu.memory_space<vmem>>, %arg6: memref<8x256xf32, #tpu.memory_space<vmem>>, %arg7: memref<8x256xf32, #tpu.memory_space<vmem>>) attributes {dimension_semantics = [#tpu.dimension_semantics<parallel>, #tpu.dimension_semantics<parallel>, #tpu.dimension_semantics<arbitrary>], iteration_bounds = array<i64: 1, 8, 1>, scalar_prefetch = 0 : i64, scratch_operands = 1 : i64, tpu.core_type = #tpu.core_type<tc>, window_params = [{transform_indices = @transform_0, window_bounds = array<i64: 8, 128>}, {transform_indices = @transform_1, window_bounds = array<i64: 128, 256>}, {transform_indices = @transform_2, window_bounds = array<i64: 1, 256>}, {transform_indices = @transform_3, window_bounds = array<i64: 8, 256>}]} {
    %c0_i32 = arith.constant 0 : i32
    %0 = arith.cmpi eq, %arg2, %c0_i32 : i32
    %1 = arith.extui %0 : i1 to i32
    %c0_i32_0 = arith.constant 0 : i32
    %2 = arith.cmpi ne, %1, %c0_i32_0 : i32
    scf.if %2 {
      %cst_10 = arith.constant 0.000000e+00 : f32
      %12 = vector.broadcast %cst_10 : f32 to vector<8x256xf32>
      %c0_11 = arith.constant 0 : index
      %c0_12 = arith.constant 0 : index
      %13 = vector.load %arg7[%c0_11, %c0_12] : memref<8x256xf32, #tpu.memory_space<vmem>>, vector<8x256xf32>
      tpu.vector_store %arg7[%c0_11, %c0_12], %12 {strides = array<i32>} : memref<8x256xf32, #tpu.memory_space<vmem>>, vector<8x256xf32>,
    } else {
    }
    %c0 = arith.constant 0 : index
    %c0_1 = arith.constant 0 : index
    %3 = vector.load %arg7[%c0, %c0_1] : memref<8x256xf32, #tpu.memory_space<vmem>>, vector<8x256xf32>
    %c0_2 = arith.constant 0 : index
    %c0_3 = arith.constant 0 : index
    %4 = vector.load %arg3[%c0_2, %c0_3] : memref<8x128xbf16, #tpu.memory_space<vmem>>, vector<8x128xbf16>
    %c0_4 = arith.constant 0 : index
    %c0_5 = arith.constant 0 : index
    %5 = vector.load %arg4[%c0_4, %c0_5] : memref<128x256xbf16, #tpu.memory_space<vmem>>, vector<128x256xbf16>
    %cst = arith.constant dense<0.000000e+00> : vector<8x256xf32>
    %6 = tpu.matmul %4, %5, %cst {dimension_numbers = #tpu.dot_dimension_numbers<[1], [0], [0], [1], [0, 0, 1, 1], [], []>} : vector<8x128xbf16>, vector<128x256xbf16>, vector<8x256xf32> -> vector<8x256xf32>
    %7 = arith.addf %3, %6 : vector<8x256xf32>
    %c0_6 = arith.constant 0 : index
    %c0_7 = arith.constant 0 : index
    %8 = vector.load %arg7[%c0_6, %c0_7] : memref<8x256xf32, #tpu.memory_space<vmem>>, vector<8x256xf32>
    tpu.vector_store %arg7[%c0_6, %c0_7], %7 {strides = array<i32>} : memref<8x256xf32, #tpu.memory_space<vmem>>, vector<8x256xf32>,
    %c0_i32_8 = arith.constant 0 : i32
    %9 = arith.cmpi eq, %arg2, %c0_i32_8 : i32
    %10 = arith.extui %9 : i1 to i32
    %c0_i32_9 = arith.constant 0 : i32
    %11 = arith.cmpi ne, %10, %c0_i32_9 : i32
    scf.if %11 {
      %c0_10 = arith.constant 0 : index
      %c0_11 = arith.constant 0 : index
      %12 = vector.load %arg7[%c0_10, %c0_11] : memref<8x256xf32, #tpu.memory_space<vmem>>, vector<8x256xf32>
      %c0_12 = arith.constant 0 : index
      %c0_13 = arith.constant 0 : index
      %13 = vector.load %arg5[%c0_12, %c0_13] : memref<1x256xf32, #tpu.memory_space<vmem>>, vector<1x256xf32>
      %14 = vector.broadcast %13 : vector<1x256xf32> to vector<8x256xf32>
      %15 = arith.addf %12, %14 : vector<8x256xf32>
      %cst_14 = arith.constant 0.000000e+00 : f32
      %16 = vector.broadcast %cst_14 : f32 to vector<8x256xf32>
      %17 = arith.maximumf %15, %16 : vector<8x256xf32>
      %c0_15 = arith.constant 0 : index
      %c0_16 = arith.constant 0 : index
      %18 = vector.load %arg6[%c0_15, %c0_16] : memref<8x256xf32, #tpu.memory_space<vmem>>, vector<8x256xf32>
      tpu.vector_store %arg6[%c0_15, %c0_16], %17 {strides = array<i32>} : memref<8x256xf32, #tpu.memory_space<vmem>>, vector<8x256xf32>,
    } else {
    }
    return
  }
  func.func @transform_0(%arg0: i32, %arg1: i32, %arg2: i32) -> (i32, i32) {
    %c0_i32 = arith.constant 0 : i32
    return %arg0, %arg2 : i32, i32
  }
  func.func @transform_1(%arg0: i32, %arg1: i32, %arg2: i32) -> (i32, i32) {
    %c0_i32 = arith.constant 0 : i32
    return %arg2, %arg1 : i32, i32
  }
  func.func @transform_2(%arg0: i32, %arg1: i32, %arg2: i32) -> (i32, i32) {
    %c0_i32 = arith.constant 0 : i32
    %c0_i32_0 = arith.constant 0 : i32
    return %c0_i32, %arg1 : i32, i32
  }
  func.func @transform_3(%arg0: i32, %arg1: i32, %arg2: i32) -> (i32, i32) {
    %c0_i32 = arith.constant 0 : i32
    return %arg0, %arg1 : i32, i32
  }
}

module attributes {stable_mosaic.version = 11 : i64} {
  func.func @_matmul_kernel(%arg0: i32, %arg1: i32, %arg2: i32, %arg3: memref<8x512xbf16, #tpu.memory_space<vmem>>, %arg4: memref<512x256xbf16, #tpu.memory_space<vmem>>, %arg5: memref<1x256xf32, #tpu.memory_space<vmem>>, %arg6: memref<8x256xbf16, #tpu.memory_space<vmem>>, %arg7: memref<8x256xf32, #tpu.memory_space<vmem>>) attributes {dimension_semantics = [#tpu.dimension_semantics<parallel>, #tpu.dimension_semantics<parallel>, #tpu.dimension_semantics<arbitrary>], iteration_bounds = array<i64: 1, 2, 4>, scalar_prefetch = 0 : i64, scratch_operands = 1 : i64, tpu.core_type = #tpu.core_type<tc>, window_params = [{transform_indices = @transform_0, window_bounds = array<i64: 8, 512>}, {transform_indices = @transform_1, window_bounds = array<i64: 512, 256>}, {transform_indices = @transform_2, window_bounds = array<i64: 1, 256>}, {transform_indices = @transform_3, window_bounds = array<i64: 8, 256>}]} {
    %c0_i32 = arith.constant 0 : i32
    %0 = arith.cmpi eq, %arg2, %c0_i32 : i32
    %1 = arith.extui %0 : i1 to i32
    %c0_i32_0 = arith.constant 0 : i32
    %2 = arith.cmpi ne, %1, %c0_i32_0 : i32
    scf.if %2 {
      %cst_9 = arith.constant 0.000000e+00 : f32
      %12 = vector.broadcast %cst_9 : f32 to vector<8x256xf32>
      %c0_10 = arith.constant 0 : index
      %c0_11 = arith.constant 0 : index
      %13 = vector.load %arg7[%c0_10, %c0_11] : memref<8x256xf32, #tpu.memory_space<vmem>>, vector<8x256xf32>
      tpu.vector_store %arg7[%c0_10, %c0_11], %12 {strides = array<i32>} : memref<8x256xf32, #tpu.memory_space<vmem>>, vector<8x256xf32>,
    } else {
    }
    %c0 = arith.constant 0 : index
    %c0_1 = arith.constant 0 : index
    %3 = vector.load %arg7[%c0, %c0_1] : memref<8x256xf32, #tpu.memory_space<vmem>>, vector<8x256xf32>
    %c0_2 = arith.constant 0 : index
    %c0_3 = arith.constant 0 : index
    %4 = vector.load %arg3[%c0_2, %c0_3] : memref<8x512xbf16, #tpu.memory_space<vmem>>, vector<8x512xbf16>
    %c0_4 = arith.constant 0 : index
    %c0_5 = arith.constant 0 : index
    %5 = vector.load %arg4[%c0_4, %c0_5] : memref<512x256xbf16, #tpu.memory_space<vmem>>, vector<512x256xbf16>
    %cst = arith.constant dense<0.000000e+00> : vector<8x256xf32>
    %6 = tpu.matmul %4, %5, %cst {dimension_numbers = #tpu.dot_dimension_numbers<[1], [0], [0], [1], [0, 0, 1, 1], [], []>} : vector<8x512xbf16>, vector<512x256xbf16>, vector<8x256xf32> -> vector<8x256xf32>
    %7 = arith.addf %3, %6 : vector<8x256xf32>
    %c0_6 = arith.constant 0 : index
    %c0_7 = arith.constant 0 : index
    %8 = vector.load %arg7[%c0_6, %c0_7] : memref<8x256xf32, #tpu.memory_space<vmem>>, vector<8x256xf32>
    tpu.vector_store %arg7[%c0_6, %c0_7], %7 {strides = array<i32>} : memref<8x256xf32, #tpu.memory_space<vmem>>, vector<8x256xf32>,
    %c3_i32 = arith.constant 3 : i32
    %9 = arith.cmpi eq, %arg2, %c3_i32 : i32
    %10 = arith.extui %9 : i1 to i32
    %c0_i32_8 = arith.constant 0 : i32
    %11 = arith.cmpi ne, %10, %c0_i32_8 : i32
    scf.if %11 {
      %c0_9 = arith.constant 0 : index
      %c0_10 = arith.constant 0 : index
      %12 = vector.load %arg7[%c0_9, %c0_10] : memref<8x256xf32, #tpu.memory_space<vmem>>, vector<8x256xf32>
      %c0_11 = arith.constant 0 : index
      %c0_12 = arith.constant 0 : index
      %13 = vector.load %arg5[%c0_11, %c0_12] : memref<1x256xf32, #tpu.memory_space<vmem>>, vector<1x256xf32>
      %14 = vector.broadcast %13 : vector<1x256xf32> to vector<8x256xf32>
      %15 = arith.addf %12, %14 : vector<8x256xf32>
      %16 = arith.truncf %15 : vector<8x256xf32> to vector<8x256xbf16>
      %c0_13 = arith.constant 0 : index
      %c0_14 = arith.constant 0 : index
      %17 = vector.load %arg6[%c0_13, %c0_14] : memref<8x256xbf16, #tpu.memory_space<vmem>>, vector<8x256xbf16>
      tpu.vector_store %arg6[%c0_13, %c0_14], %16 {strides = array<i32>} : memref<8x256xbf16, #tpu.memory_space<vmem>>, vector<8x256xbf16>,
    } else {
    }
    return
  }
  func.func @transform_0(%arg0: i32, %arg1: i32, %arg2: i32) -> (i32, i32) {
    %c0_i32 = arith.constant 0 : i32
    return %arg0, %arg2 : i32, i32
  }
  func.func @transform_1(%arg0: i32, %arg1: i32, %arg2: i32) -> (i32, i32) {
    %c0_i32 = arith.constant 0 : i32
    return %arg2, %arg1 : i32, i32
  }
  func.func @transform_2(%arg0: i32, %arg1: i32, %arg2: i32) -> (i32, i32) {
    %c0_i32 = arith.constant 0 : i32
    %c0_i32_0 = arith.constant 0 : i32
    return %c0_i32, %arg1 : i32, i32
  }
  func.func @transform_3(%arg0: i32, %arg1: i32, %arg2: i32) -> (i32, i32) {
    %c0_i32 = arith.constant 0 : i32
    return %arg0, %arg1 : i32, i32
  }
}

module attributes {stable_mosaic.version = 11 : i64} {
  func.func @_cross_attn_kernel(%arg0: i32, %arg1: i32, %arg2: memref<1x8x256xbf16, #tpu.memory_space<vmem>>, %arg3: memref<1x128x256xbf16, #tpu.memory_space<vmem>>, %arg4: memref<1x128x256xbf16, #tpu.memory_space<vmem>>, %arg5: memref<1x8x128xf32, #tpu.memory_space<vmem>>, %arg6: memref<1x8x256xbf16, #tpu.memory_space<vmem>>, %arg7: memref<8x256xf32, #tpu.memory_space<vmem>>) attributes {dimension_semantics = [#tpu.dimension_semantics<parallel>, #tpu.dimension_semantics<arbitrary>], iteration_bounds = array<i64: 2, 1>, scalar_prefetch = 0 : i64, scratch_operands = 1 : i64, tpu.core_type = #tpu.core_type<tc>, window_params = [{transform_indices = @transform_0, window_bounds = array<i64: 1, 8, 256>}, {transform_indices = @transform_1, window_bounds = array<i64: 1, 128, 256>}, {transform_indices = @transform_2, window_bounds = array<i64: 1, 128, 256>}, {transform_indices = @transform_3, window_bounds = array<i64: 1, 8, 128>}, {transform_indices = @transform_4, window_bounds = array<i64: 1, 8, 256>}]} {
    %c0_i32 = arith.constant 0 : i32
    %0 = arith.cmpi eq, %arg1, %c0_i32 : i32
    %1 = arith.extui %0 : i1 to i32
    %c0_i32_0 = arith.constant 0 : i32
    %2 = arith.cmpi ne, %1, %c0_i32_0 : i32
    scf.if %2 {
      %cst_20 = arith.constant 0.000000e+00 : f32
      %23 = vector.broadcast %cst_20 : f32 to vector<8x256xf32>
      %c0_21 = arith.constant 0 : index
      %c0_22 = arith.constant 0 : index
      %24 = vector.load %arg7[%c0_21, %c0_22] : memref<8x256xf32, #tpu.memory_space<vmem>>, vector<8x256xf32>
      tpu.vector_store %arg7[%c0_21, %c0_22], %23 {strides = array<i32>} : memref<8x256xf32, #tpu.memory_space<vmem>>, vector<8x256xf32>,
    } else {
    }
    %c0 = arith.constant 0 : index
    %c0_1 = arith.constant 0 : index
    %c0_2 = arith.constant 0 : index
    %3 = vector.load %arg2[%c0, %c0_1, %c0_2] : memref<1x8x256xbf16, #tpu.memory_space<vmem>>, vector<1x8x256xbf16>
    %4 = vector.shape_cast %3 : vector<1x8x256xbf16> to vector<8x256xbf16>
    %c0_3 = arith.constant 0 : index
    %c0_4 = arith.constant 0 : index
    %c0_5 = arith.constant 0 : index
    %5 = vector.load %arg3[%c0_3, %c0_4, %c0_5] : memref<1x128x256xbf16, #tpu.memory_space<vmem>>, vector<1x128x256xbf16>
    %6 = vector.shape_cast %5 : vector<1x128x256xbf16> to vector<128x256xbf16>
    %c0_6 = arith.constant 0 : index
    %c0_7 = arith.constant 0 : index
    %c0_8 = arith.constant 0 : index
    %7 = vector.load %arg4[%c0_6, %c0_7, %c0_8] : memref<1x128x256xbf16, #tpu.memory_space<vmem>>, vector<1x128x256xbf16>
    %8 = vector.shape_cast %7 : vector<1x128x256xbf16> to vector<128x256xbf16>
    %cst = arith.constant dense<0.000000e+00> : vector<8x128xf32>
    %9 = tpu.matmul %4, %6, %cst {dimension_numbers = #tpu.dot_dimension_numbers<[1], [1], [0], [0], [0, 0, 1, 0], [], []>} : vector<8x256xbf16>, vector<128x256xbf16>, vector<8x128xf32> -> vector<8x128xf32>
    %cst_9 = arith.constant 0.0707106814 : f32
    %10 = vector.broadcast %cst_9 : f32 to vector<8x128xf32>
    %11 = arith.mulf %9, %10 : vector<8x128xf32>
    %c0_10 = arith.constant 0 : index
    %c0_11 = arith.constant 0 : index
    %c0_12 = arith.constant 0 : index
    %12 = vector.load %arg5[%c0_10, %c0_11, %c0_12] : memref<1x8x128xf32, #tpu.memory_space<vmem>>, vector<1x8x128xf32>
    %13 = vector.shape_cast %12 : vector<1x8x128xf32> to vector<8x128xf32>
    %14 = vector.shape_cast %11 : vector<8x128xf32> to vector<1x8x128xf32>
    tpu.vector_store %arg5[%c0_10, %c0_11, %c0_12], %14 {strides = array<i32>} : memref<1x8x128xf32, #tpu.memory_space<vmem>>, vector<1x8x128xf32>,
    %c0_13 = arith.constant 0 : index
    %c0_14 = arith.constant 0 : index
    %15 = vector.load %arg7[%c0_13, %c0_14] : memref<8x256xf32, #tpu.memory_space<vmem>>, vector<8x256xf32>
    %16 = arith.truncf %11 : vector<8x128xf32> to vector<8x128xbf16>
    %cst_15 = arith.constant dense<0.000000e+00> : vector<8x256xf32>
    %17 = tpu.matmul %16, %8, %cst_15 {dimension_numbers = #tpu.dot_dimension_numbers<[1], [0], [0], [1], [0, 0, 1, 1], [], []>} : vector<8x128xbf16>, vector<128x256xbf16>, vector<8x256xf32> -> vector<8x256xf32>
    %18 = arith.addf %15, %17 : vector<8x256xf32>
    %c0_16 = arith.constant 0 : index
    %c0_17 = arith.constant 0 : index
    %19 = vector.load %arg7[%c0_16, %c0_17] : memref<8x256xf32, #tpu.memory_space<vmem>>, vector<8x256xf32>
    tpu.vector_store %arg7[%c0_16, %c0_17], %18 {strides = array<i32>} : memref<8x256xf32, #tpu.memory_space<vmem>>, vector<8x256xf32>,
    %c0_i32_18 = arith.constant 0 : i32
    %20 = arith.cmpi eq, %arg1, %c0_i32_18 : i32
    %21 = arith.extui %20 : i1 to i32
    %c0_i32_19 = arith.constant 0 : i32
    %22 = arith.cmpi ne, %21, %c0_i32_19 : i32
    scf.if %22 {
      %c0_20 = arith.constant 0 : index
      %c0_21 = arith.constant 0 : index
      %23 = vector.load %arg7[%c0_20, %c0_21] : memref<8x256xf32, #tpu.memory_space<vmem>>, vector<8x256xf32>
      %24 = arith.truncf %23 : vector<8x256xf32> to vector<8x256xbf16>
      %c0_22 = arith.constant 0 : index
      %c0_23 = arith.constant 0 : index
      %c0_24 = arith.constant 0 : index
      %25 = vector.load %arg6[%c0_22, %c0_23, %c0_24] : memref<1x8x256xbf16, #tpu.memory_space<vmem>>, vector<1x8x256xbf16>
      %26 = vector.shape_cast %25 : vector<1x8x256xbf16> to vector<8x256xbf16>
      %27 = vector.shape_cast %24 : vector<8x256xbf16> to vector<1x8x256xbf16>
      tpu.vector_store %arg6[%c0_22, %c0_23, %c0_24], %27 {strides = array<i32>} : memref<1x8x256xbf16, #tpu.memory_space<vmem>>, vector<1x8x256xbf16>,
    } else {
    }
    return
  }
  func.func @transform_0(%arg0: i32, %arg1: i32) -> (i32, i32, i32) {
    %c0_i32 = arith.constant 0 : i32
    %c0_i32_0 = arith.constant 0 : i32
    %c0_i32_1 = arith.constant 0 : i32
    return %arg0, %c0_i32, %c0_i32_0 : i32, i32, i32
  }
  func.func @transform_1(%arg0: i32, %arg1: i32) -> (i32, i32, i32) {
    %c0_i32 = arith.constant 0 : i32
    %c0_i32_0 = arith.constant 0 : i32
    return %arg0, %arg1, %c0_i32 : i32, i32, i32
  }
  func.func @transform_2(%arg0: i32, %arg1: i32) -> (i32, i32, i32) {
    %c0_i32 = arith.constant 0 : i32
    %c0_i32_0 = arith.constant 0 : i32
    return %arg0, %arg1, %c0_i32 : i32, i32, i32
  }
  func.func @transform_3(%arg0: i32, %arg1: i32) -> (i32, i32, i32) {
    %c0_i32 = arith.constant 0 : i32
    %c0_i32_0 = arith.constant 0 : i32
    return %arg0, %c0_i32, %arg1 : i32, i32, i32
  }
  func.func @transform_4(%arg0: i32, %arg1: i32) -> (i32, i32, i32) {
    %c0_i32 = arith.constant 0 : i32
    %c0_i32_0 = arith.constant 0 : i32
    %c0_i32_1 = arith.constant 0 : i32
    return %arg0, %c0_i32, %c0_i32_0 : i32, i32, i32
  }
}

module attributes {stable_mosaic.version = 11 : i64} {
  func.func @_matmul_kernel(%arg0: i32, %arg1: i32, %arg2: i32, %arg3: memref<16x256xbf16, #tpu.memory_space<vmem>>, %arg4: memref<256x128xbf16, #tpu.memory_space<vmem>>, %arg5: memref<1x128xf32, #tpu.memory_space<vmem>>, %arg6: memref<16x128xf32, #tpu.memory_space<vmem>>, %arg7: memref<16x128xf32, #tpu.memory_space<vmem>>) attributes {dimension_semantics = [#tpu.dimension_semantics<parallel>, #tpu.dimension_semantics<parallel>, #tpu.dimension_semantics<arbitrary>], iteration_bounds = array<i64: 1, 1, 1>, scalar_prefetch = 0 : i64, scratch_operands = 1 : i64, tpu.core_type = #tpu.core_type<tc>, window_params = [{transform_indices = @transform_0, window_bounds = array<i64: 16, 256>}, {transform_indices = @transform_1, window_bounds = array<i64: 256, 128>}, {transform_indices = @transform_2, window_bounds = array<i64: 1, 128>}, {transform_indices = @transform_3, window_bounds = array<i64: 16, 128>}]} {
    %c0_i32 = arith.constant 0 : i32
    %0 = arith.cmpi eq, %arg2, %c0_i32 : i32
    %1 = arith.extui %0 : i1 to i32
    %c0_i32_0 = arith.constant 0 : i32
    %2 = arith.cmpi ne, %1, %c0_i32_0 : i32
    scf.if %2 {
      %cst_10 = arith.constant 0.000000e+00 : f32
      %12 = vector.broadcast %cst_10 : f32 to vector<16x128xf32>
      %c0_11 = arith.constant 0 : index
      %c0_12 = arith.constant 0 : index
      %13 = vector.load %arg7[%c0_11, %c0_12] : memref<16x128xf32, #tpu.memory_space<vmem>>, vector<16x128xf32>
      tpu.vector_store %arg7[%c0_11, %c0_12], %12 {strides = array<i32>} : memref<16x128xf32, #tpu.memory_space<vmem>>, vector<16x128xf32>,
    } else {
    }
    %c0 = arith.constant 0 : index
    %c0_1 = arith.constant 0 : index
    %3 = vector.load %arg7[%c0, %c0_1] : memref<16x128xf32, #tpu.memory_space<vmem>>, vector<16x128xf32>
    %c0_2 = arith.constant 0 : index
    %c0_3 = arith.constant 0 : index
    %4 = vector.load %arg3[%c0_2, %c0_3] : memref<16x256xbf16, #tpu.memory_space<vmem>>, vector<16x256xbf16>
    %c0_4 = arith.constant 0 : index
    %c0_5 = arith.constant 0 : index
    %5 = vector.load %arg4[%c0_4, %c0_5] : memref<256x128xbf16, #tpu.memory_space<vmem>>, vector<256x128xbf16>
    %cst = arith.constant dense<0.000000e+00> : vector<16x128xf32>
    %6 = tpu.matmul %4, %5, %cst {dimension_numbers = #tpu.dot_dimension_numbers<[1], [0], [0], [1], [0, 0, 1, 1], [], []>} : vector<16x256xbf16>, vector<256x128xbf16>, vector<16x128xf32> -> vector<16x128xf32>
    %7 = arith.addf %3, %6 : vector<16x128xf32>
    %c0_6 = arith.constant 0 : index
    %c0_7 = arith.constant 0 : index
    %8 = vector.load %arg7[%c0_6, %c0_7] : memref<16x128xf32, #tpu.memory_space<vmem>>, vector<16x128xf32>
    tpu.vector_store %arg7[%c0_6, %c0_7], %7 {strides = array<i32>} : memref<16x128xf32, #tpu.memory_space<vmem>>, vector<16x128xf32>,
    %c0_i32_8 = arith.constant 0 : i32
    %9 = arith.cmpi eq, %arg2, %c0_i32_8 : i32
    %10 = arith.extui %9 : i1 to i32
    %c0_i32_9 = arith.constant 0 : i32
    %11 = arith.cmpi ne, %10, %c0_i32_9 : i32
    scf.if %11 {
      %c0_10 = arith.constant 0 : index
      %c0_11 = arith.constant 0 : index
      %12 = vector.load %arg7[%c0_10, %c0_11] : memref<16x128xf32, #tpu.memory_space<vmem>>, vector<16x128xf32>
      %c0_12 = arith.constant 0 : index
      %c0_13 = arith.constant 0 : index
      %13 = vector.load %arg5[%c0_12, %c0_13] : memref<1x128xf32, #tpu.memory_space<vmem>>, vector<1x128xf32>
      %14 = vector.broadcast %13 : vector<1x128xf32> to vector<16x128xf32>
      %15 = arith.addf %12, %14 : vector<16x128xf32>
      %c0_14 = arith.constant 0 : index
      %c0_15 = arith.constant 0 : index
      %16 = vector.load %arg6[%c0_14, %c0_15] : memref<16x128xf32, #tpu.memory_space<vmem>>, vector<16x128xf32>
      tpu.vector_store %arg6[%c0_14, %c0_15], %15 {strides = array<i32>} : memref<16x128xf32, #tpu.memory_space<vmem>>, vector<16x128xf32>,
    } else {
    }
    return
  }
  func.func @transform_0(%arg0: i32, %arg1: i32, %arg2: i32) -> (i32, i32) {
    %c0_i32 = arith.constant 0 : i32
    return %arg0, %arg2 : i32, i32
  }
  func.func @transform_1(%arg0: i32, %arg1: i32, %arg2: i32) -> (i32, i32) {
    %c0_i32 = arith.constant 0 : i32
    return %arg2, %arg1 : i32, i32
  }
  func.func @transform_2(%arg0: i32, %arg1: i32, %arg2: i32) -> (i32, i32) {
    %c0_i32 = arith.constant 0 : i32
    %c0_i32_0 = arith.constant 0 : i32
    return %c0_i32, %arg1 : i32, i32
  }
  func.func @transform_3(%arg0: i32, %arg1: i32, %arg2: i32) -> (i32, i32) {
    %c0_i32 = arith.constant 0 : i32
    return %arg0, %arg1 : i32, i32
  }
}

module attributes {stable_mosaic.version = 11 : i64} {
  func.func @_matmul_kernel(%arg0: i32, %arg1: i32, %arg2: i32, %arg3: memref<16x128xbf16, #tpu.memory_space<vmem>>, %arg4: memref<128x128xbf16, #tpu.memory_space<vmem>>, %arg5: memref<1x128xf32, #tpu.memory_space<vmem>>, %arg6: memref<16x128xbf16, #tpu.memory_space<vmem>>, %arg7: memref<16x128xf32, #tpu.memory_space<vmem>>) attributes {dimension_semantics = [#tpu.dimension_semantics<parallel>, #tpu.dimension_semantics<parallel>, #tpu.dimension_semantics<arbitrary>], iteration_bounds = array<i64: 1, 1, 1>, scalar_prefetch = 0 : i64, scratch_operands = 1 : i64, tpu.core_type = #tpu.core_type<tc>, window_params = [{transform_indices = @transform_0, window_bounds = array<i64: 16, 128>}, {transform_indices = @transform_1, window_bounds = array<i64: 128, 128>}, {transform_indices = @transform_2, window_bounds = array<i64: 1, 128>}, {transform_indices = @transform_3, window_bounds = array<i64: 16, 128>}]} {
    %c0_i32 = arith.constant 0 : i32
    %0 = arith.cmpi eq, %arg2, %c0_i32 : i32
    %1 = arith.extui %0 : i1 to i32
    %c0_i32_0 = arith.constant 0 : i32
    %2 = arith.cmpi ne, %1, %c0_i32_0 : i32
    scf.if %2 {
      %cst_10 = arith.constant 0.000000e+00 : f32
      %12 = vector.broadcast %cst_10 : f32 to vector<16x128xf32>
      %c0_11 = arith.constant 0 : index
      %c0_12 = arith.constant 0 : index
      %13 = vector.load %arg7[%c0_11, %c0_12] : memref<16x128xf32, #tpu.memory_space<vmem>>, vector<16x128xf32>
      tpu.vector_store %arg7[%c0_11, %c0_12], %12 {strides = array<i32>} : memref<16x128xf32, #tpu.memory_space<vmem>>, vector<16x128xf32>,
    } else {
    }
    %c0 = arith.constant 0 : index
    %c0_1 = arith.constant 0 : index
    %3 = vector.load %arg7[%c0, %c0_1] : memref<16x128xf32, #tpu.memory_space<vmem>>, vector<16x128xf32>
    %c0_2 = arith.constant 0 : index
    %c0_3 = arith.constant 0 : index
    %4 = vector.load %arg3[%c0_2, %c0_3] : memref<16x128xbf16, #tpu.memory_space<vmem>>, vector<16x128xbf16>
    %c0_4 = arith.constant 0 : index
    %c0_5 = arith.constant 0 : index
    %5 = vector.load %arg4[%c0_4, %c0_5] : memref<128x128xbf16, #tpu.memory_space<vmem>>, vector<128x128xbf16>
    %cst = arith.constant dense<0.000000e+00> : vector<16x128xf32>
    %6 = tpu.matmul %4, %5, %cst {dimension_numbers = #tpu.dot_dimension_numbers<[1], [0], [0], [1], [0, 0, 1, 1], [], []>} : vector<16x128xbf16>, vector<128x128xbf16>, vector<16x128xf32> -> vector<16x128xf32>
    %7 = arith.addf %3, %6 : vector<16x128xf32>
    %c0_6 = arith.constant 0 : index
    %c0_7 = arith.constant 0 : index
    %8 = vector.load %arg7[%c0_6, %c0_7] : memref<16x128xf32, #tpu.memory_space<vmem>>, vector<16x128xf32>
    tpu.vector_store %arg7[%c0_6, %c0_7], %7 {strides = array<i32>} : memref<16x128xf32, #tpu.memory_space<vmem>>, vector<16x128xf32>,
    %c0_i32_8 = arith.constant 0 : i32
    %9 = arith.cmpi eq, %arg2, %c0_i32_8 : i32
    %10 = arith.extui %9 : i1 to i32
    %c0_i32_9 = arith.constant 0 : i32
    %11 = arith.cmpi ne, %10, %c0_i32_9 : i32
    scf.if %11 {
      %c0_10 = arith.constant 0 : index
      %c0_11 = arith.constant 0 : index
      %12 = vector.load %arg7[%c0_10, %c0_11] : memref<16x128xf32, #tpu.memory_space<vmem>>, vector<16x128xf32>
      %c0_12 = arith.constant 0 : index
      %c0_13 = arith.constant 0 : index
      %13 = vector.load %arg5[%c0_12, %c0_13] : memref<1x128xf32, #tpu.memory_space<vmem>>, vector<1x128xf32>
      %14 = vector.broadcast %13 : vector<1x128xf32> to vector<16x128xf32>
      %15 = arith.addf %12, %14 : vector<16x128xf32>
      %16 = arith.truncf %15 : vector<16x128xf32> to vector<16x128xbf16>
      %c0_14 = arith.constant 0 : index
      %c0_15 = arith.constant 0 : index
      %17 = vector.load %arg6[%c0_14, %c0_15] : memref<16x128xbf16, #tpu.memory_space<vmem>>, vector<16x128xbf16>
      tpu.vector_store %arg6[%c0_14, %c0_15], %16 {strides = array<i32>} : memref<16x128xbf16, #tpu.memory_space<vmem>>, vector<16x128xbf16>,
    } else {
    }
    return
  }
  func.func @transform_0(%arg0: i32, %arg1: i32, %arg2: i32) -> (i32, i32) {
    %c0_i32 = arith.constant 0 : i32
    return %arg0, %arg2 : i32, i32
  }
  func.func @transform_1(%arg0: i32, %arg1: i32, %arg2: i32) -> (i32, i32) {
    %c0_i32 = arith.constant 0 : i32
    return %arg2, %arg1 : i32, i32
  }
  func.func @transform_2(%arg0: i32, %arg1: i32, %arg2: i32) -> (i32, i32) {
    %c0_i32 = arith.constant 0 : i32
    %c0_i32_0 = arith.constant 0 : i32
    return %c0_i32, %arg1 : i32, i32
  }
  func.func @transform_3(%arg0: i32, %arg1: i32, %arg2: i32) -> (i32, i32) {
    %c0_i32 = arith.constant 0 : i32
    return %arg0, %arg1 : i32, i32
  }
}

module attributes {stable_mosaic.version = 11 : i64} {
  func.func @_matmul_add_ln_kernel(%arg0: i32, %arg1: i32, %arg2: memref<16x128xbf16, #tpu.memory_space<vmem>>, %arg3: memref<128x128xbf16, #tpu.memory_space<vmem>>, %arg4: memref<1x128xf32, #tpu.memory_space<vmem>>, %arg5: memref<16x128xbf16, #tpu.memory_space<vmem>>, %arg6: memref<1x128xf32, #tpu.memory_space<vmem>>, %arg7: memref<1x128xf32, #tpu.memory_space<vmem>>, %arg8: memref<16x128xbf16, #tpu.memory_space<vmem>>, %arg9: memref<16x128xf32, #tpu.memory_space<vmem>>) attributes {dimension_semantics = [#tpu.dimension_semantics<parallel>, #tpu.dimension_semantics<arbitrary>], iteration_bounds = array<i64: 1, 1>, scalar_prefetch = 0 : i64, scratch_operands = 1 : i64, tpu.core_type = #tpu.core_type<tc>, window_params = [{transform_indices = @transform_0, window_bounds = array<i64: 16, 128>}, {transform_indices = @transform_1, window_bounds = array<i64: 128, 128>}, {pipeline_mode = #tpu.pipeline_mode<synchronous>, transform_indices = @transform_2, window_bounds = array<i64: 1, 128>}, {transform_indices = @transform_3, window_bounds = array<i64: 16, 128>}, {pipeline_mode = #tpu.pipeline_mode<synchronous>, transform_indices = @transform_4, window_bounds = array<i64: 1, 128>}, {pipeline_mode = #tpu.pipeline_mode<synchronous>, transform_indices = @transform_5, window_bounds = array<i64: 1, 128>}, {transform_indices = @transform_6, window_bounds = array<i64: 16, 128>}]} {
    %c0_i32 = arith.constant 0 : i32
    %0 = arith.cmpi eq, %arg1, %c0_i32 : i32
    %1 = arith.extui %0 : i1 to i32
    %c0_i32_0 = arith.constant 0 : i32
    %2 = arith.cmpi ne, %1, %c0_i32_0 : i32
    scf.if %2 {
      %cst_10 = arith.constant 0.000000e+00 : f32
      %12 = vector.broadcast %cst_10 : f32 to vector<16x128xf32>
      %c0_11 = arith.constant 0 : index
      %c0_12 = arith.constant 0 : index
      %13 = vector.load %arg9[%c0_11, %c0_12] : memref<16x128xf32, #tpu.memory_space<vmem>>, vector<16x128xf32>
      tpu.vector_store %arg9[%c0_11, %c0_12], %12 {strides = array<i32>} : memref<16x128xf32, #tpu.memory_space<vmem>>, vector<16x128xf32>,
    } else {
    }
    %c0 = arith.constant 0 : index
    %c0_1 = arith.constant 0 : index
    %3 = vector.load %arg9[%c0, %c0_1] : memref<16x128xf32, #tpu.memory_space<vmem>>, vector<16x128xf32>
    %c0_2 = arith.constant 0 : index
    %c0_3 = arith.constant 0 : index
    %4 = vector.load %arg2[%c0_2, %c0_3] : memref<16x128xbf16, #tpu.memory_space<vmem>>, vector<16x128xbf16>
    %c0_4 = arith.constant 0 : index
    %c0_5 = arith.constant 0 : index
    %5 = vector.load %arg3[%c0_4, %c0_5] : memref<128x128xbf16, #tpu.memory_space<vmem>>, vector<128x128xbf16>
    %cst = arith.constant dense<0.000000e+00> : vector<16x128xf32>
    %6 = tpu.matmul %4, %5, %cst {dimension_numbers = #tpu.dot_dimension_numbers<[1], [0], [0], [1], [0, 0, 1, 1], [], []>} : vector<16x128xbf16>, vector<128x128xbf16>, vector<16x128xf32> -> vector<16x128xf32>
    %7 = arith.addf %3, %6 : vector<16x128xf32>
    %c0_6 = arith.constant 0 : index
    %c0_7 = arith.constant 0 : index
    %8 = vector.load %arg9[%c0_6, %c0_7] : memref<16x128xf32, #tpu.memory_space<vmem>>, vector<16x128xf32>
    tpu.vector_store %arg9[%c0_6, %c0_7], %7 {strides = array<i32>} : memref<16x128xf32, #tpu.memory_space<vmem>>, vector<16x128xf32>,
    %c0_i32_8 = arith.constant 0 : i32
    %9 = arith.cmpi eq, %arg1, %c0_i32_8 : i32
    %10 = arith.extui %9 : i1 to i32
    %c0_i32_9 = arith.constant 0 : i32
    %11 = arith.cmpi ne, %10, %c0_i32_9 : i32
    scf.if %11 {
      %c0_10 = arith.constant 0 : index
      %c0_11 = arith.constant 0 : index
      %12 = vector.load %arg9[%c0_10, %c0_11] : memref<16x128xf32, #tpu.memory_space<vmem>>, vector<16x128xf32>
      %c0_12 = arith.constant 0 : index
      %c0_13 = arith.constant 0 : index
      %13 = vector.load %arg4[%c0_12, %c0_13] : memref<1x128xf32, #tpu.memory_space<vmem>>, vector<1x128xf32>
      %14 = vector.broadcast %13 : vector<1x128xf32> to vector<16x128xf32>
      %15 = arith.addf %12, %14 : vector<16x128xf32>
      %c0_14 = arith.constant 0 : index
      %c0_15 = arith.constant 0 : index
      %16 = vector.load %arg5[%c0_14, %c0_15] : memref<16x128xbf16, #tpu.memory_space<vmem>>, vector<16x128xbf16>
      %17 = arith.extf %16 : vector<16x128xbf16> to vector<16x128xf32>
      %18 = arith.addf %15, %17 : vector<16x128xf32>
      %19 = tpu.iota {dimensions = array<i32: 1>} : vector<1x128xi32>
      %c32_i32 = arith.constant 32 : i32
      %20 = vector.broadcast %c32_i32 : i32 to vector<1x128xi32>
      %21 = arith.cmpi slt, %19, %20 : vector<1x128xi32>
      %22 = arith.extui %21 : vector<1x128xi1> to vector<1x128xi32>
      %23 = arith.sitofp %22 : vector<1x128xi32> to vector<1x128xf32>
      %24 = vector.broadcast %23 : vector<1x128xf32> to vector<16x128xf32>
      %25 = arith.mulf %18, %24 : vector<16x128xf32>
      %cst_16 = arith.constant dense<0.000000e+00> : vector<16xf32>
      %26 = vector.multi_reduction <add>, %25, %cst_16 [1] : vector<16x128xf32> to vector<16xf32>
      %27 = vector.shape_cast %26 : vector<16xf32> to vector<16x1xf32>
      %cst_17 = arith.constant 3.125000e-02 : f32
      %28 = vector.broadcast %cst_17 : f32 to vector<16x1xf32>
      %29 = arith.mulf %27, %28 : vector<16x1xf32>
      %30 = vector.broadcast %29 : vector<16x1xf32> to vector<16x128xf32>
      %31 = arith.subf %18, %30 : vector<16x128xf32>
      %32 = vector.broadcast %23 : vector<1x128xf32> to vector<16x128xf32>
      %33 = arith.mulf %31, %32 : vector<16x128xf32>
      %34 = arith.mulf %33, %33 : vector<16x128xf32>
      %cst_18 = arith.constant dense<0.000000e+00> : vector<16xf32>
      %35 = vector.multi_reduction <add>, %34, %cst_18 [1] : vector<16x128xf32> to vector<16xf32>
      %36 = vector.shape_cast %35 : vector<16xf32> to vector<16x1xf32>
      %cst_19 = arith.constant 3.125000e-02 : f32
      %37 = vector.broadcast %cst_19 : f32 to vector<16x1xf32>
      %38 = arith.mulf %36, %37 : vector<16x1xf32>
      %39 = vector.broadcast %29 : vector<16x1xf32> to vector<16x128xf32>
      %40 = arith.subf %18, %39 : vector<16x128xf32>
      %cst_20 = arith.constant 9.99999996E-13 : f32
      %41 = vector.broadcast %cst_20 : f32 to vector<16x1xf32>
      %42 = arith.addf %38, %41 : vector<16x1xf32>
      %43 = math.rsqrt %42 : vector<16x1xf32>
      %44 = vector.broadcast %43 : vector<16x1xf32> to vector<16x128xf32>
      %45 = arith.mulf %40, %44 : vector<16x128xf32>
      %c0_21 = arith.constant 0 : index
      %c0_22 = arith.constant 0 : index
      %46 = vector.load %arg6[%c0_21, %c0_22] : memref<1x128xf32, #tpu.memory_space<vmem>>, vector<1x128xf32>
      %47 = vector.broadcast %46 : vector<1x128xf32> to vector<16x128xf32>
      %48 = arith.mulf %45, %47 : vector<16x128xf32>
      %c0_23 = arith.constant 0 : index
      %c0_24 = arith.constant 0 : index
      %49 = vector.load %arg7[%c0_23, %c0_24] : memref<1x128xf32, #tpu.memory_space<vmem>>, vector<1x128xf32>
      %50 = vector.broadcast %49 : vector<1x128xf32> to vector<16x128xf32>
      %51 = arith.addf %48, %50 : vector<16x128xf32>
      %52 = arith.truncf %51 : vector<16x128xf32> to vector<16x128xbf16>
      %c0_25 = arith.constant 0 : index
      %c0_26 = arith.constant 0 : index
      %53 = vector.load %arg8[%c0_25, %c0_26] : memref<16x128xbf16, #tpu.memory_space<vmem>>, vector<16x128xbf16>
      tpu.vector_store %arg8[%c0_25, %c0_26], %52 {strides = array<i32>} : memref<16x128xbf16, #tpu.memory_space<vmem>>, vector<16x128xbf16>,
    } else {
    }
    return
  }
  func.func @transform_0(%arg0: i32, %arg1: i32) -> (i32, i32) {
    %c0_i32 = arith.constant 0 : i32
    return %arg0, %arg1 : i32, i32
  }
  func.func @transform_1(%arg0: i32, %arg1: i32) -> (i32, i32) {
    %c0_i32 = arith.constant 0 : i32
    %c0_i32_0 = arith.constant 0 : i32
    return %arg1, %c0_i32 : i32, i32
  }
  func.func @transform_2(%arg0: i32, %arg1: i32) -> (i32, i32) {
    %c0_i32 = arith.constant 0 : i32
    %c0_i32_0 = arith.constant 0 : i32
    %c0_i32_1 = arith.constant 0 : i32
    return %c0_i32, %c0_i32_0 : i32, i32
  }
  func.func @transform_3(%arg0: i32, %arg1: i32) -> (i32, i32) {
    %c0_i32 = arith.constant 0 : i32
    %c0_i32_0 = arith.constant 0 : i32
    return %arg0, %c0_i32 : i32, i32
  }
  func.func @transform_4(%arg0: i32, %arg1: i32) -> (i32, i32) {
    %c0_i32 = arith.constant 0 : i32
    %c0_i32_0 = arith.constant 0 : i32
    %c0_i32_1 = arith.constant 0 : i32
    return %c0_i32, %c0_i32_0 : i32, i32
  }
  func.func @transform_5(%arg0: i32, %arg1: i32) -> (i32, i32) {
    %c0_i32 = arith.constant 0 : i32
    %c0_i32_0 = arith.constant 0 : i32
    %c0_i32_1 = arith.constant 0 : i32
    return %c0_i32, %c0_i32_0 : i32, i32
  }
  func.func @transform_6(%arg0: i32, %arg1: i32) -> (i32, i32) {
    %c0_i32 = arith.constant 0 : i32
    %c0_i32_0 = arith.constant 0 : i32
    return %arg0, %c0_i32 : i32, i32
  }
}

module attributes {stable_mosaic.version = 11 : i64} {
  func.func @_self_attn_kernel(%arg0: i32, %arg1: i32, %arg2: memref<1x1x8x8xbf16, #tpu.memory_space<vmem>>, %arg3: memref<1x1x8x8xbf16, #tpu.memory_space<vmem>>, %arg4: memref<1x1x8x8xbf16, #tpu.memory_space<vmem>>, %arg5: memref<1x1x8xf32, #tpu.memory_space<vmem>>, %arg6: memref<1x1x8x8xbf16, #tpu.memory_space<vmem>>) attributes {dimension_semantics = [#tpu.dimension_semantics<parallel>, #tpu.dimension_semantics<parallel>], iteration_bounds = array<i64: 2, 4>, scalar_prefetch = 0 : i64, scratch_operands = 0 : i64, tpu.core_type = #tpu.core_type<tc>, window_params = [{transform_indices = @transform_0, window_bounds = array<i64: 1, 1, 8, 8>}, {transform_indices = @transform_1, window_bounds = array<i64: 1, 1, 8, 8>}, {transform_indices = @transform_2, window_bounds = array<i64: 1, 1, 8, 8>}, {transform_indices = @transform_3, window_bounds = array<i64: 1, 1, 8>}, {transform_indices = @transform_4, window_bounds = array<i64: 1, 1, 8, 8>}]} {
    %c0 = arith.constant 0 : index
    %c0_0 = arith.constant 0 : index
    %c0_1 = arith.constant 0 : index
    %c0_2 = arith.constant 0 : index
    %0 = vector.load %arg2[%c0, %c0_0, %c0_1, %c0_2] : memref<1x1x8x8xbf16, #tpu.memory_space<vmem>>, vector<1x1x8x8xbf16>
    %1 = vector.shape_cast %0 : vector<1x1x8x8xbf16> to vector<8x8xbf16>
    %c0_3 = arith.constant 0 : index
    %c0_4 = arith.constant 0 : index
    %c0_5 = arith.constant 0 : index
    %c0_6 = arith.constant 0 : index
    %2 = vector.load %arg3[%c0_3, %c0_4, %c0_5, %c0_6] : memref<1x1x8x8xbf16, #tpu.memory_space<vmem>>, vector<1x1x8x8xbf16>
    %3 = vector.shape_cast %2 : vector<1x1x8x8xbf16> to vector<8x8xbf16>
    %c0_7 = arith.constant 0 : index
    %c0_8 = arith.constant 0 : index
    %c0_9 = arith.constant 0 : index
    %c0_10 = arith.constant 0 : index
    %4 = vector.load %arg4[%c0_7, %c0_8, %c0_9, %c0_10] : memref<1x1x8x8xbf16, #tpu.memory_space<vmem>>, vector<1x1x8x8xbf16>
    %5 = vector.shape_cast %4 : vector<1x1x8x8xbf16> to vector<8x8xbf16>
    %c0_11 = arith.constant 0 : index
    %c0_12 = arith.constant 0 : index
    %c0_13 = arith.constant 0 : index
    %6 = vector.load %arg5[%c0_11, %c0_12, %c0_13] : memref<1x1x8xf32, #tpu.memory_space<vmem>>, vector<1x1x8xf32>
    %7 = vector.shape_cast %6 : vector<1x1x8xf32> to vector<1x8xf32>
    %cst = arith.constant dense<0.000000e+00> : vector<8x8xf32>
    %8 = tpu.matmul %1, %3, %cst {dimension_numbers = #tpu.dot_dimension_numbers<[1], [1], [0], [0], [0, 0, 1, 0], [], []>} : vector<8x8xbf16>, vector<8x8xbf16>, vector<8x8xf32> -> vector<8x8xf32>
    %cst_14 = arith.constant 0.353553385 : f32
    %9 = vector.broadcast %cst_14 : f32 to vector<8x8xf32>
    %10 = arith.mulf %8, %9 : vector<8x8xf32>
    %11 = vector.broadcast %7 : vector<1x8xf32> to vector<8x8xf32>
    %12 = arith.addf %10, %11 : vector<8x8xf32>
    %cst_15 = arith.constant dense<0xFF800000> : vector<8xf32>
    %13 = vector.multi_reduction <maximumf>, %12, %cst_15 [1] : vector<8x8xf32> to vector<8xf32>
    %14 = vector.shape_cast %13 : vector<8xf32> to vector<8x1xf32>
    %15 = vector.broadcast %14 : vector<8x1xf32> to vector<8x8xf32>
    %16 = arith.subf %12, %15 : vector<8x8xf32>
    %17 = math.exp %16 : vector<8x8xf32>
    %cst_16 = arith.constant dense<0.000000e+00> : vector<8xf32>
    %18 = vector.multi_reduction <add>, %17, %cst_16 [1] : vector<8x8xf32> to vector<8xf32>
    %19 = vector.shape_cast %18 : vector<8xf32> to vector<8x1xf32>
    %20 = tpu.reciprocal %19 {approx = true} : vector<8x1xf32> -> vector<8x1xf32>
    %21 = vector.broadcast %20 : vector<8x1xf32> to vector<8x8xf32>
    %22 = arith.mulf %17, %21 : vector<8x8xf32>
    %23 = arith.truncf %22 : vector<8x8xf32> to vector<8x8xbf16>
    %cst_17 = arith.constant dense<0.000000e+00> : vector<8x8xf32>
    %24 = tpu.matmul %23, %5, %cst_17 {dimension_numbers = #tpu.dot_dimension_numbers<[1], [0], [0], [1], [0, 0, 1, 1], [], []>} : vector<8x8xbf16>, vector<8x8xbf16>, vector<8x8xf32> -> vector<8x8xf32>
    %25 = arith.truncf %24 : vector<8x8xf32> to vector<8x8xbf16>
    %c0_18 = arith.constant 0 : index
    %c0_19 = arith.constant 0 : index
    %c0_20 = arith.constant 0 : index
    %c0_21 = arith.constant 0 : index
    %26 = vector.load %arg6[%c0_18, %c0_19, %c0_20, %c0_21] : memref<1x1x8x8xbf16, #tpu.memory_space<vmem>>, vector<1x1x8x8xbf16>
    %27 = vector.shape_cast %26 : vector<1x1x8x8xbf16> to vector<8x8xbf16>
    %28 = vector.shape_cast %25 : vector<8x8xbf16> to vector<1x1x8x8xbf16>
    tpu.vector_store %arg6[%c0_18, %c0_19, %c0_20, %c0_21], %28 {strides = array<i32>} : memref<1x1x8x8xbf16, #tpu.memory_space<vmem>>, vector<1x1x8x8xbf16>,
    return
  }
  func.func @transform_0(%arg0: i32, %arg1: i32) -> (i32, i32, i32, i32) {
    %c0_i32 = arith.constant 0 : i32
    %c0_i32_0 = arith.constant 0 : i32
    %c0_i32_1 = arith.constant 0 : i32
    return %arg0, %arg1, %c0_i32, %c0_i32_0 : i32, i32, i32, i32
  }
  func.func @transform_1(%arg0: i32, %arg1: i32) -> (i32, i32, i32, i32) {
    %c0_i32 = arith.constant 0 : i32
    %c0_i32_0 = arith.constant 0 : i32
    %c0_i32_1 = arith.constant 0 : i32
    return %arg0, %arg1, %c0_i32, %c0_i32_0 : i32, i32, i32, i32
  }
  func.func @transform_2(%arg0: i32, %arg1: i32) -> (i32, i32, i32, i32) {
    %c0_i32 = arith.constant 0 : i32
    %c0_i32_0 = arith.constant 0 : i32
    %c0_i32_1 = arith.constant 0 : i32
    return %arg0, %arg1, %c0_i32, %c0_i32_0 : i32, i32, i32, i32
  }
  func.func @transform_3(%arg0: i32, %arg1: i32) -> (i32, i32, i32) {
    %c0_i32 = arith.constant 0 : i32
    %c0_i32_0 = arith.constant 0 : i32
    %c0_i32_1 = arith.constant 0 : i32
    return %arg0, %c0_i32, %c0_i32_0 : i32, i32, i32
  }
  func.func @transform_4(%arg0: i32, %arg1: i32) -> (i32, i32, i32, i32) {
    %c0_i32 = arith.constant 0 : i32
    %c0_i32_0 = arith.constant 0 : i32
    %c0_i32_1 = arith.constant 0 : i32
    return %arg0, %arg1, %c0_i32, %c0_i32_0 : i32, i32, i32, i32
  }
}

module attributes {stable_mosaic.version = 11 : i64} {
  func.func @_matmul_kernel(%arg0: i32, %arg1: i32, %arg2: i32, %arg3: memref<16x128xbf16, #tpu.memory_space<vmem>>, %arg4: memref<128x128xbf16, #tpu.memory_space<vmem>>, %arg5: memref<1x128xf32, #tpu.memory_space<vmem>>, %arg6: memref<16x128xbf16, #tpu.memory_space<vmem>>, %arg7: memref<16x128xf32, #tpu.memory_space<vmem>>) attributes {dimension_semantics = [#tpu.dimension_semantics<parallel>, #tpu.dimension_semantics<parallel>, #tpu.dimension_semantics<arbitrary>], iteration_bounds = array<i64: 1, 1, 1>, scalar_prefetch = 0 : i64, scratch_operands = 1 : i64, tpu.core_type = #tpu.core_type<tc>, window_params = [{transform_indices = @transform_0, window_bounds = array<i64: 16, 128>}, {transform_indices = @transform_1, window_bounds = array<i64: 128, 128>}, {transform_indices = @transform_2, window_bounds = array<i64: 1, 128>}, {transform_indices = @transform_3, window_bounds = array<i64: 16, 128>}]} {
    %c0_i32 = arith.constant 0 : i32
    %0 = arith.cmpi eq, %arg2, %c0_i32 : i32
    %1 = arith.extui %0 : i1 to i32
    %c0_i32_0 = arith.constant 0 : i32
    %2 = arith.cmpi ne, %1, %c0_i32_0 : i32
    scf.if %2 {
      %cst_10 = arith.constant 0.000000e+00 : f32
      %12 = vector.broadcast %cst_10 : f32 to vector<16x128xf32>
      %c0_11 = arith.constant 0 : index
      %c0_12 = arith.constant 0 : index
      %13 = vector.load %arg7[%c0_11, %c0_12] : memref<16x128xf32, #tpu.memory_space<vmem>>, vector<16x128xf32>
      tpu.vector_store %arg7[%c0_11, %c0_12], %12 {strides = array<i32>} : memref<16x128xf32, #tpu.memory_space<vmem>>, vector<16x128xf32>,
    } else {
    }
    %c0 = arith.constant 0 : index
    %c0_1 = arith.constant 0 : index
    %3 = vector.load %arg7[%c0, %c0_1] : memref<16x128xf32, #tpu.memory_space<vmem>>, vector<16x128xf32>
    %c0_2 = arith.constant 0 : index
    %c0_3 = arith.constant 0 : index
    %4 = vector.load %arg3[%c0_2, %c0_3] : memref<16x128xbf16, #tpu.memory_space<vmem>>, vector<16x128xbf16>
    %c0_4 = arith.constant 0 : index
    %c0_5 = arith.constant 0 : index
    %5 = vector.load %arg4[%c0_4, %c0_5] : memref<128x128xbf16, #tpu.memory_space<vmem>>, vector<128x128xbf16>
    %cst = arith.constant dense<0.000000e+00> : vector<16x128xf32>
    %6 = tpu.matmul %4, %5, %cst {dimension_numbers = #tpu.dot_dimension_numbers<[1], [0], [0], [1], [0, 0, 1, 1], [], []>} : vector<16x128xbf16>, vector<128x128xbf16>, vector<16x128xf32> -> vector<16x128xf32>
    %7 = arith.addf %3, %6 : vector<16x128xf32>
    %c0_6 = arith.constant 0 : index
    %c0_7 = arith.constant 0 : index
    %8 = vector.load %arg7[%c0_6, %c0_7] : memref<16x128xf32, #tpu.memory_space<vmem>>, vector<16x128xf32>
    tpu.vector_store %arg7[%c0_6, %c0_7], %7 {strides = array<i32>} : memref<16x128xf32, #tpu.memory_space<vmem>>, vector<16x128xf32>,
    %c0_i32_8 = arith.constant 0 : i32
    %9 = arith.cmpi eq, %arg2, %c0_i32_8 : i32
    %10 = arith.extui %9 : i1 to i32
    %c0_i32_9 = arith.constant 0 : i32
    %11 = arith.cmpi ne, %10, %c0_i32_9 : i32
    scf.if %11 {
      %c0_10 = arith.constant 0 : index
      %c0_11 = arith.constant 0 : index
      %12 = vector.load %arg7[%c0_10, %c0_11] : memref<16x128xf32, #tpu.memory_space<vmem>>, vector<16x128xf32>
      %c0_12 = arith.constant 0 : index
      %c0_13 = arith.constant 0 : index
      %13 = vector.load %arg5[%c0_12, %c0_13] : memref<1x128xf32, #tpu.memory_space<vmem>>, vector<1x128xf32>
      %14 = vector.broadcast %13 : vector<1x128xf32> to vector<16x128xf32>
      %15 = arith.addf %12, %14 : vector<16x128xf32>
      %cst_14 = arith.constant 0.707106769 : f32
      %16 = vector.broadcast %cst_14 : f32 to vector<16x128xf32>
      %17 = arith.mulf %15, %16 : vector<16x128xf32>
      %18 = math.absf %17 : vector<16x128xf32>
      %cst_15 = arith.constant 0.327591091 : f32
      %19 = vector.broadcast %cst_15 : f32 to vector<16x128xf32>
      %20 = arith.mulf %19, %18 : vector<16x128xf32>
      %cst_16 = arith.constant 1.000000e+00 : f32
      %21 = vector.broadcast %cst_16 : f32 to vector<16x128xf32>
      %22 = arith.addf %21, %20 : vector<16x128xf32>
      %cst_17 = arith.constant 1.000000e+00 : f32
      %23 = vector.broadcast %cst_17 : f32 to vector<16x128xf32>
      %24 = arith.divf %23, %22 : vector<16x128xf32>
      %cst_18 = arith.constant 1.06140542 : f32
      %25 = vector.broadcast %cst_18 : f32 to vector<16x128xf32>
      %26 = arith.mulf %24, %25 : vector<16x128xf32>
      %cst_19 = arith.constant -1.45315206 : f32
      %27 = vector.broadcast %cst_19 : f32 to vector<16x128xf32>
      %28 = arith.addf %27, %26 : vector<16x128xf32>
      %29 = arith.mulf %24, %28 : vector<16x128xf32>
      %cst_20 = arith.constant 1.42141378 : f32
      %30 = vector.broadcast %cst_20 : f32 to vector<16x128xf32>
      %31 = arith.addf %30, %29 : vector<16x128xf32>
      %32 = arith.mulf %24, %31 : vector<16x128xf32>
      %cst_21 = arith.constant -0.284496725 : f32
      %33 = vector.broadcast %cst_21 : f32 to vector<16x128xf32>
      %34 = arith.addf %33, %32 : vector<16x128xf32>
      %35 = arith.mulf %24, %34 : vector<16x128xf32>
      %cst_22 = arith.constant 0.254829586 : f32
      %36 = vector.broadcast %cst_22 : f32 to vector<16x128xf32>
      %37 = arith.addf %36, %35 : vector<16x128xf32>
      %38 = arith.mulf %24, %37 : vector<16x128xf32>
      %cst_23 = arith.constant 0.000000e+00 : f32
      %39 = vector.broadcast %cst_23 : f32 to vector<16x128xf32>
      %40 = arith.subf %39, %18 : vector<16x128xf32>
      %41 = arith.mulf %40, %18 : vector<16x128xf32>
      %42 = math.exp %41 : vector<16x128xf32>
      %43 = arith.mulf %38, %42 : vector<16x128xf32>
      %cst_24 = arith.constant 1.000000e+00 : f32
      %44 = vector.broadcast %cst_24 : f32 to vector<16x128xf32>
      %45 = arith.subf %44, %43 : vector<16x128xf32>
      %cst_25 = arith.constant 0.000000e+00 : f32
      %46 = vector.broadcast %cst_25 : f32 to vector<16x128xf32>
      %47 = arith.cmpf oge, %17, %46 : vector<16x128xf32>
      %cst_26 = arith.constant 0.000000e+00 : f32
      %48 = vector.broadcast %cst_26 : f32 to vector<16x128xf32>
      %49 = arith.subf %48, %45 : vector<16x128xf32>
      %50 = arith.select %47, %45, %49 : vector<16x128xi1>, vector<16x128xf32>
      %cst_27 = arith.constant 5.000000e-01 : f32
      %51 = vector.broadcast %cst_27 : f32 to vector<16x128xf32>
      %52 = arith.mulf %51, %15 : vector<16x128xf32>
      %cst_28 = arith.constant 1.000000e+00 : f32
      %53 = vector.broadcast %cst_28 : f32 to vector<16x128xf32>
      %54 = arith.addf %53, %50 : vector<16x128xf32>
      %55 = arith.mulf %52, %54 : vector<16x128xf32>
      %56 = arith.truncf %55 : vector<16x128xf32> to vector<16x128xbf16>
      %c0_29 = arith.constant 0 : index
      %c0_30 = arith.constant 0 : index
      %57 = vector.load %arg6[%c0_29, %c0_30] : memref<16x128xbf16, #tpu.memory_space<vmem>>, vector<16x128xbf16>
      tpu.vector_store %arg6[%c0_29, %c0_30], %56 {strides = array<i32>} : memref<16x128xbf16, #tpu.memory_space<vmem>>, vector<16x128xbf16>,
    } else {
    }
    return
  }
  func.func @transform_0(%arg0: i32, %arg1: i32, %arg2: i32) -> (i32, i32) {
    %c0_i32 = arith.constant 0 : i32
    return %arg0, %arg2 : i32, i32
  }
  func.func @transform_1(%arg0: i32, %arg1: i32, %arg2: i32) -> (i32, i32) {
    %c0_i32 = arith.constant 0 : i32
    return %arg2, %arg1 : i32, i32
  }
  func.func @transform_2(%arg0: i32, %arg1: i32, %arg2: i32) -> (i32, i32) {
    %c0_i32 = arith.constant 0 : i32
    %c0_i32_0 = arith.constant 0 : i32
    return %c0_i32, %arg1 : i32, i32
  }
  func.func @transform_3(%arg0: i32, %arg1: i32, %arg2: i32) -> (i32, i32) {
    %c0_i32 = arith.constant 0 : i32
    return %arg0, %arg1 : i32, i32
  }
}

module attributes {stable_mosaic.version = 11 : i64} {
  func.func @_matmul_add_ln_kernel(%arg0: i32, %arg1: i32, %arg2: memref<16x128xbf16, #tpu.memory_space<vmem>>, %arg3: memref<128x128xbf16, #tpu.memory_space<vmem>>, %arg4: memref<1x128xf32, #tpu.memory_space<vmem>>, %arg5: memref<16x128xbf16, #tpu.memory_space<vmem>>, %arg6: memref<1x128xf32, #tpu.memory_space<vmem>>, %arg7: memref<1x128xf32, #tpu.memory_space<vmem>>, %arg8: memref<16x128xf32, #tpu.memory_space<vmem>>, %arg9: memref<16x128xf32, #tpu.memory_space<vmem>>) attributes {dimension_semantics = [#tpu.dimension_semantics<parallel>, #tpu.dimension_semantics<arbitrary>], iteration_bounds = array<i64: 1, 1>, scalar_prefetch = 0 : i64, scratch_operands = 1 : i64, tpu.core_type = #tpu.core_type<tc>, window_params = [{transform_indices = @transform_0, window_bounds = array<i64: 16, 128>}, {transform_indices = @transform_1, window_bounds = array<i64: 128, 128>}, {pipeline_mode = #tpu.pipeline_mode<synchronous>, transform_indices = @transform_2, window_bounds = array<i64: 1, 128>}, {transform_indices = @transform_3, window_bounds = array<i64: 16, 128>}, {pipeline_mode = #tpu.pipeline_mode<synchronous>, transform_indices = @transform_4, window_bounds = array<i64: 1, 128>}, {pipeline_mode = #tpu.pipeline_mode<synchronous>, transform_indices = @transform_5, window_bounds = array<i64: 1, 128>}, {transform_indices = @transform_6, window_bounds = array<i64: 16, 128>}]} {
    %c0_i32 = arith.constant 0 : i32
    %0 = arith.cmpi eq, %arg1, %c0_i32 : i32
    %1 = arith.extui %0 : i1 to i32
    %c0_i32_0 = arith.constant 0 : i32
    %2 = arith.cmpi ne, %1, %c0_i32_0 : i32
    scf.if %2 {
      %cst_10 = arith.constant 0.000000e+00 : f32
      %12 = vector.broadcast %cst_10 : f32 to vector<16x128xf32>
      %c0_11 = arith.constant 0 : index
      %c0_12 = arith.constant 0 : index
      %13 = vector.load %arg9[%c0_11, %c0_12] : memref<16x128xf32, #tpu.memory_space<vmem>>, vector<16x128xf32>
      tpu.vector_store %arg9[%c0_11, %c0_12], %12 {strides = array<i32>} : memref<16x128xf32, #tpu.memory_space<vmem>>, vector<16x128xf32>,
    } else {
    }
    %c0 = arith.constant 0 : index
    %c0_1 = arith.constant 0 : index
    %3 = vector.load %arg9[%c0, %c0_1] : memref<16x128xf32, #tpu.memory_space<vmem>>, vector<16x128xf32>
    %c0_2 = arith.constant 0 : index
    %c0_3 = arith.constant 0 : index
    %4 = vector.load %arg2[%c0_2, %c0_3] : memref<16x128xbf16, #tpu.memory_space<vmem>>, vector<16x128xbf16>
    %c0_4 = arith.constant 0 : index
    %c0_5 = arith.constant 0 : index
    %5 = vector.load %arg3[%c0_4, %c0_5] : memref<128x128xbf16, #tpu.memory_space<vmem>>, vector<128x128xbf16>
    %cst = arith.constant dense<0.000000e+00> : vector<16x128xf32>
    %6 = tpu.matmul %4, %5, %cst {dimension_numbers = #tpu.dot_dimension_numbers<[1], [0], [0], [1], [0, 0, 1, 1], [], []>} : vector<16x128xbf16>, vector<128x128xbf16>, vector<16x128xf32> -> vector<16x128xf32>
    %7 = arith.addf %3, %6 : vector<16x128xf32>
    %c0_6 = arith.constant 0 : index
    %c0_7 = arith.constant 0 : index
    %8 = vector.load %arg9[%c0_6, %c0_7] : memref<16x128xf32, #tpu.memory_space<vmem>>, vector<16x128xf32>
    tpu.vector_store %arg9[%c0_6, %c0_7], %7 {strides = array<i32>} : memref<16x128xf32, #tpu.memory_space<vmem>>, vector<16x128xf32>,
    %c0_i32_8 = arith.constant 0 : i32
    %9 = arith.cmpi eq, %arg1, %c0_i32_8 : i32
    %10 = arith.extui %9 : i1 to i32
    %c0_i32_9 = arith.constant 0 : i32
    %11 = arith.cmpi ne, %10, %c0_i32_9 : i32
    scf.if %11 {
      %c0_10 = arith.constant 0 : index
      %c0_11 = arith.constant 0 : index
      %12 = vector.load %arg9[%c0_10, %c0_11] : memref<16x128xf32, #tpu.memory_space<vmem>>, vector<16x128xf32>
      %c0_12 = arith.constant 0 : index
      %c0_13 = arith.constant 0 : index
      %13 = vector.load %arg4[%c0_12, %c0_13] : memref<1x128xf32, #tpu.memory_space<vmem>>, vector<1x128xf32>
      %14 = vector.broadcast %13 : vector<1x128xf32> to vector<16x128xf32>
      %15 = arith.addf %12, %14 : vector<16x128xf32>
      %c0_14 = arith.constant 0 : index
      %c0_15 = arith.constant 0 : index
      %16 = vector.load %arg5[%c0_14, %c0_15] : memref<16x128xbf16, #tpu.memory_space<vmem>>, vector<16x128xbf16>
      %17 = arith.extf %16 : vector<16x128xbf16> to vector<16x128xf32>
      %18 = arith.addf %15, %17 : vector<16x128xf32>
      %19 = tpu.iota {dimensions = array<i32: 1>} : vector<1x128xi32>
      %c32_i32 = arith.constant 32 : i32
      %20 = vector.broadcast %c32_i32 : i32 to vector<1x128xi32>
      %21 = arith.cmpi slt, %19, %20 : vector<1x128xi32>
      %22 = arith.extui %21 : vector<1x128xi1> to vector<1x128xi32>
      %23 = arith.sitofp %22 : vector<1x128xi32> to vector<1x128xf32>
      %24 = vector.broadcast %23 : vector<1x128xf32> to vector<16x128xf32>
      %25 = arith.mulf %18, %24 : vector<16x128xf32>
      %cst_16 = arith.constant dense<0.000000e+00> : vector<16xf32>
      %26 = vector.multi_reduction <add>, %25, %cst_16 [1] : vector<16x128xf32> to vector<16xf32>
      %27 = vector.shape_cast %26 : vector<16xf32> to vector<16x1xf32>
      %cst_17 = arith.constant 3.125000e-02 : f32
      %28 = vector.broadcast %cst_17 : f32 to vector<16x1xf32>
      %29 = arith.mulf %27, %28 : vector<16x1xf32>
      %30 = vector.broadcast %29 : vector<16x1xf32> to vector<16x128xf32>
      %31 = arith.subf %18, %30 : vector<16x128xf32>
      %32 = vector.broadcast %23 : vector<1x128xf32> to vector<16x128xf32>
      %33 = arith.mulf %31, %32 : vector<16x128xf32>
      %34 = arith.mulf %33, %33 : vector<16x128xf32>
      %cst_18 = arith.constant dense<0.000000e+00> : vector<16xf32>
      %35 = vector.multi_reduction <add>, %34, %cst_18 [1] : vector<16x128xf32> to vector<16xf32>
      %36 = vector.shape_cast %35 : vector<16xf32> to vector<16x1xf32>
      %cst_19 = arith.constant 3.125000e-02 : f32
      %37 = vector.broadcast %cst_19 : f32 to vector<16x1xf32>
      %38 = arith.mulf %36, %37 : vector<16x1xf32>
      %39 = vector.broadcast %29 : vector<16x1xf32> to vector<16x128xf32>
      %40 = arith.subf %18, %39 : vector<16x128xf32>
      %cst_20 = arith.constant 9.99999996E-13 : f32
      %41 = vector.broadcast %cst_20 : f32 to vector<16x1xf32>
      %42 = arith.addf %38, %41 : vector<16x1xf32>
      %43 = math.rsqrt %42 : vector<16x1xf32>
      %44 = vector.broadcast %43 : vector<16x1xf32> to vector<16x128xf32>
      %45 = arith.mulf %40, %44 : vector<16x128xf32>
      %c0_21 = arith.constant 0 : index
      %c0_22 = arith.constant 0 : index
      %46 = vector.load %arg6[%c0_21, %c0_22] : memref<1x128xf32, #tpu.memory_space<vmem>>, vector<1x128xf32>
      %47 = vector.broadcast %46 : vector<1x128xf32> to vector<16x128xf32>
      %48 = arith.mulf %45, %47 : vector<16x128xf32>
      %c0_23 = arith.constant 0 : index
      %c0_24 = arith.constant 0 : index
      %49 = vector.load %arg7[%c0_23, %c0_24] : memref<1x128xf32, #tpu.memory_space<vmem>>, vector<1x128xf32>
      %50 = vector.broadcast %49 : vector<1x128xf32> to vector<16x128xf32>
      %51 = arith.addf %48, %50 : vector<16x128xf32>
      %c0_25 = arith.constant 0 : index
      %c0_26 = arith.constant 0 : index
      %52 = vector.load %arg8[%c0_25, %c0_26] : memref<16x128xf32, #tpu.memory_space<vmem>>, vector<16x128xf32>
      tpu.vector_store %arg8[%c0_25, %c0_26], %51 {strides = array<i32>} : memref<16x128xf32, #tpu.memory_space<vmem>>, vector<16x128xf32>,
    } else {
    }
    return
  }
  func.func @transform_0(%arg0: i32, %arg1: i32) -> (i32, i32) {
    %c0_i32 = arith.constant 0 : i32
    return %arg0, %arg1 : i32, i32
  }
  func.func @transform_1(%arg0: i32, %arg1: i32) -> (i32, i32) {
    %c0_i32 = arith.constant 0 : i32
    %c0_i32_0 = arith.constant 0 : i32
    return %arg1, %c0_i32 : i32, i32
  }
  func.func @transform_2(%arg0: i32, %arg1: i32) -> (i32, i32) {
    %c0_i32 = arith.constant 0 : i32
    %c0_i32_0 = arith.constant 0 : i32
    %c0_i32_1 = arith.constant 0 : i32
    return %c0_i32, %c0_i32_0 : i32, i32
  }
  func.func @transform_3(%arg0: i32, %arg1: i32) -> (i32, i32) {
    %c0_i32 = arith.constant 0 : i32
    %c0_i32_0 = arith.constant 0 : i32
    return %arg0, %c0_i32 : i32, i32
  }
  func.func @transform_4(%arg0: i32, %arg1: i32) -> (i32, i32) {
    %c0_i32 = arith.constant 0 : i32
    %c0_i32_0 = arith.constant 0 : i32
    %c0_i32_1 = arith.constant 0 : i32
    return %c0_i32, %c0_i32_0 : i32, i32
  }
  func.func @transform_5(%arg0: i32, %arg1: i32) -> (i32, i32) {
    %c0_i32 = arith.constant 0 : i32
    %c0_i32_0 = arith.constant 0 : i32
    %c0_i32_1 = arith.constant 0 : i32
    return %c0_i32, %c0_i32_0 : i32, i32
  }
  func.func @transform_6(%arg0: i32, %arg1: i32) -> (i32, i32) {
    %c0_i32 = arith.constant 0 : i32
    %c0_i32_0 = arith.constant 0 : i32
    return %arg0, %c0_i32 : i32, i32
  }
}

</mosaic_0001>

<bundles_post_ra>
// kernel: pretrained_encoder_tir_forward.20
= control target key start
LH: loop header
LB: loop body
LE: loop exit
PB: predicated region body
PF: predicated region fallthrough
CT: control target
= control target key end

     0   :  { %8 = vsyncpa [#allocation3], 0  ;;  %s192_s0 = inlined_call_operand.vmem [shape: f32[16,32], index: 0, kind: input, shape index: {}]   ;;  %s193_s1 = inlined_call_operand.hbm [shape: f32[1,32], index: 1, kind: input, shape index: {}]   ;;  %s194_s2 = inlined_call_operand.hbm [shape: f32[1,32], index: 2, kind: input, shape index: {}]   ;;  %s195_s3 = inlined_call_operand.vmem [shape: f32[16,32], index: 3, kind: output, shape index: {}]  }
   0x1   :  { %9 = vsyncpa [#allocation5], 0  ;;  %s146_s12 = smov [#allocation2]   ;;  %s147_s14 = smov [#allocation4]  }
   0x2   :  { %s18_s13 = sshll.u32 %s146_s12, 4  ;;  %s28_s15 = sshll.u32 %s147_s14, 4  ;;  %s19_s13 = int_to_ptr.vmem [resolvable:$true] %s18_s13  ;;  %s29_s15 = int_to_ptr.vmem [resolvable:$true] %s28_s15 }
   0x3   :  { %s110_s16 = scalar_lea.vmem %s19_s13, 16  ;;  %s114_s17 = scalar_lea.vmem %s19_s13, 32 }
   0x4   :  { %p111_p0 = scmp.ne.s32.totalorder %s19_s13, %s110_s16  ;;  %p115_p1 = scmp.lt.s32.totalorder %s19_s13, %s19_s13 }
   0x5   :  { %p116_p2 = scmp.lt.s32.totalorder %s114_s17, %s110_s16 }
   0x7   :  { %p117_p3 = por %p116_p2, %p115_p1 }
   0x9   :  { %p118_p4 = pnand %p117_p3, %p111_p0 }
   0xb   :  { %121 = shalt.err (!%p118_p4)
}
   0xc   :  { %21 = dma.hbm_to_vmem [thread:$0]  %s193_s1, 16, %s19_s13, [#allocation3]  }
   0xd   :  { %s130_s20 = scalar_lea.vmem %s29_s15, 16  ;;  %s134_s21 = scalar_lea.vmem %s29_s15, 32 }
   0xe   :  { %p131_p5 = scmp.ne.s32.totalorder %s29_s15, %s130_s20  ;;  %p135_p6 = scmp.lt.s32.totalorder %s29_s15, %s29_s15 }
   0xf   :  { %p136_p7 = scmp.lt.s32.totalorder %s134_s21, %s130_s20 }
  0x11   :  { %p137_p8 = por %p136_p7, %p135_p6 }
  0x13   :  { %p138_p9 = pnand %p137_p8, %p131_p5 }
  0x15   :  { %141 = shalt.err (!%p138_p9)
}
  0x16   :  { %31 = dma.hbm_to_vmem [thread:$0]  %s194_s2, 16, %s29_s15, [#allocation5]  }
  0x17   :  { %142 = dma.done.wait [#allocation3], 16  }
  0x18   :  { %143 = vsyncadd [#allocation3], 4294967280 }
  0x19   :  { %144 = dma.done.wait [#allocation5], 16  }
  0x1a   :  { %145 = vsyncadd [#allocation5], 4294967280  ;;  %vm40_vm0 = vcmask 261120   ;;  %v38_v0 = vld [vmem:[%s192_s0] sm:$0xff]  ;;  %v39_v1 = vld [vmem:[%s192_s0 + $0x8] sm:$0xff] }
  0x1b   :  { %v41_v2 = vsel %vm40_vm0, %v38_v0, 0.0  ;;  %v44_v3 = vsel %vm40_vm0, %v39_v1, 0.0  ;;  %v94_v21 = vld [vmem:[#allocation2] ss:$0 sm:$0xff]  ;;  %v95_v23 = vld [vmem:[#allocation4] ss:$0 sm:$0xff] }
  0x1c   :  { %42 = vadd.xlane.f32.xlu0 %v41_v2 }
  0x20   :  { %45 = vadd.xlane.f32.xlu0 %v44_v3 }
  0xa5   :  { %v43_v4 = vpop.xlane.xlu0 %42 }
  0xa6   :  { %v48_v5 = vmul.f32 0.03125, %v43_v4 }
  0xa8   :  { %v50_v6 = vsub.f32 %v38_v0, %v48_v5 }
  0xa9   :  { %v46_v7 = vpop.xlane.xlu0 %45 }
  0xaa   :  { %v49_v8 = vmul.f32 0.03125, %v46_v7  ;;  %v52_v9 = vmul.f32 %v50_v6, %v50_v6 }
  0xac   :  { %v51_v10 = vsub.f32 %v39_v1, %v49_v8  ;;  %v54_v11 = vsel %vm40_vm0, %v52_v9, 0.0 }
  0xad   :  { %55 = vadd.xlane.f32.xlu1 %v54_v11 }
  0xae   :  { %v53_v12 = vmul.f32 %v51_v10, %v51_v10 }
  0xb0   :  { %v57_v13 = vsel %vm40_vm0, %v53_v12, 0.0 }
  0xb1   :  { %58 = vadd.xlane.f32.xlu1 %v57_v13 }
 0x136   :  { %v56_v14 = vpop.xlane.xlu1 %55 }
 0x137   :  { %v60_v15 = vmul.f32 0.03125, %v56_v14 }
 0x139   :  { %v62_v16 = vadd.f32 1e-12, %v60_v15 }
 0x13a   :  { %v59_v17 = vpop.xlane.xlu1 %58 }
 0x13b   :  { %98 = vrsqrt.f32 %v62_v16  ;;  %v61_v18 = vmul.f32 0.03125, %v59_v17 }
 0x13d   :  { %v63_v19 = vadd.f32 1e-12, %v61_v18 }
 0x13f   :  { %100 = vrsqrt.f32 %v63_v19 }
 0x148   :  { %v99_v20 = vpop.eup %98 }
 0x149   :  { %v66_v22 = vmul.f32 %v99_v20, %v50_v6 }
 0x14b   :  { %v75_v24 = vmul.f32 %v94_v21, %v66_v22 }
 0x14c   :  { %v101_v25 = vpop.eup %100 }
 0x14d   :  { %v84_v26 = vadd.f32 %v95_v23, %v75_v24  ;;  %v67_v27 = vmul.f32 %v101_v25, %v51_v10 }
 0x14f   :  { %86 = vst.msk [vmem:[%s195_s3] sm:$0xff] %vm40_vm0, %v84_v26  ;;  %v76_v28 = vmul.f32 %v94_v21, %v67_v27 }
 0x151   :  { %v85_v29 = vadd.f32 %v95_v23, %v76_v28 }
 0x153   :  { %87 = vst.msk [vmem:[%s195_s3 + $0x8] sm:$0xff] %vm40_vm0, %v85_v29 }
 0x154   :  { %92 = vsyncpa [#allocation3], 1 }
 0x155   :  { %93 = vsyncpa [#allocation5], 1 }

// kernel: pretrained_encoder_tir_forward.21
= control target key start
LH: loop header
LB: loop body
LE: loop exit
PB: predicated region body
PF: predicated region fallthrough
CT: control target
= control target key end

     0   :  { %s866_s12 = smov 0   ;;  %s868_s13 = smov 0   ;;  %s967_s0 = inlined_call_operand.vmem [shape: bf16[16,128], index: 0, kind: input, shape index: {}]   ;;  %s968_s1 = inlined_call_operand.vmem [shape: bf16[128,1024], index: 1, kind: input, shape index: {}]   ;;  %s969_s2 = inlined_call_operand.vmem [shape: f32[1,1024], index: 2, kind: input, shape index: {}]   ;;  %s970_s3 = inlined_call_operand.vmem [shape: bf16[16,1024], index: 3, kind: output, shape index: {}]  }
   0x1   :  { %s870_s14 = smov 0   ;;  %s872_s15 = smov 0  }
   0x2   :  { %s874_s16 = smov 0  }
   0x3 LB: > { %s28_s17 = sadd.s32 1, %s839_s15  ;;  %s699_s18 = sadd.s32 4294967295, %s843_s16   ;;  %s843_s16 = sphi %s874_s16, %s13_s16   ;;  %s839_s15 = sphi %s872_s15, %s975_s15   ;;  %s835_s14 = sphi %s870_s14, %s974_s14   ;;  %s831_s13 = sphi %s868_s13, %s973_s13   ;;  %s827_s12 = sphi %s866_s12, %s972_s12  }
   0x4   : > { %p30_p0 = scmp.ge.s32.totalorder %s28_s17, 4  ;;  %p76_p1 = scmp.ne.s32.totalorder %s831_s13, %s827_s12 }
   0x5   : > { %p77_p2 = scmp.eq.s32.totalorder %s843_s16, 0  ;;  %p134_p4 = scmp.eq.s32.totalorder %s699_s18, 3 }
   0x6   : > { %s977_s17 = smov (%p30_p0, %s28_s17), 0  ;;  %s69_s20 = sadd.s32 1, %s831_s13 }
   0x7   : > { %p78_p3 = por %p77_p2, %p76_p1  ;;  %s65_s19 = ssub.s32 %s839_s15, %s977_s17 }
   0x8   : > { %p67_p5 = scmp.eq.s32.totalorder %s65_s19, 0  ;;  %p901_p6 = por %p134_p4, %p76_p1 }
   0x9   : > { %p703_p7 = scmp.ge.s32.totalorder %s843_s16, 4 }
   0xa   : > { %s906_s22 = scalar_select %p67_p5, %s831_s13, %s69_s20  }
   0xb   : > { %168 = sbr.rel (%p703_p7) target bundleno = 36 (0x24), region = 20 }
  0x10   : > { %171 = sbr.rel (!%p78_p3) target bundleno = 36 (0x24), region = 24  ;;  %s173_s23 = sand.u32 (%p78_p3), 1, %s831_s13  }
  0x11   : > { %s735_s24 = sshll.u32 (%p78_p3), %s839_s15, 3  ;;  %s704_s25 = sshll.u32 (%p78_p3), %s173_s23, 7 }
  0x12   : > { %s914_s28 = scalar_lea.vmem (%p78_p3), %s968_s1, %s735_s24  ;;  %s175_s29 = scalar_lea.vmem (%p78_p3), [#allocation3], %s704_s25 }
  0x13   : > { %v240_v0 = vld [vmem:[%s914_s28] sm:$0xff] (%p78_p3) }
  0x14   : > { %v242_v1 = vld [vmem:[%s914_s28 + $0x20] sm:$0xff] (%p78_p3)  ;;  %241 = vst [vmem:[%s175_s29] sm:$0xff] (%p78_p3), %v240_v0 }
  0x15   : > { %v244_v2 = vld [vmem:[%s914_s28 + $0x40] sm:$0xff]  ;;  %243 = vst [vmem:[%s175_s29 + $0x8] sm:$0xff] %v242_v1 }
  0x16   : > { %245 = vst [vmem:[%s175_s29 + $0x10] sm:$0xff] %v244_v2  ;;  %v246_v3 = vld [vmem:[%s914_s28 + $0x60] sm:$0xff] }
  0x17   : > { %v248_v4 = vld [vmem:[%s914_s28 + $0x80] sm:$0xff]  ;;  %247 = vst [vmem:[%s175_s29 + $0x18] sm:$0xff] %v246_v3 }
  0x18   : > { %v250_v5 = vld [vmem:[%s914_s28 + $0xa0] sm:$0xff]  ;;  %249 = vst [vmem:[%s175_s29 + $0x20] sm:$0xff] %v248_v4 }
  0x19   : > { %251 = vst [vmem:[%s175_s29 + $0x28] sm:$0xff] %v250_v5  ;;  %v252_v6 = vld [vmem:[%s914_s28 + $0xc0] sm:$0xff] }
  0x1a   : > { %v254_v7 = vld [vmem:[%s914_s28 + $0xe0] sm:$0xff]  ;;  %253 = vst [vmem:[%s175_s29 + $0x30] sm:$0xff] %v252_v6 }
  0x1b   : > { %v256_v8 = vld [vmem:[%s914_s28 + $0x100] sm:$0xff]  ;;  %255 = vst [vmem:[%s175_s29 + $0x38] sm:$0xff] %v254_v7 }
  0x1c   : > { %257 = vst [vmem:[%s175_s29 + $0x40] sm:$0xff] %v256_v8  ;;  %v258_v9 = vld [vmem:[%s914_s28 + $0x120] sm:$0xff] }
  0x1d   : > { %v260_v10 = vld [vmem:[%s914_s28 + $0x140] sm:$0xff]  ;;  %259 = vst [vmem:[%s175_s29 + $0x48] sm:$0xff] %v258_v9 }
  0x1e   : > { %v262_v11 = vld [vmem:[%s914_s28 + $0x160] sm:$0xff]  ;;  %261 = vst [vmem:[%s175_s29 + $0x50] sm:$0xff] %v260_v10 }
  0x1f   : > { %263 = vst [vmem:[%s175_s29 + $0x58] sm:$0xff] %v262_v11  ;;  %v264_v12 = vld [vmem:[%s914_s28 + $0x180] sm:$0xff] }
  0x20   : > { %v266_v13 = vld [vmem:[%s914_s28 + $0x1a0] sm:$0xff]  ;;  %265 = vst [vmem:[%s175_s29 + $0x60] sm:$0xff] %v264_v12 }
  0x21   : > { %v268_v14 = vld [vmem:[%s914_s28 + $0x1c0] sm:$0xff]  ;;  %267 = vst [vmem:[%s175_s29 + $0x68] sm:$0xff] %v266_v13 }
  0x22   : > { %269 = vst [vmem:[%s175_s29 + $0x70] sm:$0xff] %v268_v14  ;;  %v270_v15 = vld [vmem:[%s914_s28 + $0x1e0] sm:$0xff] }
  0x23   : > { %271 = vst [vmem:[%s175_s29 + $0x78] sm:$0xff] %v270_v15 }
  0x24 PF: > { %p707_p8 = scmp.ge.s32.totalorder %s843_s16, 1  ;;  %p284_p9 = scmp.lt.s32.totalorder %s843_s16, 5 }
  0x26   : > { %p285_p10 = pnand %p707_p8, %p284_p9 }
  0x27   : > { %s291_s30 = sand.u32 (!%p285_p10), 1, %s827_s12   ;;  %s710_s8 = sshll.u32 (!%p285_p10), %s835_s14, 1 }
  0x28   : > { %288 = sbr.rel (%p285_p10) target bundleno = 290 (0x122), region = 66  ;;  %s708_s4 = sshll.u32 (!%p285_p10), %s291_s30, 7 }
  0x29   : > { %s293_s5 = scalar_lea.vmem (!%p285_p10), [#allocation3], %s708_s4  ;;  %p337_p11 = scmp.lt.s32.totalorder (!%p285_p10), %s710_s8, 7 }
  0x2a   : > { %s709_s18 = sshll.u32 (!%p285_p10), %s291_s30, 4 }
  0x2b   : > { %s324_s19 = scalar_lea.vmem (!%p285_p10), [#allocation4], %s709_s18 }
  0x2d   : > { %v845_v16 = vmov 0   ;;  %v780_v17 = vld [vmem:[%s293_s5 + $0x74] ss:$8 sps:$4 sm:$0xff]   ;;  %v782_v18 = vld [vmem:[%s293_s5 + $0x70] ss:$8 sps:$4 sm:$0xff]   ;;  %v804_v33 = vld [vmem:[%s967_s0] sm:$0xff]   ;;  %v520_v34 = vlaneseq }
  0x2e   : > { %492 = vmatprep.mubr.bf16.mxu0 %v845_v16  ;;  %460 = vmatprep.subr.bf16.mxu0 %v780_v17  ;;  %v783_v19 = vld [vmem:[%s293_s5 + $0x64] ss:$8 sps:$4 sm:$0xff]   ;;  %v785_v20 = vld [vmem:[%s293_s5 + $0x60] ss:$8 sps:$4 sm:$0xff]   ;;  %v786_v21 = vld [vmem:[%s293_s5 + $0x54] ss:$8 sps:$4 sm:$0xff]  }
  0x2f   : > { %461 = vmatpush1.bf16.msra.mxu0 %v782_v18  ;;  %v788_v22 = vld [vmem:[%s293_s5 + $0x50] ss:$8 sps:$4 sm:$0xff]   ;;  %v789_v23 = vld [vmem:[%s293_s5 + $0x44] ss:$8 sps:$4 sm:$0xff]   ;;  %v791_v24 = vld [vmem:[%s293_s5 + $0x40] ss:$8 sps:$4 sm:$0xff]  }
  0x30   : > { %462 = vmatprep.subr.bf16.mxu0 %v783_v19  ;;  %v792_v25 = vld [vmem:[%s293_s5 + $0x34] ss:$8 sps:$4 sm:$0xff]   ;;  %v794_v26 = vld [vmem:[%s293_s5 + $0x30] ss:$8 sps:$4 sm:$0xff]   ;;  %v795_v27 = vld [vmem:[%s293_s5 + $0x24] ss:$8 sps:$4 sm:$0xff]  }
  0x31   : > { %v797_v28 = vld [vmem:[%s293_s5 + $0x20] ss:$8 sps:$4 sm:$0xff]   ;;  %v798_v29 = vld [vmem:[%s293_s5 + $0x14] ss:$8 sps:$4 sm:$0xff]   ;;  %v800_v30 = vld [vmem:[%s293_s5 + $0x10] ss:$8 sps:$4 sm:$0xff]  }
  0x32   : > { %v801_v31 = vld [vmem:[%s293_s5 + $0x4] ss:$8 sps:$4 sm:$0xff]   ;;  %v803_v32 = vld [vmem:[%s293_s5] ss:$8 sps:$4 sm:$0xff]   ;;  %s979_s8 = smov (!%p337_p11, %s710_s8), 7  ;;  %v521_v35 = vshrl.u32 %v520_v34, 7 }
  0x33   : > { %463 = vmatpush1.bf16.msra.mxu0 %v785_v20  ;;  %s339_s11 = scalar_lea.vmem %s969_s2, %s979_s8  ;;  %s738_s20 = sshll.u32 (%p901_p6), %s835_s14, 3 }
  0x34   : > { %464 = vmatprep.subr.bf16.mxu0 %v786_v21  ;;  %v522_v36 = vsub.s32 0, %v521_v35  ;;  %v526_v37 = vsub.s32 1, %v521_v35  ;;  %v518_v38 = vld [vmem:[%s339_s11] sm:$0x3]  ;;  %s560_s24 = scalar_lea.vmem (%p901_p6), %s970_s3, %s738_s20 }
  0x36   : > { %v523_v39 = vrot.slane %v518_v38, %v522_v36  ;;  %v527_v40 = vrot.slane %v518_v38, %v526_v37 }
  0x37   : > { %465 = vmatpush1.bf16.msra.mxu0 %v788_v22 }
  0x38   : > { %466 = vmatprep.subr.bf16.mxu0 %v789_v23 }
  0x3b   : > { %467 = vmatpush1.bf16.msra.mxu0 %v791_v24 }
  0x3c   : > { %468 = vmatprep.subr.bf16.mxu0 %v792_v25 }
  0x3f   : > { %469 = vmatpush1.bf16.msra.mxu0 %v794_v26 }
  0x40   : > { %470 = vmatprep.subr.bf16.mxu0 %v795_v27 }
  0x43   : > { %471 = vmatpush1.bf16.msra.mxu0 %v797_v28 }
  0x44   : > { %472 = vmatprep.subr.bf16.mxu0 %v798_v29 }
  0x47   : > { %473 = vmatpush1.bf16.msra.mxu0 %v800_v30 }
  0x48   : > { %474 = vmatprep.subr.bf16.mxu0 %v801_v31 }
  0x4b   : > { %475 = vmatpush1.bf16.msra.mxu0 %v803_v32 }
  0x4e   : > { %493 = vmatmul.mubr.bf16.vlgmr.msra.gmra.mxu0 %v804_v33 }
 0x10e   : > { %v494_v41 = vpop.f32.mrf.mxu0 }
 0x10f   : > { %v530_v43 = vadd.f32 %v523_v39, %v494_v41 }
 0x110   : > { %v496_v42 = vpop.f32.mrf.mxu0 }
 0x111   : > { %v531_v44 = vadd.f32 %v527_v40, %v496_v42 }
 0x112   : > { %v498_v45 = vpop.f32.mrf.mxu0 }
 0x113   : > { %v736_v46 = vpack.c.bf16 %v531_v44, %v530_v43  ;;  %v532_v48 = vadd.f32 %v523_v39, %v498_v45 }
 0x114   : > { %v500_v47 = vpop.f32.mrf.mxu0 }
 0x115   : > { %546 = vst [vmem:[%s324_s19] sm:$0xff] %v736_v46  ;;  %v533_v49 = vadd.f32 %v527_v40, %v500_v47  ;;  %554 = sbr.rel (!%p901_p6) target bundleno = 290 (0x122), region = 82 }
 0x117   : > { %v737_v50 = vpack.c.bf16 %v533_v49, %v532_v48 }
 0x119   : > { %547 = vst [vmem:[%s324_s19 + $0x8] sm:$0xff] %v737_v50 }
 0x11c   : > { %v591_v51 = vld [vmem:[%s324_s19] sm:$0xff] }
 0x11d   : > { %592 = vst [vmem:[%s560_s24] sm:$0xff] %v591_v51 }
 0x120   : > { %v593_v52 = vld [vmem:[%s324_s19 + $0x8] sm:$0xff] }
 0x121   : > { %594 = vst [vmem:[%s560_s24 + $0x20] sm:$0xff] %v593_v52 }
 0x122 PF: > { %s13_s16 = sadd.s32 1, %s843_s16   ;;  %s972_s12 = smov %s831_s13 }
 0x123   : > { %p10_p12 = scmp.ge.s32.totalorder %s13_s16, 6   ;;  %s973_s13 = smov %s906_s22 }
 0x124   : > { %s974_s14 = smov %s839_s15  ;;  %s975_s15 = smov %s977_s17 }
 0x125   :  { %12 = sbr.rel (!%p10_p12) target bundleno = 3 (0x3), region = 157 }

// kernel: pretrained_encoder_tir_forward.23
= control target key start
LH: loop header
LB: loop body
LE: loop exit
PB: predicated region body
PF: predicated region fallthrough
CT: control target
= control target key end

     0   :  { %10 = vsyncpa [#allocation4], 0  ;;  %s1191_s0 = inlined_call_operand.vmem [shape: bf16[2,8,256], index: 0, kind: input, shape index: {}]   ;;  %s1192_s1 = inlined_call_operand.vmem [shape: bf16[2,128,256], index: 1, kind: input, shape index: {}]   ;;  %s1193_s2 = inlined_call_operand.vmem [shape: bf16[2,128,256], index: 2, kind: input, shape index: {}]   ;;  %s1194_s3 = inlined_call_operand.hbm [shape: f32[2,8,128], index: 3, kind: output, shape index: {0}]   ;;  %s1195_s4 = inlined_call_operand.vmem [shape: bf16[2,8,256], index: 4, kind: output, shape index: {1}]  }
   0x1   :  { %12 = vsyncpa [#allocation4 + $0x1], 0  ;;  %s1039_s15 = smov 0   ;;  %s1041_s16 = smov 0  }
   0x2   :  { %s1043_s17 = smov 0   ;;  %s1045_s18 = smov 0  }
   0x3   :  { %s1047_s19 = smov 0   ;;  %s1049_s20 = smov 0  }
   0x4 LB: > { %s770_s21 = sadd.s32 4294967295, %s1010_s20   ;;  %s771_s22 = sadd.s32 4294967294, %s1010_s20   ;;  %s1010_s20 = sphi %s1049_s20, %s18_s20   ;;  %s1006_s19 = sphi %s1047_s19, %s1202_s19   ;;  %s1002_s18 = sphi %s1045_s18, %s1201_s18   ;;  %s998_s17 = sphi %s1043_s17, %s1200_s17   ;;  %s994_s16 = sphi %s1041_s16, %s1199_s16   ;;  %s990_s15 = sphi %s1039_s15, %s1198_s15  }
   0x5   : > { %s30_s23 = sadd.s32 1, %s1006_s19  ;;  %s121_s24 = sadd.s32 1, %s998_s17 }
   0x6   : > { %p32_p0 = scmp.ge.s32.totalorder %s30_s23, 2  ;;  %p131_p1 = scmp.ne.s32.totalorder %s998_s17, %s994_s16 }
   0x7   : > { %p132_p2 = scmp.eq.s32.totalorder %s770_s21, 1  ;;  %p137_p3 = scmp.ne.s32.totalorder %s994_s16, %s990_s15 }
   0x8   : > { %s1204_s23 = smov (%p32_p0, %s30_s23), 0  ;;  %p138_p5 = scmp.eq.s32.totalorder %s771_s22, 1 }
   0x9   : > { %p1079_p4 = por %p132_p2, %p131_p1  ;;  %s116_s26 = ssub.s32 %s1006_s19, %s1204_s23 }
   0xa   : > { %p774_p6 = scmp.ge.s32.totalorder %s1010_s20, 1  ;;  %p119_p7 = scmp.eq.s32.totalorder %s116_s26, 0 }
   0xb   : > { %p1086_p8 = por %p138_p5, %p137_p3  ;;  %p218_p9 = scmp.lt.s32.totalorder %s1010_s20, 3 }
   0xc   : > { %s1092_s28 = scalar_select %p119_p7, %s998_s17, %s121_s24  }
   0xd   : > { %p219_p10 = pnand %p774_p6, %p218_p9 }
   0xe   : > { %p269_p11 = scmp.lt.s32.totalorder (!%p219_p10), %s1002_s18, 1  ;;  %s259_s21 = sand.u32 (!%p219_p10), 1, %s994_s16  }
   0xf   : > { %222 = sbr.rel (%p219_p10) target bundleno = 485 (0x1e5), region = 32  ;;  %s775_s22 = sshll.u32 (!%p219_p10), %s259_s21, 3 }
  0x10   : > { %s261_s24 = scalar_lea.vmem (!%p219_p10), [#allocation3], %s775_s22  ;;  %s820_s26 = sshll.u32 (!%p219_p10), %s1002_s18, 7 }
  0x11   : > { %s613_s9 = scalar_lea.sflag (!%p219_p10), [#allocation4], %s259_s21 }
  0x14   : > { %s1096_s29 = scalar_select %p269_p11, %s1002_s18, 1  ;;  %v1012_v35 = vmov 0  }
  0x15   : > { %585 = vmatprep.mubr.bf16.mxu1 %v1012_v35 }
  0x16   : > { %s824_s30 = sshll.u32 %s1096_s29, 7  ;;  %s823_s8 = sshll.u32 %s1096_s29, 3 }
  0x17   : > { %s1102_s7 = scalar_lea.vmem %s1192_s1, %s824_s30  ;;  %s273_s11 = scalar_lea.vmem %s1191_s0, %s823_s8 }
  0x18   : > { %v884_v0 = vld [vmem:[%s1102_s7 + $0x74] ss:$8 sps:$4 sm:$0xff]   ;;  %v886_v1 = vld [vmem:[%s1102_s7 + $0x70] ss:$8 sps:$4 sm:$0xff]   ;;  %v887_v2 = vld [vmem:[%s1102_s7 + $0x64] ss:$8 sps:$4 sm:$0xff]   ;;  %s1118_s14 = scalar_lea.vmem %s1193_s2, %s824_s30 }
  0x19   : > { %428 = vmatprep.subr.bf16.mxu0 %v884_v0  ;;  %v889_v3 = vld [vmem:[%s1102_s7 + $0x60] ss:$8 sps:$4 sm:$0xff]   ;;  %v890_v4 = vld [vmem:[%s1102_s7 + $0x54] ss:$8 sps:$4 sm:$0xff]   ;;  %v912_v8 = vld [vmem:[%s1118_s14 + $0x70] ss:$8 sps:$4 sm:$0xff]  }
  0x1a   : > { %429 = vmatpush1.bf16.xpose.msra.mxu0 %v886_v1  ;;  %v308_v5 = vld [vmem:[%s273_s11] sm:$0xff]  ;;  %v910_v7 = vld [vmem:[%s1118_s14 + $0x74] ss:$8 sps:$4 sm:$0xff]   ;;  %v892_v10 = vld [vmem:[%s1102_s7 + $0x50] ss:$8 sps:$4 sm:$0xff]   ;;  %s632_s30 = sshll.u32 %s261_s24, 4  ;;  %s633_s30 = int_to_ptr.vmem [resolvable:$true] %s632_s30 }
  0x1b   : > { %430 = vmatprep.subr.bf16.mxu0 %v887_v2  ;;  %v785_v6 = vcombine.high %v308_v5, %v308_v5  ;;  %553 = vmatprep.subr.bf16.mxu1 %v910_v7  ;;  %v913_v9 = vld [vmem:[%s1118_s14 + $0x64] ss:$8 sps:$4 sm:$0xff]   ;;  %v915_v11 = vld [vmem:[%s1118_s14 + $0x60] ss:$8 sps:$4 sm:$0xff]   ;;  %v916_v12 = vld [vmem:[%s1118_s14 + $0x54] ss:$8 sps:$4 sm:$0xff]   ;;  %v784_v32 = vcombine.low %v308_v5, %v308_v5 }
  0x1c   : > { %554 = vmatpush1.bf16.msra.mxu1 %v912_v8  ;;  %v893_v13 = vld [vmem:[%s1102_s7 + $0x44] ss:$8 sps:$4 sm:$0xff]   ;;  %v918_v14 = vld [vmem:[%s1118_s14 + $0x50] ss:$8 sps:$4 sm:$0xff]   ;;  %v921_v16 = vld [vmem:[%s1118_s14 + $0x40] ss:$8 sps:$4 sm:$0xff]  }
  0x1d   : > { %460 = vmatprep.mubr.bf16.mxu0 %v785_v6  ;;  %555 = vmatprep.subr.bf16.mxu1 %v913_v9  ;;  %v919_v15 = vld [vmem:[%s1118_s14 + $0x44] ss:$8 sps:$4 sm:$0xff]   ;;  %v895_v17 = vld [vmem:[%s1102_s7 + $0x40] ss:$8 sps:$4 sm:$0xff]   ;;  %v922_v18 = vld [vmem:[%s1118_s14 + $0x34] ss:$8 sps:$4 sm:$0xff]  }
  0x1e   : > { %v896_v19 = vld [vmem:[%s1102_s7 + $0x34] ss:$8 sps:$4 sm:$0xff]   ;;  %v924_v20 = vld [vmem:[%s1118_s14 + $0x30] ss:$8 sps:$4 sm:$0xff]   ;;  %v925_v21 = vld [vmem:[%s1118_s14 + $0x24] ss:$8 sps:$4 sm:$0xff]  }
  0x1f   : > { %v927_v22 = vld [vmem:[%s1118_s14 + $0x20] ss:$8 sps:$4 sm:$0xff]   ;;  %v898_v23 = vld [vmem:[%s1102_s7 + $0x30] ss:$8 sps:$4 sm:$0xff]   ;;  %v928_v24 = vld [vmem:[%s1118_s14 + $0x14] ss:$8 sps:$4 sm:$0xff]  }
  0x20   : > { %556 = vmatpush1.bf16.msra.mxu1 %v915_v11  ;;  %v899_v25 = vld [vmem:[%s1102_s7 + $0x24] ss:$8 sps:$4 sm:$0xff]   ;;  %v930_v26 = vld [vmem:[%s1118_s14 + $0x10] ss:$8 sps:$4 sm:$0xff]   ;;  %v901_v27 = vld [vmem:[%s1102_s7 + $0x20] ss:$8 sps:$4 sm:$0xff]  }
  0x21   : > { %557 = vmatprep.subr.bf16.mxu1 %v916_v12  ;;  %v902_v28 = vld [vmem:[%s1102_s7 + $0x14] ss:$8 sps:$4 sm:$0xff]   ;;  %v904_v29 = vld [vmem:[%s1102_s7 + $0x10] ss:$8 sps:$4 sm:$0xff]   ;;  %v905_v30 = vld [vmem:[%s1102_s7 + $0x4] ss:$8 sps:$4 sm:$0xff]  }
  0x22   : > { %431 = vmatpush1.bf16.xpose.msra.mxu0 %v889_v3  ;;  %v907_v31 = vld [vmem:[%s1102_s7] ss:$8 sps:$4 sm:$0xff]   ;;  %v931_v33 = vld [vmem:[%s1118_s14 + $0x4] ss:$8 sps:$4 sm:$0xff]   ;;  %s630_s7 = scalar_lea.hbm %s1194_s3, %s820_s26  ;;  %s934_s10 = scalar_lea.vmem %s633_s30, 128 }
  0x23   : > { %432 = vmatprep.subr.bf16.mxu0 %v890_v4  ;;  %v933_v34 = vld [vmem:[%s1118_s14] ss:$8 sps:$4 sm:$0xff]   ;;  %p935_p12 = scmp.ne.s32.totalorder %s633_s30, %s934_s10  ;;  %s1013_s11 = smov [#allocation3]  }
  0x24   : > { %558 = vmatpush1.bf16.msra.mxu1 %v918_v14  ;;  %s938_s12 = sshll.u32 %s1013_s11, 4  ;;  %s939_s12 = int_to_ptr.vmem [resolvable:$false] %s938_s12 }
  0x25   : > { %559 = vmatprep.subr.bf16.mxu1 %v919_v15  ;;  %p936_p13 = pnand %p935_p12, %p1079_p4  ;;  %s940_s13 = scalar_lea.vmem %s939_s12, 256 }
  0x26   : > { %p941_p1 = scmp.lt.s32.totalorder %s633_s30, %s939_s12  ;;  %p942_p2 = scmp.lt.s32.totalorder %s940_s13, %s934_s10 }
  0x27   : > { %p937_p0 = pneg %p936_p13 }
  0x28   : > { %560 = vmatpush1.bf16.msra.mxu1 %v921_v16  ;;  %p943_p3 = por %p942_p2, %p941_p1 }
  0x29   : > { %561 = vmatprep.subr.bf16.mxu1 %v922_v18 }
  0x2a   : > { %433 = vmatpush1.bf16.xpose.msra.mxu0 %v892_v10  ;;  %p944_p5 = pnand %p943_p3, %p937_p0 }
  0x2b   : > { %434 = vmatprep.subr.bf16.mxu0 %v893_v13 }
  0x2c   : > { %562 = vmatpush1.bf16.msra.mxu1 %v924_v20 }
  0x2d   : > { %563 = vmatprep.subr.bf16.mxu1 %v925_v21 }
  0x30   : > { %564 = vmatpush1.bf16.msra.mxu1 %v927_v22 }
  0x31   : > { %565 = vmatprep.subr.bf16.mxu1 %v928_v24 }
  0x32   : > { %435 = vmatpush1.bf16.xpose.msra.mxu0 %v895_v17 }
  0x33   : > { %436 = vmatprep.subr.bf16.mxu0 %v896_v19 }
  0x34   : > { %566 = vmatpush1.bf16.msra.mxu1 %v930_v26 }
  0x35   : > { %567 = vmatprep.subr.bf16.mxu1 %v931_v33 }
  0x38   : > { %568 = vmatpush1.bf16.msra.mxu1 %v933_v34 }
  0x3a   : > { %437 = vmatpush1.bf16.xpose.msra.mxu0 %v898_v23 }
  0x3b   : > { %438 = vmatprep.subr.bf16.mxu0 %v899_v25 }
  0x42   : > { %439 = vmatpush1.bf16.xpose.msra.mxu0 %v901_v27 }
  0x43   : > { %440 = vmatprep.subr.bf16.mxu0 %v902_v28 }
  0x4a   : > { %441 = vmatpush1.bf16.xpose.msra.mxu0 %v904_v29 }
  0x4b   : > { %442 = vmatprep.subr.bf16.mxu0 %v905_v30 }
  0x52   : > { %443 = vmatpush1.bf16.xpose.msra.mxu0 %v907_v31 }
  0x59   : > { %461 = vmatmul.mubr.bf16.vlgmr.msra.gmra.mxu0 %v784_v32 }
 0x119   : > { %v462_v36 = vpop.f32.mrf.mxu0 }
 0x11a   : > { %v468_v37 = vmul.f32 0.07071068, %v462_v36 }
 0x11b   : > { %v464_v38 = vpop.f32.mrf.mxu0 }
 0x11c   : > { %469 = vst [vmem:[%s261_s24] sm:$0xff] %v468_v37  ;;  %v472_v39 = vpack.c.bf16 %v468_v37, %v468_v37 }
 0x11d   : > { %v465_v40 = vpop.f32.mrf.mxu0 }
 0x11e   : > { %586 = vmatmul.mubr.bf16.vlgmr.msra.gmra.mxu1 %v472_v39 }
 0x11f   : > { %v466_v41 = vpop.f32.mrf.mxu0 }
 0x120   : > { %947 = shalt.err (!%p944_p5)
}
 0x121   : > { %s948_s18 = scalar_lea.hbm %s630_s7, 128  ;;  %s952_s22 = scalar_lea.hbm %s1194_s3, 256 }
 0x122   : > { %p949_p6 = scmp.ne.s32.totalorder %s630_s7, %s948_s18  ;;  %p953_p10 = scmp.lt.s32.totalorder %s630_s7, %s1194_s3 }
 0x123   : > { %p954_p11 = scmp.lt.s32.totalorder %s952_s22, %s948_s18 }
 0x124   : > { %p950_p7 = pnand %p949_p6, %p1079_p4 }
 0x125   : > { %p955_p12 = por %p954_p11, %p953_p10 }
 0x126   : > { %p951_p9 = pneg %p950_p7 }
 0x128   : > { %p956_p13 = pnand %p955_p12, %p951_p9 }
 0x12a   : > { %959 = shalt.err (!%p956_p13)
}
 0x12b   : > { %828 = dma.vmem_to_hbm [thread:$0]  (%p1079_p4), %s633_s30, 128, %s630_s7, %s613_s9  }
 0x12c   : > { %s300_s10 = scalar_lea.vmem %s1195_s4, %s823_s8 }
 0x1de   : > { %v587_v42 = vpop.f32.mrf.mxu1 }
 0x1e0   : > { %v589_v43 = vpop.f32.mrf.mxu1 }
 0x1e1   : > { %v827_v44 = vpack.c.bf16 %v589_v43, %v587_v42 }
 0x1e2   : > { %v591_v45 = vpop.f32.mrf.mxu1 }
 0x1e3   : > { %611 = vst [vmem:[%s300_s10] sm:$0xff] %v827_v44 }
 0x1e4   : > { %v592_v46 = vpop.f32.mrf.mxu1 }
 0x1e5 PF: > { %p834_p0 = scmp.ge.s32.totalorder %s1010_s20, 2  ;;  %s647_s11 = sand.u32 1, %s990_s15  }
 0x1e6   : > { %s648_s25 = scalar_lea.sflag [#allocation4], %s647_s11 }
 0x1e7   : > { %p831_p1 = pnand %p834_p0, %p1086_p8 }
 0x1e9   : > { %p832_p4 = pneg %p831_p1 }
 0x1eb   : > { %985 = dma.done.wait (%p832_p4), %s648_s25, 128  }
 0x1ec   : > { %987 = vsyncadd (%p832_p4), %s648_s25, 4294967168  ;;  %s18_s20 = sadd.s32 1, %s1010_s20   ;;  %s1198_s15 = smov %s994_s16 }
 0x1ed   : > { %p15_p2 = scmp.ge.s32.totalorder %s18_s20, 4   ;;  %s1199_s16 = smov %s998_s17 }
 0x1ee   : > { %s1200_s17 = smov %s1092_s28  ;;  %s1201_s18 = smov %s1006_s19 }
 0x1ef   : > { %s1202_s19 = smov %s1204_s23  ;;  %17 = sbr.rel (!%p15_p2) target bundleno = 4 (0x4), region = 93 }
 0x1f4   :  { %661 = vsyncpa [#allocation4], 1 }
 0x1f5   :  { %663 = vsyncpa [#allocation4 + $0x1], 1 }

// kernel: pretrained_encoder_tir_forward.19
= control target key start
LH: loop header
LB: loop body
LE: loop exit
PB: predicated region body
PF: predicated region fallthrough
CT: control target
= control target key end

     0   :  { %s803_s12 = smov 0   ;;  %s805_s13 = smov 0   ;;  %s892_s0 = inlined_call_operand.vmem [shape: bf16[8,128], index: 0, kind: input, shape index: {}]   ;;  %s893_s1 = inlined_call_operand.vmem [shape: bf16[128,2048], index: 1, kind: input, shape index: {}]   ;;  %s894_s2 = inlined_call_operand.vmem [shape: f32[1,2048], index: 2, kind: input, shape index: {}]   ;;  %s895_s3 = inlined_call_operand.vmem [shape: f32[8,2048], index: 3, kind: output, shape index: {}]  }
   0x1   :  { %s807_s14 = smov 0   ;;  %s809_s15 = smov 0  }
   0x2   :  { %s811_s16 = smov 0  }
   0x3 LB: > { %s28_s17 = sadd.s32 1, %s776_s15  ;;  %p76_p1 = scmp.ne.s32.totalorder %s768_s13, %s764_s12  ;;  %s780_s16 = sphi %s811_s16, %s13_s16   ;;  %s776_s15 = sphi %s809_s15, %s899_s15   ;;  %s772_s14 = sphi %s807_s14, %s898_s14   ;;  %s768_s13 = sphi %s805_s13, %s897_s13   ;;  %s764_s12 = sphi %s803_s12, %s896_s12  }
   0x4   : > { %p30_p0 = scmp.ge.s32.totalorder %s28_s17, 8  ;;  %p77_p2 = scmp.eq.s32.totalorder %s780_s16, 0 }
   0x5   : > { %s69_s19 = sadd.s32 1, %s768_s13  ;;  %p649_p5 = scmp.ge.s32.totalorder %s780_s16, 8 }
   0x6   : > { %s901_s17 = smov (%p30_p0, %s28_s17), 0  ;;  %p78_p3 = por %p77_p2, %p76_p1 }
   0x7   : > { %s65_s18 = ssub.s32 %s776_s15, %s901_s17  ;;  %166 = sbr.rel (%p649_p5) target bundleno = 32 (0x20), region = 20 }
   0x8   : > { %p67_p4 = scmp.eq.s32.totalorder %s65_s18, 0 }
   0xa   : > { %s838_s20 = scalar_select %p67_p4, %s768_s13, %s69_s19  }
   0xc   : > { %169 = sbr.rel (!%p78_p3) target bundleno = 32 (0x20), region = 24  ;;  %s171_s21 = sand.u32 (%p78_p3), 1, %s768_s13  }
   0xd   : > { %s676_s22 = sshll.u32 (%p78_p3), %s776_s15, 3  ;;  %s650_s23 = sshll.u32 (%p78_p3), %s171_s21, 7 }
   0xe   : > { %s846_s26 = scalar_lea.vmem (%p78_p3), %s893_s1, %s676_s22  ;;  %s173_s27 = scalar_lea.vmem (%p78_p3), [#allocation3], %s650_s23 }
   0xf   : > { %v238_v0 = vld [vmem:[%s846_s26] sm:$0xff] (%p78_p3) }
  0x10   : > { %v240_v1 = vld [vmem:[%s846_s26 + $0x40] sm:$0xff] (%p78_p3)  ;;  %239 = vst [vmem:[%s173_s27] sm:$0xff] (%p78_p3), %v238_v0 }
  0x11   : > { %v242_v2 = vld [vmem:[%s846_s26 + $0x80] sm:$0xff]  ;;  %241 = vst [vmem:[%s173_s27 + $0x8] sm:$0xff] %v240_v1 }
  0x12   : > { %243 = vst [vmem:[%s173_s27 + $0x10] sm:$0xff] %v242_v2  ;;  %v244_v3 = vld [vmem:[%s846_s26 + $0xc0] sm:$0xff] }
  0x13   : > { %v246_v4 = vld [vmem:[%s846_s26 + $0x100] sm:$0xff]  ;;  %245 = vst [vmem:[%s173_s27 + $0x18] sm:$0xff] %v244_v3 }
  0x14   : > { %v248_v5 = vld [vmem:[%s846_s26 + $0x140] sm:$0xff]  ;;  %247 = vst [vmem:[%s173_s27 + $0x20] sm:$0xff] %v246_v4 }
  0x15   : > { %249 = vst [vmem:[%s173_s27 + $0x28] sm:$0xff] %v248_v5  ;;  %v250_v6 = vld [vmem:[%s846_s26 + $0x180] sm:$0xff] }
  0x16   : > { %v252_v7 = vld [vmem:[%s846_s26 + $0x1c0] sm:$0xff]  ;;  %251 = vst [vmem:[%s173_s27 + $0x30] sm:$0xff] %v250_v6 }
  0x17   : > { %v254_v8 = vld [vmem:[%s846_s26 + $0x200] sm:$0xff]  ;;  %253 = vst [vmem:[%s173_s27 + $0x38] sm:$0xff] %v252_v7 }
  0x18   : > { %255 = vst [vmem:[%s173_s27 + $0x40] sm:$0xff] %v254_v8  ;;  %v256_v9 = vld [vmem:[%s846_s26 + $0x240] sm:$0xff] }
  0x19   : > { %v258_v10 = vld [vmem:[%s846_s26 + $0x280] sm:$0xff]  ;;  %257 = vst [vmem:[%s173_s27 + $0x48] sm:$0xff] %v256_v9 }
  0x1a   : > { %v260_v11 = vld [vmem:[%s846_s26 + $0x2c0] sm:$0xff]  ;;  %259 = vst [vmem:[%s173_s27 + $0x50] sm:$0xff] %v258_v10 }
  0x1b   : > { %261 = vst [vmem:[%s173_s27 + $0x58] sm:$0xff] %v260_v11  ;;  %v262_v12 = vld [vmem:[%s846_s26 + $0x300] sm:$0xff] }
  0x1c   : > { %v264_v13 = vld [vmem:[%s846_s26 + $0x340] sm:$0xff]  ;;  %263 = vst [vmem:[%s173_s27 + $0x60] sm:$0xff] %v262_v12 }
  0x1d   : > { %v266_v14 = vld [vmem:[%s846_s26 + $0x380] sm:$0xff]  ;;  %265 = vst [vmem:[%s173_s27 + $0x68] sm:$0xff] %v264_v13 }
  0x1e   : > { %267 = vst [vmem:[%s173_s27 + $0x70] sm:$0xff] %v266_v14  ;;  %v268_v15 = vld [vmem:[%s846_s26 + $0x3c0] sm:$0xff] }
  0x1f   : > { %269 = vst [vmem:[%s173_s27 + $0x78] sm:$0xff] %v268_v15 }
  0x20 PF: > { %p653_p6 = scmp.ge.s32.totalorder %s780_s16, 1  ;;  %p282_p7 = scmp.lt.s32.totalorder %s780_s16, 9 }
  0x22   : > { %p283_p8 = pnand %p653_p6, %p282_p7 }
  0x23   : > { %s289_s28 = sand.u32 (!%p283_p8), 1, %s764_s12   ;;  %s655_s6 = sshll.u32 (!%p283_p8), %s772_s14, 1 }
  0x24   : > { %286 = sbr.rel (%p283_p8) target bundleno = 274 (0x112), region = 66  ;;  %s654_s29 = sshll.u32 (!%p283_p8), %s289_s28, 7 }
  0x25   : > { %s291_s30 = scalar_lea.vmem (!%p283_p8), [#allocation3], %s654_s29  ;;  %p337_p9 = scmp.lt.s32.totalorder (!%p283_p8), %s655_s6, 15 }
  0x29   : > { %v782_v16 = vmov 0   ;;  %v718_v17 = vld [vmem:[%s291_s30 + $0x74] ss:$8 sps:$4 sm:$0xff]   ;;  %v720_v18 = vld [vmem:[%s291_s30 + $0x70] ss:$8 sps:$4 sm:$0xff]   ;;  %v509_v34 = vlaneseq  ;;  %s903_s6 = smov (!%p337_p9, %s655_s6), 15 }
  0x2a   : > { %489 = vmatprep.mubr.bf16.mxu0 %v782_v16  ;;  %457 = vmatprep.subr.bf16.mxu0 %v718_v17  ;;  %v721_v19 = vld [vmem:[%s291_s30 + $0x64] ss:$8 sps:$4 sm:$0xff]   ;;  %v723_v20 = vld [vmem:[%s291_s30 + $0x60] ss:$8 sps:$4 sm:$0xff]   ;;  %v724_v21 = vld [vmem:[%s291_s30 + $0x54] ss:$8 sps:$4 sm:$0xff]   ;;  %s339_s9 = scalar_lea.vmem %s894_s2, %s903_s6 }
  0x2b   : > { %458 = vmatpush1.bf16.msra.mxu0 %v720_v18  ;;  %v726_v22 = vld [vmem:[%s291_s30 + $0x50] ss:$8 sps:$4 sm:$0xff]   ;;  %v727_v23 = vld [vmem:[%s291_s30 + $0x44] ss:$8 sps:$4 sm:$0xff]   ;;  %v729_v24 = vld [vmem:[%s291_s30 + $0x40] ss:$8 sps:$4 sm:$0xff]  }
  0x2c   : > { %459 = vmatprep.subr.bf16.mxu0 %v721_v19  ;;  %v730_v25 = vld [vmem:[%s291_s30 + $0x34] ss:$8 sps:$4 sm:$0xff]   ;;  %v732_v26 = vld [vmem:[%s291_s30 + $0x30] ss:$8 sps:$4 sm:$0xff]   ;;  %v733_v27 = vld [vmem:[%s291_s30 + $0x24] ss:$8 sps:$4 sm:$0xff]  }
  0x2d   : > { %v735_v28 = vld [vmem:[%s291_s30 + $0x20] ss:$8 sps:$4 sm:$0xff]   ;;  %v736_v29 = vld [vmem:[%s291_s30 + $0x14] ss:$8 sps:$4 sm:$0xff]   ;;  %v738_v30 = vld [vmem:[%s291_s30 + $0x10] ss:$8 sps:$4 sm:$0xff]  }
  0x2e   : > { %v739_v31 = vld [vmem:[%s291_s30 + $0x4] ss:$8 sps:$4 sm:$0xff]   ;;  %v741_v32 = vld [vmem:[%s291_s30] ss:$8 sps:$4 sm:$0xff]   ;;  %v510_v35 = vshrl.u32 %v509_v34, 7  ;;  %s657_s10 = sshll.u32 %s903_s6, 3 }
  0x2f   : > { %460 = vmatpush1.bf16.msra.mxu0 %v723_v20  ;;  %v360_v33 = vld [vmem:[%s892_s0] sm:$0xf]  ;;  %s349_s14 = scalar_lea.vmem %s895_s3, %s657_s10 }
  0x30   : > { %461 = vmatprep.subr.bf16.mxu0 %v724_v21  ;;  %v511_v36 = vsub.s32 0, %v510_v35  ;;  %v507_v37 = vld [vmem:[%s339_s9] sm:$0x3]  ;;  %v515_v38 = vsub.s32 1, %v510_v35 }
  0x32   : > { %v512_v39 = vrot.slane %v507_v37, %v511_v36  ;;  %v516_v40 = vrot.slane %v507_v37, %v515_v38 }
  0x33   : > { %462 = vmatpush1.bf16.msra.mxu0 %v726_v22 }
  0x34   : > { %463 = vmatprep.subr.bf16.mxu0 %v727_v23 }
  0x37   : > { %464 = vmatpush1.bf16.msra.mxu0 %v729_v24 }
  0x38   : > { %465 = vmatprep.subr.bf16.mxu0 %v730_v25 }
  0x3b   : > { %466 = vmatpush1.bf16.msra.mxu0 %v732_v26 }
  0x3c   : > { %467 = vmatprep.subr.bf16.mxu0 %v733_v27 }
  0x3f   : > { %468 = vmatpush1.bf16.msra.mxu0 %v735_v28 }
  0x40   : > { %469 = vmatprep.subr.bf16.mxu0 %v736_v29 }
  0x43   : > { %470 = vmatpush1.bf16.msra.mxu0 %v738_v30 }
  0x44   : > { %471 = vmatprep.subr.bf16.mxu0 %v739_v31 }
  0x47   : > { %472 = vmatpush1.bf16.msra.mxu0 %v741_v32 }
  0x4a   : > { %490 = vmatmul.mubr.bf16.vlgmr.msra.gmra.mxu0 %v360_v33 }
 0x10a   : > { %v491_v41 = vpop.f32.mrf.mxu0 }
 0x10b   : > { %v519_v42 = vadd.f32 %v512_v39, %v491_v41 }
 0x10c   : > { %v493_v43 = vpop.f32.mrf.mxu0 }
 0x10d   : > { %v521_v44 = vmax.f32 %v519_v42, 0.0  ;;  %v520_v45 = vadd.f32 %v516_v40, %v493_v43 }
 0x10e   : > { %v495_v46 = vpop.f32.mrf.mxu0 }
 0x10f   : > { %523 = vst [vmem:[%s349_s14] sm:$0xff] %v521_v44  ;;  %v522_v47 = vmax.f32 %v520_v45, 0.0 }
 0x110   : > { %v496_v48 = vpop.f32.mrf.mxu0 }
 0x111   : > { %524 = vst [vmem:[%s349_s14 + $0x8] sm:$0xff] %v522_v47 }
 0x112 PF: > { %s13_s16 = sadd.s32 1, %s780_s16   ;;  %s896_s12 = smov %s768_s13 }
 0x113   : > { %p10_p10 = scmp.ge.s32.totalorder %s13_s16, 10   ;;  %s897_s13 = smov %s838_s20 }
 0x114   : > { %s898_s14 = smov %s776_s15  ;;  %s899_s15 = smov %s901_s17 }
 0x115   :  { %12 = sbr.rel (!%p10_p10) target bundleno = 3 (0x3), region = 119 }

// kernel: pretrained_encoder_tir_forward.18
= control target key start
LH: loop header
LB: loop body
LE: loop exit
PB: predicated region body
PF: predicated region fallthrough
CT: control target
= control target key end

     0   :  { %s820_s1 = inlined_call_operand.vmem [shape: bf16[256,128], index: 1, kind: input, shape index: {}]   ;;  %s821_s0 = inlined_call_operand.vmem [shape: bf16[128,256], index: 0, kind: input, shape index: {}]   ;;  %s822_s2 = inlined_call_operand.vmem [shape: f32[1,128], index: 2, kind: input, shape index: {}]   ;;  %s823_s3 = inlined_call_operand.vmem [shape: f32[128,128], index: 3, kind: output, shape index: {}]  }
   0x1   :  { %v595_v0 = vld [vmem:[%s820_s1 + $0x78] sm:$0xff]   ;;  %v597_v2 = vld [vmem:[%s820_s1 + $0x70] sm:$0xff]   ;;  %v599_v4 = vld [vmem:[%s820_s1 + $0x68] sm:$0xff]  }
   0x2   :  { %v596_v1 = vld [vmem:[%s820_s1 + $0x38] sm:$0xff]   ;;  %515 = vmatprep.subr.bf16.mxu0 %v595_v0  ;;  %579 = vmatprep.subr.bf16.mxu1 %v595_v0  ;;  %v598_v3 = vld [vmem:[%s820_s1 + $0x30] sm:$0xff]   ;;  %v600_v5 = vld [vmem:[%s820_s1 + $0x28] sm:$0xff]  }
   0x3   :  { %516 = vmatpush3.bf16.msra.mxu0 %v596_v1  ;;  %587 = vmatpush3.bf16.msra.mxu1 %v596_v1  ;;  %v601_v6 = vld [vmem:[%s820_s1 + $0x60] sm:$0xff]   ;;  %v603_v8 = vld [vmem:[%s820_s1 + $0x58] sm:$0xff]   ;;  %v605_v10 = vld [vmem:[%s820_s1 + $0x50] sm:$0xff]  }
   0x4   :  { %517 = vmatprep.subr.bf16.mxu0 %v597_v2  ;;  %580 = vmatprep.subr.bf16.mxu1 %v597_v2  ;;  %v602_v7 = vld [vmem:[%s820_s1 + $0x20] sm:$0xff]   ;;  %v604_v9 = vld [vmem:[%s820_s1 + $0x18] sm:$0xff]   ;;  %v606_v13 = vld [vmem:[%s820_s1 + $0x10] sm:$0xff]  }
   0x5   :  { %v613_v11 = vld [vmem:[%s821_s0 + $0x4] ss:$8 sps:$4 sm:$0xff]   ;;  %v611_v18 = vld [vmem:[%s821_s0] ss:$8 sps:$4 sm:$0xff]   ;;  %v617_v20 = vld [vmem:[%s821_s0 + $0x14] ss:$8 sps:$4 sm:$0xff]  }
   0x6   :  { %v616_v12 = vld [vmem:[%s821_s0 + $0x44] ss:$8 sps:$4 sm:$0xff]   ;;  %307 = vmatprep.mubr.bf16.mxu0 %v613_v11  ;;  %v614_v19 = vld [vmem:[%s821_s0 + $0x40] ss:$8 sps:$4 sm:$0xff]   ;;  %v619_v21 = vld [vmem:[%s821_s0 + $0x54] ss:$8 sps:$4 sm:$0xff]  }
   0x7   :  { %518 = vmatpush3.bf16.msra.mxu0 %v598_v3  ;;  %588 = vmatpush3.bf16.msra.mxu1 %v598_v3  ;;  %v607_v14 = vld [vmem:[%s820_s1 + $0x48] sm:$0xff]   ;;  %v609_v16 = vld [vmem:[%s820_s1 + $0x40] sm:$0xff]   ;;  %v621_v22 = vld [vmem:[%s821_s0 + $0x10] ss:$8 sps:$4 sm:$0xff]  }
   0x8   :  { %519 = vmatprep.subr.bf16.mxu0 %v599_v4  ;;  %581 = vmatprep.subr.bf16.mxu1 %v599_v4  ;;  %v608_v15 = vld [vmem:[%s820_s1 + $0x8] sm:$0xff]   ;;  %v610_v17 = vld [vmem:[%s820_s1] sm:$0xff]   ;;  %v622_v23 = vld [vmem:[%s821_s0 + $0x50] ss:$8 sps:$4 sm:$0xff]  }
   0x9   :  { %339 = vmatprep.mubr.bf16.mxu1 %v616_v12  ;;  %v623_v24 = vld [vmem:[%s821_s0 + $0x24] ss:$8 sps:$4 sm:$0xff]   ;;  %v627_v26 = vld [vmem:[%s821_s0 + $0x20] ss:$8 sps:$4 sm:$0xff]   ;;  %v629_v28 = vld [vmem:[%s821_s0 + $0x34] ss:$8 sps:$4 sm:$0xff]  }
   0xa   :  { %v625_v25 = vld [vmem:[%s821_s0 + $0x64] ss:$8 sps:$4 sm:$0xff]   ;;  %v628_v27 = vld [vmem:[%s821_s0 + $0x60] ss:$8 sps:$4 sm:$0xff]   ;;  %v631_v29 = vld [vmem:[%s821_s0 + $0x74] ss:$8 sps:$4 sm:$0xff]  }
   0xb   :  { %520 = vmatpush3.bf16.msra.mxu0 %v600_v5  ;;  %589 = vmatpush3.bf16.msra.mxu1 %v600_v5  ;;  %v633_v30 = vld [vmem:[%s821_s0 + $0x30] ss:$8 sps:$4 sm:$0xff]   ;;  %v754_v35 = vld [vmem:[%s822_s2] ss:$0 sm:$0xff] }
   0xc   :  { %521 = vmatprep.subr.bf16.mxu0 %v601_v6  ;;  %582 = vmatprep.subr.bf16.mxu1 %v601_v6  ;;  %v634_v31 = vld [vmem:[%s821_s0 + $0x70] ss:$8 sps:$4 sm:$0xff]  }
   0xf   :  { %522 = vmatpush3.bf16.msra.mxu0 %v602_v7  ;;  %590 = vmatpush3.bf16.msra.mxu1 %v602_v7 }
  0x10   :  { %523 = vmatprep.subr.bf16.mxu0 %v603_v8  ;;  %583 = vmatprep.subr.bf16.mxu1 %v603_v8 }
  0x13   :  { %524 = vmatpush3.bf16.msra.mxu0 %v604_v9  ;;  %591 = vmatpush3.bf16.msra.mxu1 %v604_v9 }
  0x14   :  { %525 = vmatprep.subr.bf16.mxu0 %v605_v10  ;;  %584 = vmatprep.subr.bf16.mxu1 %v605_v10 }
  0x17   :  { %526 = vmatpush3.bf16.msra.mxu0 %v606_v13  ;;  %592 = vmatpush3.bf16.msra.mxu1 %v606_v13 }
  0x18   :  { %527 = vmatprep.subr.bf16.mxu0 %v607_v14  ;;  %585 = vmatprep.subr.bf16.mxu1 %v607_v14 }
  0x1b   :  { %528 = vmatpush3.bf16.msra.mxu0 %v608_v15  ;;  %593 = vmatpush3.bf16.msra.mxu1 %v608_v15 }
  0x1c   :  { %529 = vmatprep.subr.bf16.mxu0 %v609_v16  ;;  %586 = vmatprep.subr.bf16.mxu1 %v609_v16 }
  0x1f   :  { %530 = vmatpush3.bf16.msra.mxu0 %v610_v17  ;;  %594 = vmatpush3.bf16.msra.mxu1 %v610_v17 }
  0x22   :  { %308 = vmatmul.mubr.bf16.vlgmr.msra.gmra.mxu0 %v611_v18  ;;  %340 = vmatmul.mubr.bf16.vlgmr.msra.gmra.mxu1 %v614_v19 }
  0x23   :  { %315 = vmatprep.mubr.bf16.mxu0 %v617_v20  ;;  %347 = vmatprep.mubr.bf16.mxu1 %v619_v21 }
  0x2a   :  { %316 = vmatmul.mubr.bf16.gmra.mxu0 %v621_v22  ;;  %348 = vmatmul.mubr.bf16.gmra.mxu1 %v622_v23 }
  0x2b   :  { %323 = vmatprep.mubr.bf16.mxu0 %v623_v24  ;;  %355 = vmatprep.mubr.bf16.mxu1 %v625_v25 }
  0x32   :  { %324 = vmatmul.mubr.bf16.gmra.mxu0 %v627_v26  ;;  %356 = vmatmul.mubr.bf16.gmra.mxu1 %v628_v27 }
  0x33   :  { %331 = vmatprep.mubr.bf16.mxu0 %v629_v28  ;;  %363 = vmatprep.mubr.bf16.mxu1 %v631_v29 }
  0x3a   :  { %332 = vmatmul.mubr.bf16.gmra.mxu0 %v633_v30  ;;  %364 = vmatmul.mubr.bf16.gmra.mxu1 %v634_v31 }
  0xe2   :  { %v531_v32 = vpop.f32.mrf.mxu0  ;;  %v555_v33 = vpop.f32.mrf.mxu1 }
  0xe4   :  { %v532_v34 = vpop.f32.mrf.mxu0  ;;  %v556_v36 = vpop.f32.mrf.mxu1 }
  0xe5   :  { %v533_v37 = vadd.f32 %v532_v34, %v531_v32  ;;  %v557_v38 = vadd.f32 %v556_v36, %v555_v33 }
  0xe6   :  { %v534_v39 = vpop.f32.mrf.mxu0  ;;  %v558_v40 = vpop.f32.mrf.mxu1 }
  0xe7   :  { %v430_v41 = vadd.f32 %v533_v37, %v754_v35  ;;  %v438_v42 = vadd.f32 %v557_v38, %v754_v35 }
  0xe8   :  { %v535_v43 = vpop.f32.mrf.mxu0  ;;  %v559_v44 = vpop.f32.mrf.mxu1 }
  0xe9   :  { %v446_v45 = vmax.f32 %v430_v41, 0.0  ;;  %v454_v46 = vmax.f32 %v438_v42, 0.0  ;;  %v536_v47 = vadd.f32 %v535_v43, %v534_v39  ;;  %v560_v48 = vadd.f32 %v559_v44, %v558_v40 }
  0xea   :  { %v537_v49 = vpop.f32.mrf.mxu0  ;;  %v561_v50 = vpop.f32.mrf.mxu1 }
  0xeb   :  { %462 = vst [vmem:[%s823_s3] sm:$0xff] %v446_v45  ;;  %470 = vst [vmem:[%s823_s3 + $0x40] sm:$0xff] %v454_v46  ;;  %v431_v51 = vadd.f32 %v536_v47, %v754_v35  ;;  %v439_v52 = vadd.f32 %v560_v48, %v754_v35 }
  0xec   :  { %v538_v53 = vpop.f32.mrf.mxu0  ;;  %v562_v54 = vpop.f32.mrf.mxu1 }
  0xed   :  { %v447_v55 = vmax.f32 %v431_v51, 0.0  ;;  %v455_v56 = vmax.f32 %v439_v52, 0.0  ;;  %v539_v57 = vadd.f32 %v538_v53, %v537_v49  ;;  %v563_v58 = vadd.f32 %v562_v54, %v561_v50 }
  0xee   :  { %v540_v59 = vpop.f32.mrf.mxu0  ;;  %v564_v60 = vpop.f32.mrf.mxu1 }
  0xef   :  { %463 = vst [vmem:[%s823_s3 + $0x8] sm:$0xff] %v447_v55  ;;  %471 = vst [vmem:[%s823_s3 + $0x48] sm:$0xff] %v455_v56  ;;  %v432_v61 = vadd.f32 %v539_v57, %v754_v35  ;;  %v440_v62 = vadd.f32 %v563_v58, %v754_v35 }
  0xf0   :  { %v541_v63 = vpop.f32.mrf.mxu0  ;;  %v565_v0 = vpop.f32.mrf.mxu1 }
  0xf1   :  { %v448_v1 = vmax.f32 %v432_v61, 0.0  ;;  %v456_v2 = vmax.f32 %v440_v62, 0.0  ;;  %v542_v3 = vadd.f32 %v541_v63, %v540_v59  ;;  %v566_v4 = vadd.f32 %v565_v0, %v564_v60 }
  0xf2   :  { %v543_v5 = vpop.f32.mrf.mxu0  ;;  %v567_v6 = vpop.f32.mrf.mxu1 }
  0xf3   :  { %464 = vst [vmem:[%s823_s3 + $0x10] sm:$0xff] %v448_v1  ;;  %472 = vst [vmem:[%s823_s3 + $0x50] sm:$0xff] %v456_v2  ;;  %v433_v7 = vadd.f32 %v542_v3, %v754_v35  ;;  %v441_v8 = vadd.f32 %v566_v4, %v754_v35 }
  0xf4   :  { %v544_v9 = vpop.f32.mrf.mxu0  ;;  %v568_v10 = vpop.f32.mrf.mxu1 }
  0xf5   :  { %v449_v11 = vmax.f32 %v433_v7, 0.0  ;;  %v457_v12 = vmax.f32 %v441_v8, 0.0  ;;  %v545_v13 = vadd.f32 %v544_v9, %v543_v5  ;;  %v569_v14 = vadd.f32 %v568_v10, %v567_v6 }
  0xf6   :  { %v546_v15 = vpop.f32.mrf.mxu0  ;;  %v570_v16 = vpop.f32.mrf.mxu1 }
  0xf7   :  { %465 = vst [vmem:[%s823_s3 + $0x18] sm:$0xff] %v449_v11  ;;  %473 = vst [vmem:[%s823_s3 + $0x58] sm:$0xff] %v457_v12  ;;  %v434_v17 = vadd.f32 %v545_v13, %v754_v35  ;;  %v442_v18 = vadd.f32 %v569_v14, %v754_v35 }
  0xf8   :  { %v547_v19 = vpop.f32.mrf.mxu0  ;;  %v571_v20 = vpop.f32.mrf.mxu1 }
  0xf9   :  { %v450_v21 = vmax.f32 %v434_v17, 0.0  ;;  %v458_v22 = vmax.f32 %v442_v18, 0.0  ;;  %v548_v23 = vadd.f32 %v547_v19, %v546_v15  ;;  %v572_v24 = vadd.f32 %v571_v20, %v570_v16 }
  0xfa   :  { %v549_v25 = vpop.f32.mrf.mxu0  ;;  %v573_v26 = vpop.f32.mrf.mxu1 }
  0xfb   :  { %466 = vst [vmem:[%s823_s3 + $0x20] sm:$0xff] %v450_v21  ;;  %474 = vst [vmem:[%s823_s3 + $0x60] sm:$0xff] %v458_v22  ;;  %v435_v27 = vadd.f32 %v548_v23, %v754_v35  ;;  %v443_v28 = vadd.f32 %v572_v24, %v754_v35 }
  0xfc   :  { %v550_v29 = vpop.f32.mrf.mxu0  ;;  %v574_v30 = vpop.f32.mrf.mxu1 }
  0xfd   :  { %v451_v31 = vmax.f32 %v435_v27, 0.0  ;;  %v459_v32 = vmax.f32 %v443_v28, 0.0  ;;  %v551_v33 = vadd.f32 %v550_v29, %v549_v25  ;;  %v575_v34 = vadd.f32 %v574_v30, %v573_v26 }
  0xfe   :  { %v552_v36 = vpop.f32.mrf.mxu0  ;;  %v576_v37 = vpop.f32.mrf.mxu1 }
  0xff   :  { %467 = vst [vmem:[%s823_s3 + $0x28] sm:$0xff] %v451_v31  ;;  %475 = vst [vmem:[%s823_s3 + $0x68] sm:$0xff] %v459_v32  ;;  %v436_v38 = vadd.f32 %v551_v33, %v754_v35  ;;  %v444_v39 = vadd.f32 %v575_v34, %v754_v35 }
 0x100   :  { %v553_v40 = vpop.f32.mrf.mxu0  ;;  %v577_v41 = vpop.f32.mrf.mxu1 }
 0x101   :  { %v452_v42 = vmax.f32 %v436_v38, 0.0  ;;  %v460_v43 = vmax.f32 %v444_v39, 0.0  ;;  %v554_v44 = vadd.f32 %v553_v40, %v552_v36  ;;  %v578_v45 = vadd.f32 %v577_v41, %v576_v37 }
 0x103   :  { %468 = vst [vmem:[%s823_s3 + $0x30] sm:$0xff] %v452_v42  ;;  %476 = vst [vmem:[%s823_s3 + $0x70] sm:$0xff] %v460_v43  ;;  %v437_v46 = vadd.f32 %v554_v44, %v754_v35  ;;  %v445_v47 = vadd.f32 %v578_v45, %v754_v35 }
 0x105   :  { %v453_v48 = vmax.f32 %v437_v46, 0.0  ;;  %v461_v49 = vmax.f32 %v445_v47, 0.0 }
 0x107   :  { %469 = vst [vmem:[%s823_s3 + $0x38] sm:$0xff] %v453_v48  ;;  %477 = vst [vmem:[%s823_s3 + $0x78] sm:$0xff] %v461_v49 }

// kernel: pretrained_encoder_tir_forward.22
= control target key start
LH: loop header
LB: loop body
LE: loop exit
PB: predicated region body
PF: predicated region fallthrough
CT: control target
= control target key end

     0   :  { %s1522_s12 = smov 0   ;;  %s1524_s13 = smov 0   ;;  %s1833_s0 = inlined_call_operand.vmem [shape: bf16[8,2048], index: 0, kind: input, shape index: {}]   ;;  %s1834_s1 = inlined_call_operand.vmem [shape: bf16[2048,512], index: 1, kind: input, shape index: {}]   ;;  %s1835_s2 = inlined_call_operand.vmem [shape: f32[1,512], index: 2, kind: input, shape index: {}]   ;;  %s1836_s3 = inlined_call_operand.vmem [shape: bf16[8,512], index: 3, kind: output, shape index: {}]  }
   0x1   :  { %s1526_s14 = smov 0   ;;  %s1528_s15 = smov 0  }
   0x2   :  { %s1530_s16 = smov 0   ;;  %s1532_s17 = smov 0  }
   0x3   :  { %s1534_s18 = smov 0  }
   0x4 LB: > { %s25_s19 = sadd.s32 1, %s1491_s16  ;;  %s28_s20 = sadd.s32 1, %s1495_s17  ;;  %s1499_s18 = sphi %s1534_s18, %s13_s18   ;;  %s1495_s17 = sphi %s1532_s17, %s1842_s17   ;;  %s1491_s16 = sphi %s1530_s16, %s1841_s16   ;;  %s1487_s15 = sphi %s1528_s15, %s1840_s15   ;;  %s1483_s14 = sphi %s1526_s14, %s1839_s14   ;;  %s1479_s13 = sphi %s1524_s13, %s1838_s13   ;;  %s1475_s12 = sphi %s1522_s12, %s1837_s12  }
   0x5   : > { %p26_p0 = scmp.ge.s32.totalorder %s25_s19, 4  ;;  %p76_p1 = scmp.ne.s32.totalorder %s1479_s13, %s1475_s12 }
   0x6   : > { %p77_p2 = scmp.eq.s32.totalorder %s1499_s18, 0  ;;  %s69_s24 = sadd.s32 1, %s1479_s13 }
   0x7   : > { %s1844_s19 = smov (%p26_p0, %s25_s19), 0  ;;  %s1846_s20 = smov (!%p26_p0, %s28_s20), %s1495_s17 }
   0x8   : > { %p78_p3 = por %p77_p2, %p76_p1  ;;  %p30_p4 = scmp.ge.s32.totalorder %s1846_s20, 2 }
   0x9   : > { %s64_s21 = ssub.s32 %s1491_s16, %s1844_s19  ;;  %p1200_p6 = scmp.ge.s32.totalorder %s1499_s18, 8 }
   0xa   : > { %s1848_s20 = smov (%p30_p4, %s1846_s20), 0 }
   0xb   : > { %s65_s22 = ssub.s32 %s1495_s17, %s1848_s20  ;;  %156 = sbr.rel (%p1200_p6) target bundleno = 55 (0x37), region = 16 }
   0xc   : > { %s66_s23 = sor.u32 %s65_s22, %s64_s21 }
   0xd   : > { %p67_p5 = scmp.eq.s32.totalorder %s66_s23, 0 }
   0xf   : > { %s1573_s25 = scalar_select %p67_p5, %s1479_s13, %s69_s24  }
  0x10   : > { %172 = sbr.rel (!%p78_p3) target bundleno = 55 (0x37), region = 24  ;;  %s174_s26 = sand.u32 (%p78_p3), 1, %s1479_s13  }
  0x11   : > { %s1203_s27 = sshll.u32 (%p78_p3), %s1495_s17, 1  ;;  %s1201_s28 = sshll.u32 (%p78_p3), %s174_s26, 9 }
  0x12   : > { %s1286_s29 = sshll.u32 (%p78_p3), %s1491_s16, 8  ;;  %s1587_s8 = scalar_lea.vmem (%p78_p3), [#allocation3], %s1201_s28 }
  0x13   : > { %s180_s30 = sadd.s32 (%p78_p3), %s1286_s29, %s1203_s27 }
  0x14   : > { %s1205_s4 = sshll.u32 (%p78_p3), %s180_s30, 2 }
  0x15   : > { %s1582_s7 = scalar_lea.vmem %s1834_s1, %s1205_s4 }
  0x16   : > { %v337_v0 = vld [vmem:[%s1582_s7] sm:$0xff]  ;;  %v339_v1 = vld [vmem:[%s1582_s7 + $0x10] sm:$0xff] }
  0x17   : > { %v341_v2 = vld [vmem:[%s1582_s7 + $0x20] sm:$0xff]  ;;  %338 = vst [vmem:[%s1587_s8] sm:$0xff] %v337_v0  ;;  %340 = vst [vmem:[%s1587_s8 + $0x8] sm:$0xff] %v339_v1  ;;  %v343_v3 = vld [vmem:[%s1582_s7 + $0x30] sm:$0xff] }
  0x18   : > { %342 = vst [vmem:[%s1587_s8 + $0x10] sm:$0xff] %v341_v2  ;;  %v345_v4 = vld [vmem:[%s1582_s7 + $0x40] sm:$0xff]  ;;  %v347_v5 = vld [vmem:[%s1582_s7 + $0x50] sm:$0xff]  ;;  %344 = vst [vmem:[%s1587_s8 + $0x18] sm:$0xff] %v343_v3 }
  0x19   : > { %346 = vst [vmem:[%s1587_s8 + $0x20] sm:$0xff] %v345_v4  ;;  %348 = vst [vmem:[%s1587_s8 + $0x28] sm:$0xff] %v347_v5  ;;  %v349_v6 = vld [vmem:[%s1582_s7 + $0x60] sm:$0xff]  ;;  %v351_v7 = vld [vmem:[%s1582_s7 + $0x70] sm:$0xff] }
  0x1a   : > { %v353_v8 = vld [vmem:[%s1582_s7 + $0x80] sm:$0xff]  ;;  %350 = vst [vmem:[%s1587_s8 + $0x30] sm:$0xff] %v349_v6  ;;  %352 = vst [vmem:[%s1587_s8 + $0x38] sm:$0xff] %v351_v7  ;;  %v355_v9 = vld [vmem:[%s1582_s7 + $0x90] sm:$0xff] }
  0x1b   : > { %354 = vst [vmem:[%s1587_s8 + $0x40] sm:$0xff] %v353_v8  ;;  %v357_v10 = vld [vmem:[%s1582_s7 + $0xa0] sm:$0xff]  ;;  %v359_v11 = vld [vmem:[%s1582_s7 + $0xb0] sm:$0xff]  ;;  %356 = vst [vmem:[%s1587_s8 + $0x48] sm:$0xff] %v355_v9 }
  0x1c   : > { %358 = vst [vmem:[%s1587_s8 + $0x50] sm:$0xff] %v357_v10  ;;  %360 = vst [vmem:[%s1587_s8 + $0x58] sm:$0xff] %v359_v11  ;;  %v361_v12 = vld [vmem:[%s1582_s7 + $0xc0] sm:$0xff]  ;;  %v363_v13 = vld [vmem:[%s1582_s7 + $0xd0] sm:$0xff] }
  0x1d   : > { %v365_v14 = vld [vmem:[%s1582_s7 + $0xe0] sm:$0xff]  ;;  %362 = vst [vmem:[%s1587_s8 + $0x60] sm:$0xff] %v361_v12  ;;  %364 = vst [vmem:[%s1587_s8 + $0x68] sm:$0xff] %v363_v13  ;;  %v367_v15 = vld [vmem:[%s1582_s7 + $0xf0] sm:$0xff] }
  0x1e   : > { %366 = vst [vmem:[%s1587_s8 + $0x70] sm:$0xff] %v365_v14  ;;  %v369_v16 = vld [vmem:[%s1582_s7 + $0x100] sm:$0xff]  ;;  %v371_v17 = vld [vmem:[%s1582_s7 + $0x110] sm:$0xff]  ;;  %368 = vst [vmem:[%s1587_s8 + $0x78] sm:$0xff] %v367_v15 }
  0x1f   : > { %370 = vst [vmem:[%s1587_s8 + $0x80] sm:$0xff] %v369_v16  ;;  %372 = vst [vmem:[%s1587_s8 + $0x88] sm:$0xff] %v371_v17  ;;  %v373_v18 = vld [vmem:[%s1582_s7 + $0x120] sm:$0xff]  ;;  %v375_v19 = vld [vmem:[%s1582_s7 + $0x130] sm:$0xff] }
  0x20   : > { %v377_v20 = vld [vmem:[%s1582_s7 + $0x140] sm:$0xff]  ;;  %374 = vst [vmem:[%s1587_s8 + $0x90] sm:$0xff] %v373_v18  ;;  %376 = vst [vmem:[%s1587_s8 + $0x98] sm:$0xff] %v375_v19  ;;  %v379_v21 = vld [vmem:[%s1582_s7 + $0x150] sm:$0xff] }
  0x21   : > { %378 = vst [vmem:[%s1587_s8 + $0xa0] sm:$0xff] %v377_v20  ;;  %v381_v22 = vld [vmem:[%s1582_s7 + $0x160] sm:$0xff]  ;;  %v383_v23 = vld [vmem:[%s1582_s7 + $0x170] sm:$0xff]  ;;  %380 = vst [vmem:[%s1587_s8 + $0xa8] sm:$0xff] %v379_v21 }
  0x22   : > { %382 = vst [vmem:[%s1587_s8 + $0xb0] sm:$0xff] %v381_v22  ;;  %384 = vst [vmem:[%s1587_s8 + $0xb8] sm:$0xff] %v383_v23  ;;  %v385_v24 = vld [vmem:[%s1582_s7 + $0x180] sm:$0xff]  ;;  %v387_v25 = vld [vmem:[%s1582_s7 + $0x190] sm:$0xff] }
  0x23   : > { %v389_v26 = vld [vmem:[%s1582_s7 + $0x1a0] sm:$0xff]  ;;  %386 = vst [vmem:[%s1587_s8 + $0xc0] sm:$0xff] %v385_v24  ;;  %388 = vst [vmem:[%s1587_s8 + $0xc8] sm:$0xff] %v387_v25  ;;  %v391_v27 = vld [vmem:[%s1582_s7 + $0x1b0] sm:$0xff] }
  0x24   : > { %390 = vst [vmem:[%s1587_s8 + $0xd0] sm:$0xff] %v389_v26  ;;  %v393_v28 = vld [vmem:[%s1582_s7 + $0x1c0] sm:$0xff]  ;;  %v395_v29 = vld [vmem:[%s1582_s7 + $0x1d0] sm:$0xff]  ;;  %392 = vst [vmem:[%s1587_s8 + $0xd8] sm:$0xff] %v391_v27 }
  0x25   : > { %394 = vst [vmem:[%s1587_s8 + $0xe0] sm:$0xff] %v393_v28  ;;  %396 = vst [vmem:[%s1587_s8 + $0xe8] sm:$0xff] %v395_v29  ;;  %v397_v30 = vld [vmem:[%s1582_s7 + $0x1e0] sm:$0xff]  ;;  %v399_v31 = vld [vmem:[%s1582_s7 + $0x1f0] sm:$0xff] }
  0x26   : > { %v401_v32 = vld [vmem:[%s1582_s7 + $0x200] sm:$0xff]  ;;  %398 = vst [vmem:[%s1587_s8 + $0xf0] sm:$0xff] %v397_v30  ;;  %400 = vst [vmem:[%s1587_s8 + $0xf8] sm:$0xff] %v399_v31  ;;  %v403_v33 = vld [vmem:[%s1582_s7 + $0x210] sm:$0xff] }
  0x27   : > { %402 = vst [vmem:[%s1587_s8 + $0x100] sm:$0xff] %v401_v32  ;;  %v405_v34 = vld [vmem:[%s1582_s7 + $0x220] sm:$0xff]  ;;  %v407_v35 = vld [vmem:[%s1582_s7 + $0x230] sm:$0xff]  ;;  %404 = vst [vmem:[%s1587_s8 + $0x108] sm:$0xff] %v403_v33 }
  0x28   : > { %406 = vst [vmem:[%s1587_s8 + $0x110] sm:$0xff] %v405_v34  ;;  %408 = vst [vmem:[%s1587_s8 + $0x118] sm:$0xff] %v407_v35  ;;  %v409_v36 = vld [vmem:[%s1582_s7 + $0x240] sm:$0xff]  ;;  %v411_v37 = vld [vmem:[%s1582_s7 + $0x250] sm:$0xff] }
  0x29   : > { %v413_v38 = vld [vmem:[%s1582_s7 + $0x260] sm:$0xff]  ;;  %410 = vst [vmem:[%s1587_s8 + $0x120] sm:$0xff] %v409_v36  ;;  %412 = vst [vmem:[%s1587_s8 + $0x128] sm:$0xff] %v411_v37  ;;  %v415_v39 = vld [vmem:[%s1582_s7 + $0x270] sm:$0xff] }
  0x2a   : > { %414 = vst [vmem:[%s1587_s8 + $0x130] sm:$0xff] %v413_v38  ;;  %v417_v40 = vld [vmem:[%s1582_s7 + $0x280] sm:$0xff]  ;;  %v419_v41 = vld [vmem:[%s1582_s7 + $0x290] sm:$0xff]  ;;  %416 = vst [vmem:[%s1587_s8 + $0x138] sm:$0xff] %v415_v39 }
  0x2b   : > { %418 = vst [vmem:[%s1587_s8 + $0x140] sm:$0xff] %v417_v40  ;;  %420 = vst [vmem:[%s1587_s8 + $0x148] sm:$0xff] %v419_v41  ;;  %v421_v42 = vld [vmem:[%s1582_s7 + $0x2a0] sm:$0xff]  ;;  %v423_v43 = vld [vmem:[%s1582_s7 + $0x2b0] sm:$0xff] }
  0x2c   : > { %v425_v44 = vld [vmem:[%s1582_s7 + $0x2c0] sm:$0xff]  ;;  %422 = vst [vmem:[%s1587_s8 + $0x150] sm:$0xff] %v421_v42  ;;  %424 = vst [vmem:[%s1587_s8 + $0x158] sm:$0xff] %v423_v43  ;;  %v427_v45 = vld [vmem:[%s1582_s7 + $0x2d0] sm:$0xff] }
  0x2d   : > { %426 = vst [vmem:[%s1587_s8 + $0x160] sm:$0xff] %v425_v44  ;;  %v429_v46 = vld [vmem:[%s1582_s7 + $0x2e0] sm:$0xff]  ;;  %v431_v47 = vld [vmem:[%s1582_s7 + $0x2f0] sm:$0xff]  ;;  %428 = vst [vmem:[%s1587_s8 + $0x168] sm:$0xff] %v427_v45 }
  0x2e   : > { %430 = vst [vmem:[%s1587_s8 + $0x170] sm:$0xff] %v429_v46  ;;  %432 = vst [vmem:[%s1587_s8 + $0x178] sm:$0xff] %v431_v47  ;;  %v433_v48 = vld [vmem:[%s1582_s7 + $0x300] sm:$0xff]  ;;  %v435_v49 = vld [vmem:[%s1582_s7 + $0x310] sm:$0xff] }
  0x2f   : > { %v437_v50 = vld [vmem:[%s1582_s7 + $0x320] sm:$0xff]  ;;  %434 = vst [vmem:[%s1587_s8 + $0x180] sm:$0xff] %v433_v48  ;;  %436 = vst [vmem:[%s1587_s8 + $0x188] sm:$0xff] %v435_v49  ;;  %v439_v51 = vld [vmem:[%s1582_s7 + $0x330] sm:$0xff] }
  0x30   : > { %438 = vst [vmem:[%s1587_s8 + $0x190] sm:$0xff] %v437_v50  ;;  %v441_v52 = vld [vmem:[%s1582_s7 + $0x340] sm:$0xff]  ;;  %v443_v53 = vld [vmem:[%s1582_s7 + $0x350] sm:$0xff]  ;;  %440 = vst [vmem:[%s1587_s8 + $0x198] sm:$0xff] %v439_v51 }
  0x31   : > { %442 = vst [vmem:[%s1587_s8 + $0x1a0] sm:$0xff] %v441_v52  ;;  %444 = vst [vmem:[%s1587_s8 + $0x1a8] sm:$0xff] %v443_v53  ;;  %v445_v54 = vld [vmem:[%s1582_s7 + $0x360] sm:$0xff]  ;;  %v447_v55 = vld [vmem:[%s1582_s7 + $0x370] sm:$0xff] }
  0x32   : > { %v449_v56 = vld [vmem:[%s1582_s7 + $0x380] sm:$0xff]  ;;  %446 = vst [vmem:[%s1587_s8 + $0x1b0] sm:$0xff] %v445_v54  ;;  %448 = vst [vmem:[%s1587_s8 + $0x1b8] sm:$0xff] %v447_v55  ;;  %v451_v57 = vld [vmem:[%s1582_s7 + $0x390] sm:$0xff] }
  0x33   : > { %450 = vst [vmem:[%s1587_s8 + $0x1c0] sm:$0xff] %v449_v56  ;;  %v453_v58 = vld [vmem:[%s1582_s7 + $0x3a0] sm:$0xff]  ;;  %v455_v59 = vld [vmem:[%s1582_s7 + $0x3b0] sm:$0xff]  ;;  %452 = vst [vmem:[%s1587_s8 + $0x1c8] sm:$0xff] %v451_v57 }
  0x34   : > { %454 = vst [vmem:[%s1587_s8 + $0x1d0] sm:$0xff] %v453_v58  ;;  %456 = vst [vmem:[%s1587_s8 + $0x1d8] sm:$0xff] %v455_v59  ;;  %v457_v60 = vld [vmem:[%s1582_s7 + $0x3c0] sm:$0xff]  ;;  %v459_v61 = vld [vmem:[%s1582_s7 + $0x3d0] sm:$0xff] }
  0x35   : > { %v461_v62 = vld [vmem:[%s1582_s7 + $0x3e0] sm:$0xff]  ;;  %458 = vst [vmem:[%s1587_s8 + $0x1e0] sm:$0xff] %v457_v60  ;;  %460 = vst [vmem:[%s1587_s8 + $0x1e8] sm:$0xff] %v459_v61  ;;  %v463_v63 = vld [vmem:[%s1582_s7 + $0x3f0] sm:$0xff] }
  0x36   : > { %462 = vst [vmem:[%s1587_s8 + $0x1f0] sm:$0xff] %v461_v62  ;;  %464 = vst [vmem:[%s1587_s8 + $0x1f8] sm:$0xff] %v463_v63 }
  0x37 PF: > { %p1206_p7 = scmp.ge.s32.totalorder %s1499_s18, 1  ;;  %p477_p8 = scmp.lt.s32.totalorder %s1499_s18, 9 }
  0x39   : > { %p478_p9 = pnand %p1206_p7, %p477_p8 }
  0x3a   : > { %s484_s9 = sand.u32 (!%p478_p9), 1, %s1475_s12   ;;  %s1208_s10 = sshll.u32 (!%p478_p9), %s1483_s14, 2 }
  0x3b   : > { %481 = sbr.rel (%p478_p9) target bundleno = 353 (0x161), region = 66  ;;  %s1207_s11 = sshll.u32 (!%p478_p9), %s484_s9, 9 }
  0x3c   : > { %p527_p10 = scmp.lt.s32.totalorder (!%p478_p9), %s1208_s10, 15  ;;  %s1210_s21 = sshll.u32 (!%p478_p9), %s1487_s15, 1 }
  0x3d   : > { %p537_p11 = scmp.lt.s32.totalorder (!%p478_p9), %s1210_s21, 3  ;;  %s1736_s5 = scalar_lea.vmem (!%p478_p9), [#allocation3], %s1207_s11 }
  0x3e   : > { %p1213_p12 = scmp.ne.s32.totalorder (!%p478_p9), %s1483_s14, 0 }
  0x40   : > { %s1850_s10 = smov (!%p527_p10, %s1208_s10), 15  ;;  %s1852_s21 = smov (!%p537_p11, %s1210_s21), 3 }
  0x41   : > { %s1209_s22 = sshll.u32 %s1850_s10, 2  ;;  %s539_s12 = scalar_lea.vmem %s1835_s2, %s1852_s21 }
  0x42   : > { %s1722_s26 = scalar_lea.vmem %s1833_s0, %s1209_s22  ;;  %s1212_s29 = sshll.u32 %s1852_s21, 2 }
  0x43   : > { %s1734_s15 = scalar_lea.vmem %s1836_s3, %s1212_s29  ;;  %554 = sbr.rel (%p1213_p12) target bundleno = 74 (0x4a), region = 74 }
  0x48   : > { %v1501_v0 = vmov 0.0  }
  0x49   : > { %555 = vst [vmem:[#allocation2] sm:$0xff] %v1501_v0  ;;  %556 = vst [vmem:[#allocation2 + $0x8] sm:$0xff] %v1501_v0 }
  0x4a PF: > { %v1345_v1 = vld [vmem:[%s1736_s5 + $0x74] ss:$8 sps:$4 sm:$0xff]   ;;  %v1349_v3 = vld [vmem:[%s1736_s5 + $0x70] ss:$8 sps:$4 sm:$0xff]   ;;  %v1351_v5 = vld [vmem:[%s1736_s5 + $0x64] ss:$8 sps:$4 sm:$0xff]  }
  0x4b   : > { %v1347_v2 = vld [vmem:[%s1736_s5 + $0x174] ss:$8 sps:$4 sm:$0xff]   ;;  %959 = vmatprep.subr.bf16.mxu0 %v1345_v1  ;;  %v1350_v4 = vld [vmem:[%s1736_s5 + $0x170] ss:$8 sps:$4 sm:$0xff]   ;;  %v1353_v6 = vld [vmem:[%s1736_s5 + $0x164] ss:$8 sps:$4 sm:$0xff]  }
  0x4c   : > { %1000 = vmatprep.subr.bf16.mxu1 %v1347_v2  ;;  %960 = vmatpush1.bf16.msra.mxu0 %v1349_v3  ;;  %v1355_v7 = vld [vmem:[%s1736_s5 + $0x60] ss:$8 sps:$4 sm:$0xff]   ;;  %v1357_v9 = vld [vmem:[%s1736_s5 + $0x54] ss:$8 sps:$4 sm:$0xff]   ;;  %v1361_v11 = vld [vmem:[%s1736_s5 + $0x50] ss:$8 sps:$4 sm:$0xff]  }
  0x4d   : > { %1001 = vmatpush1.bf16.msra.mxu1 %v1350_v4  ;;  %961 = vmatprep.subr.bf16.mxu0 %v1351_v5  ;;  %v1356_v8 = vld [vmem:[%s1736_s5 + $0x160] ss:$8 sps:$4 sm:$0xff]   ;;  %v1359_v10 = vld [vmem:[%s1736_s5 + $0x154] ss:$8 sps:$4 sm:$0xff]   ;;  %v1362_v12 = vld [vmem:[%s1736_s5 + $0x150] ss:$8 sps:$4 sm:$0xff]  }
  0x4e   : > { %1002 = vmatprep.subr.bf16.mxu1 %v1353_v6  ;;  %v1363_v13 = vld [vmem:[%s1736_s5 + $0x44] ss:$8 sps:$4 sm:$0xff]   ;;  %v1367_v15 = vld [vmem:[%s1736_s5 + $0x40] ss:$8 sps:$4 sm:$0xff]   ;;  %v1369_v17 = vld [vmem:[%s1736_s5 + $0x34] ss:$8 sps:$4 sm:$0xff]  }
  0x4f   : > { %v1365_v14 = vld [vmem:[%s1736_s5 + $0x144] ss:$8 sps:$4 sm:$0xff]   ;;  %v1368_v16 = vld [vmem:[%s1736_s5 + $0x140] ss:$8 sps:$4 sm:$0xff]   ;;  %v1371_v18 = vld [vmem:[%s1736_s5 + $0x134] ss:$8 sps:$4 sm:$0xff]  }
  0x50   : > { %962 = vmatpush1.bf16.msra.mxu0 %v1355_v7  ;;  %v1373_v19 = vld [vmem:[%s1736_s5 + $0x30] ss:$8 sps:$4 sm:$0xff]   ;;  %v1375_v21 = vld [vmem:[%s1736_s5 + $0x24] ss:$8 sps:$4 sm:$0xff]   ;;  %v1379_v23 = vld [vmem:[%s1736_s5 + $0x20] ss:$8 sps:$4 sm:$0xff]  }
  0x51   : > { %1003 = vmatpush1.bf16.msra.mxu1 %v1356_v8  ;;  %963 = vmatprep.subr.bf16.mxu0 %v1357_v9  ;;  %v1374_v20 = vld [vmem:[%s1736_s5 + $0x130] ss:$8 sps:$4 sm:$0xff]   ;;  %v1377_v22 = vld [vmem:[%s1736_s5 + $0x124] ss:$8 sps:$4 sm:$0xff]   ;;  %v1380_v24 = vld [vmem:[%s1736_s5 + $0x120] ss:$8 sps:$4 sm:$0xff]  }
  0x52   : > { %1004 = vmatprep.subr.bf16.mxu1 %v1359_v10  ;;  %v1381_v25 = vld [vmem:[%s1736_s5 + $0x14] ss:$8 sps:$4 sm:$0xff]   ;;  %v1385_v27 = vld [vmem:[%s1736_s5 + $0x10] ss:$8 sps:$4 sm:$0xff]   ;;  %v1387_v29 = vld [vmem:[%s1736_s5 + $0x4] ss:$8 sps:$4 sm:$0xff]  }
  0x53   : > { %v1383_v26 = vld [vmem:[%s1736_s5 + $0x114] ss:$8 sps:$4 sm:$0xff]   ;;  %v1386_v28 = vld [vmem:[%s1736_s5 + $0x110] ss:$8 sps:$4 sm:$0xff]   ;;  %v1389_v30 = vld [vmem:[%s1736_s5 + $0x104] ss:$8 sps:$4 sm:$0xff]  }
  0x54   : > { %964 = vmatpush1.bf16.msra.mxu0 %v1361_v11  ;;  %v1391_v31 = vld [vmem:[%s1736_s5] ss:$8 sps:$4 sm:$0xff]   ;;  %v1393_v33 = vld [vmem:[%s1736_s5 + $0xf4] ss:$8 sps:$4 sm:$0xff]   ;;  %v1397_v35 = vld [vmem:[%s1736_s5 + $0xf0] ss:$8 sps:$4 sm:$0xff]  }
  0x55   : > { %1005 = vmatpush1.bf16.msra.mxu1 %v1362_v12  ;;  %965 = vmatprep.subr.bf16.mxu0 %v1363_v13  ;;  %v1392_v32 = vld [vmem:[%s1736_s5 + $0x100] ss:$8 sps:$4 sm:$0xff]   ;;  %v1395_v34 = vld [vmem:[%s1736_s5 + $0x1f4] ss:$8 sps:$4 sm:$0xff]   ;;  %v1398_v36 = vld [vmem:[%s1736_s5 + $0x1f0] ss:$8 sps:$4 sm:$0xff]  }
  0x56   : > { %1006 = vmatprep.subr.bf16.mxu1 %v1365_v14  ;;  %v1399_v37 = vld [vmem:[%s1736_s5 + $0xe4] ss:$8 sps:$4 sm:$0xff]   ;;  %v1403_v39 = vld [vmem:[%s1736_s5 + $0xe0] ss:$8 sps:$4 sm:$0xff]   ;;  %v1405_v41 = vld [vmem:[%s1736_s5 + $0xd4] ss:$8 sps:$4 sm:$0xff]  }
  0x57   : > { %v1401_v38 = vld [vmem:[%s1736_s5 + $0x1e4] ss:$8 sps:$4 sm:$0xff]   ;;  %v1404_v40 = vld [vmem:[%s1736_s5 + $0x1e0] ss:$8 sps:$4 sm:$0xff]   ;;  %v1407_v42 = vld [vmem:[%s1736_s5 + $0x1d4] ss:$8 sps:$4 sm:$0xff]  }
  0x58   : > { %966 = vmatpush1.bf16.msra.mxu0 %v1367_v15  ;;  %v1409_v43 = vld [vmem:[%s1736_s5 + $0xd0] ss:$8 sps:$4 sm:$0xff]   ;;  %v1411_v45 = vld [vmem:[%s1736_s5 + $0xc4] ss:$8 sps:$4 sm:$0xff]   ;;  %v1415_v50 = vld [vmem:[%s1736_s5 + $0xc0] ss:$8 sps:$4 sm:$0xff]  }
  0x59   : > { %1007 = vmatpush1.bf16.msra.mxu1 %v1368_v16  ;;  %967 = vmatprep.subr.bf16.mxu0 %v1369_v17  ;;  %v1410_v44 = vld [vmem:[%s1736_s5 + $0x1d0] ss:$8 sps:$4 sm:$0xff]   ;;  %v1413_v46 = vld [vmem:[%s1736_s5 + $0x1c4] ss:$8 sps:$4 sm:$0xff]   ;;  %v1416_v51 = vld [vmem:[%s1736_s5 + $0x1c0] ss:$8 sps:$4 sm:$0xff]  }
  0x5a   : > { %1008 = vmatprep.subr.bf16.mxu1 %v1371_v18  ;;  %v559_v47 = vld [vmem:[%s1722_s26] sm:$0xff]  ;;  %v560_v49 = vld [vmem:[%s1722_s26 + $0x8] sm:$0xff]  ;;  %v1423_v57 = vld [vmem:[%s1736_s5 + $0xa4] ss:$8 sps:$4 sm:$0xff]   ;;  %p1282_p13 = scmp.ne.s32.totalorder %s1483_s14, 3 }
  0x5b   : > { %v1215_v48 = vcombine.high %v559_v47, %v559_v47  ;;  %v1217_v52 = vcombine.high %v560_v49, %v560_v49  ;;  %v1417_v53 = vld [vmem:[%s1736_s5 + $0xb4] ss:$8 sps:$4 sm:$0xff]   ;;  %v1421_v55 = vld [vmem:[%s1736_s5 + $0xb0] ss:$8 sps:$4 sm:$0xff]   ;;  %v1425_v58 = vld [vmem:[%s1736_s5 + $0x1a4] ss:$8 sps:$4 sm:$0xff]   ;;  %v1214_v5 = vcombine.low %v559_v47, %v559_v47  ;;  %v1216_v6 = vcombine.low %v560_v49, %v560_v49 }
  0x5c   : > { %968 = vmatpush1.bf16.msra.mxu0 %v1373_v19  ;;  %v1419_v54 = vld [vmem:[%s1736_s5 + $0x1b4] ss:$8 sps:$4 sm:$0xff]   ;;  %v1422_v56 = vld [vmem:[%s1736_s5 + $0x1b0] ss:$8 sps:$4 sm:$0xff]   ;;  %v1427_v59 = vld [vmem:[%s1736_s5 + $0xa0] ss:$8 sps:$4 sm:$0xff]  }
  0x5d   : > { %1009 = vmatpush1.bf16.msra.mxu1 %v1374_v20  ;;  %969 = vmatprep.subr.bf16.mxu0 %v1375_v21  ;;  %v1428_v60 = vld [vmem:[%s1736_s5 + $0x1a0] ss:$8 sps:$4 sm:$0xff]   ;;  %v1429_v61 = vld [vmem:[%s1736_s5 + $0x94] ss:$8 sps:$4 sm:$0xff]   ;;  %v1433_v63 = vld [vmem:[%s1736_s5 + $0x90] ss:$8 sps:$4 sm:$0xff]  }
  0x5e   : > { %1010 = vmatprep.subr.bf16.mxu1 %v1377_v22  ;;  %991 = vmatprep.mubr.bf16.mxu0 %v1215_v48  ;;  %v1431_v62 = vld [vmem:[%s1736_s5 + $0x194] ss:$8 sps:$4 sm:$0xff]   ;;  %v1434_v0 = vld [vmem:[%s1736_s5 + $0x190] ss:$8 sps:$4 sm:$0xff]   ;;  %v1435_v1 = vld [vmem:[%s1736_s5 + $0x84] ss:$8 sps:$4 sm:$0xff]  }
  0x5f   : > { %1032 = vmatprep.mubr.bf16.mxu1 %v1217_v52  ;;  %v1437_v2 = vld [vmem:[%s1736_s5 + $0x184] ss:$8 sps:$4 sm:$0xff]   ;;  %v1439_v3 = vld [vmem:[%s1736_s5 + $0x80] ss:$8 sps:$4 sm:$0xff]   ;;  %v557_v8 = vld [vmem:[#allocation2] sm:$0xff] }
  0x60   : > { %970 = vmatpush1.bf16.msra.mxu0 %v1379_v23  ;;  %v1440_v4 = vld [vmem:[%s1736_s5 + $0x180] ss:$8 sps:$4 sm:$0xff]   ;;  %v558_v12 = vld [vmem:[#allocation2 + $0x8] sm:$0xff] }
  0x61   : > { %1011 = vmatpush1.bf16.msra.mxu1 %v1380_v24  ;;  %971 = vmatprep.subr.bf16.mxu0 %v1381_v25 }
  0x62   : > { %1012 = vmatprep.subr.bf16.mxu1 %v1383_v26 }
  0x64   : > { %972 = vmatpush1.bf16.msra.mxu0 %v1385_v27 }
  0x65   : > { %1013 = vmatpush1.bf16.msra.mxu1 %v1386_v28  ;;  %973 = vmatprep.subr.bf16.mxu0 %v1387_v29 }
  0x66   : > { %1014 = vmatprep.subr.bf16.mxu1 %v1389_v30 }
  0x68   : > { %974 = vmatpush1.bf16.msra.mxu0 %v1391_v31 }
  0x69   : > { %1015 = vmatpush1.bf16.msra.mxu1 %v1392_v32  ;;  %975 = vmatprep.subr.bf16.mxu0 %v1393_v33 }
  0x6a   : > { %1016 = vmatprep.subr.bf16.mxu1 %v1395_v34 }
  0x6c   : > { %976 = vmatpush2.bf16.msra.mxu0 %v1397_v35 }
  0x6d   : > { %1017 = vmatpush2.bf16.msra.mxu1 %v1398_v36  ;;  %977 = vmatprep.subr.bf16.mxu0 %v1399_v37 }
  0x6e   : > { %1018 = vmatprep.subr.bf16.mxu1 %v1401_v38 }
  0x70   : > { %978 = vmatpush2.bf16.msra.mxu0 %v1403_v39 }
  0x71   : > { %1019 = vmatpush2.bf16.msra.mxu1 %v1404_v40  ;;  %979 = vmatprep.subr.bf16.mxu0 %v1405_v41 }
  0x72   : > { %1020 = vmatprep.subr.bf16.mxu1 %v1407_v42 }
  0x74   : > { %980 = vmatpush2.bf16.msra.mxu0 %v1409_v43 }
  0x75   : > { %1021 = vmatpush2.bf16.msra.mxu1 %v1410_v44  ;;  %981 = vmatprep.subr.bf16.mxu0 %v1411_v45 }
  0x76   : > { %1022 = vmatprep.subr.bf16.mxu1 %v1413_v46 }
  0x78   : > { %982 = vmatpush2.bf16.msra.mxu0 %v1415_v50 }
  0x79   : > { %1023 = vmatpush2.bf16.msra.mxu1 %v1416_v51  ;;  %983 = vmatprep.subr.bf16.mxu0 %v1417_v53 }
  0x7a   : > { %1024 = vmatprep.subr.bf16.mxu1 %v1419_v54 }
  0x7c   : > { %984 = vmatpush2.bf16.msra.mxu0 %v1421_v55 }
  0x7d   : > { %1025 = vmatpush2.bf16.msra.mxu1 %v1422_v56  ;;  %985 = vmatprep.subr.bf16.mxu0 %v1423_v57 }
  0x7e   : > { %1026 = vmatprep.subr.bf16.mxu1 %v1425_v58 }
  0x80   : > { %986 = vmatpush2.bf16.msra.mxu0 %v1427_v59 }
  0x81   : > { %1027 = vmatpush2.bf16.msra.mxu1 %v1428_v60  ;;  %987 = vmatprep.subr.bf16.mxu0 %v1429_v61 }
  0x82   : > { %1028 = vmatprep.subr.bf16.mxu1 %v1431_v62 }
  0x84   : > { %988 = vmatpush2.bf16.msra.mxu0 %v1433_v63 }
  0x85   : > { %1029 = vmatpush2.bf16.msra.mxu1 %v1434_v0  ;;  %989 = vmatprep.subr.bf16.mxu0 %v1435_v1 }
  0x86   : > { %1030 = vmatprep.subr.bf16.mxu1 %v1437_v2 }
  0x88   : > { %990 = vmatpush2.bf16.msra.mxu0 %v1439_v3 }
  0x89   : > { %1031 = vmatpush2.bf16.msra.mxu1 %v1440_v4 }
  0x8b   : > { %992 = vmatmul.mubr.bf16.vlgmr.msra.gmra.mxu0 %v1214_v5 }
  0x8c   : > { %1033 = vmatmul.mubr.bf16.vlgmr.msra.gmra.mxu1 %v1216_v6 }
 0x14b   : > { %v993_v7 = vpop.f32.mrf.mxu0 }
 0x14c   : > { %v1034_v9 = vpop.f32.mrf.mxu1 }
 0x14d   : > { %v1035_v10 = vadd.f32 %v1034_v9, %v993_v7  ;;  %v995_v11 = vpop.f32.mrf.mxu0 }
 0x14e   : > { %v1036_v13 = vpop.f32.mrf.mxu1 }
 0x14f   : > { %v1041_v14 = vadd.f32 %v1035_v10, %v557_v8  ;;  %v1037_v15 = vadd.f32 %v1036_v13, %v995_v11  ;;  %v997_v16 = vpop.f32.mrf.mxu0  ;;  %1048 = sbr.rel (%p1282_p13) target bundleno = 353 (0x161), region = 78 }
 0x150   : > { %v1038_v17 = vpop.f32.mrf.mxu1 }
 0x151   : > { %1043 = vst [vmem:[#allocation2] sm:$0xff] %v1041_v14  ;;  %v1042_v18 = vadd.f32 %v1037_v15, %v558_v12  ;;  %v998_v19 = vpop.f32.mrf.mxu0 }
 0x152   : > { %v1039_v20 = vpop.f32.mrf.mxu1 }
 0x153   : > { %1044 = vst [vmem:[#allocation2 + $0x8] sm:$0xff] %v1042_v18 }
 0x154   : > { %v1053_v21 = vlaneseq  ;;  %v1051_v23 = vld [vmem:[%s539_s12] sm:$0x3] }
 0x156   : > { %v1054_v22 = vshrl.u32 %v1053_v21, 7 }
 0x158   : > { %v1055_v24 = vsub.s32 0, %v1054_v22  ;;  %v1059_v25 = vsub.s32 1, %v1054_v22  ;;  %v1049_v26 = vld [vmem:[#allocation2] sm:$0xff] }
 0x15a   : > { %v1050_v27 = vld [vmem:[#allocation2 + $0x8] sm:$0xff]  ;;  %v1056_v28 = vrot.slane %v1051_v23, %v1055_v24  ;;  %v1060_v29 = vrot.slane %v1051_v23, %v1059_v25 }
 0x15c   : > { %v1063_v30 = vadd.f32 %v1056_v28, %v1049_v26  ;;  %v1064_v31 = vadd.f32 %v1060_v29, %v1050_v27 }
 0x15e   : > { %v1287_v32 = vpack.c.bf16 %v1064_v31, %v1063_v30 }
 0x160   : > { %1073 = vst [vmem:[%s1734_s15] sm:$0xff] %v1287_v32 }
 0x161 PF: > { %s13_s18 = sadd.s32 1, %s1499_s18   ;;  %s1837_s12 = smov %s1479_s13 }
 0x162   : > { %p10_p0 = scmp.ge.s32.totalorder %s13_s18, 10   ;;  %s1838_s13 = smov %s1573_s25 }
 0x163   : > { %s1839_s14 = smov %s1491_s16  ;;  %s1840_s15 = smov %s1495_s17 }
 0x164   : > { %s1841_s16 = smov %s1844_s19  ;;  %s1842_s17 = smov %s1848_s20 }
 0x165   :  { %12 = sbr.rel (!%p10_p0) target bundleno = 4 (0x4), region = 119 }

// kernel: pretrained_encoder_tir_forward.24
= control target key start
LH: loop header
LB: loop body
LE: loop exit
PB: predicated region body
PF: predicated region fallthrough
CT: control target
= control target key end

     0   :  { %s945_s15 = smov 0   ;;  %s947_s16 = smov 0   ;;  %s1028_s0 = inlined_call_operand.vmem [shape: bf16[2,8,256], index: 0, kind: input, shape index: {}]   ;;  %s1029_s1 = inlined_call_operand.vmem [shape: bf16[2,128,256], index: 1, kind: input, shape index: {}]   ;;  %s1030_s2 = inlined_call_operand.vmem [shape: bf16[2,128,256], index: 2, kind: input, shape index: {}]   ;;  %s1031_s3 = inlined_call_operand.vmem [shape: f32[2,8,128], index: 3, kind: output, shape index: {0}]   ;;  %s1032_s4 = inlined_call_operand.vmem [shape: bf16[2,8,256], index: 4, kind: output, shape index: {1}]  }
   0x1   :  { %s949_s17 = smov 0  }
   0x2 LB: > { %s27_s18 = sadd.s32 1, %s913_s16  ;;  %p768_p0 = scmp.ge.s32.totalorder %s917_s17, 1  ;;  %s917_s17 = sphi %s949_s17, %s15_s17   ;;  %s913_s16 = sphi %s947_s16, %s1034_s16   ;;  %s909_s15 = sphi %s945_s15, %s1033_s15  }
   0x3   : > { %p29_p1 = scmp.ge.s32.totalorder %s27_s18, 2  ;;  %p215_p2 = scmp.lt.s32.totalorder %s917_s17, 3 }
   0x5   : > { %s1036_s18 = smov (%p29_p1, %s27_s18), 0  ;;  %p216_p3 = pnand %p768_p0, %p215_p2 }
   0x6   : > { %p268_p4 = scmp.lt.s32.totalorder (!%p216_p3), %s909_s15, 1 }
   0x7   : > { %219 = sbr.rel (%p216_p3) target bundleno = 476 (0x1dc), region = 32 }
   0xc   : > { %s1038_s15 = smov (!%p268_p4, %s909_s15), 1  ;;  %v919_v35 = vmov 0  }
   0xd   : > { %s816_s19 = sshll.u32 %s1038_s15, 7  ;;  %s971_s23 = sshll.u32 %s1038_s15, 3  ;;  %591 = vmatprep.mubr.bf16.mxu1 %v919_v35 }
   0xe   : > { %s966_s22 = scalar_lea.vmem %s1029_s1, %s816_s19  ;;  %s272_s26 = scalar_lea.vmem %s1028_s0, %s971_s23 }
   0xf   : > { %v845_v0 = vld [vmem:[%s966_s22 + $0x74] ss:$8 sps:$4 sm:$0xff]   ;;  %v847_v1 = vld [vmem:[%s966_s22 + $0x70] ss:$8 sps:$4 sm:$0xff]   ;;  %v848_v2 = vld [vmem:[%s966_s22 + $0x64] ss:$8 sps:$4 sm:$0xff]   ;;  %s982_s29 = scalar_lea.vmem %s1030_s2, %s816_s19  ;;  %s301_s6 = scalar_lea.vmem %s1031_s3, %s971_s23 }
  0x10   : > { %434 = vmatprep.subr.bf16.mxu0 %v845_v0  ;;  %v850_v3 = vld [vmem:[%s966_s22 + $0x60] ss:$8 sps:$4 sm:$0xff]   ;;  %v851_v4 = vld [vmem:[%s966_s22 + $0x54] ss:$8 sps:$4 sm:$0xff]   ;;  %v873_v8 = vld [vmem:[%s982_s29 + $0x70] ss:$8 sps:$4 sm:$0xff]   ;;  %s306_s9 = scalar_lea.vmem %s1032_s4, %s971_s23 }
  0x11   : > { %435 = vmatpush1.bf16.xpose.msra.mxu0 %v847_v1  ;;  %v314_v5 = vld [vmem:[%s272_s26] sm:$0xff]  ;;  %v871_v7 = vld [vmem:[%s982_s29 + $0x74] ss:$8 sps:$4 sm:$0xff]   ;;  %v853_v10 = vld [vmem:[%s966_s22 + $0x50] ss:$8 sps:$4 sm:$0xff]  }
  0x12   : > { %436 = vmatprep.subr.bf16.mxu0 %v848_v2  ;;  %v779_v6 = vcombine.high %v314_v5, %v314_v5  ;;  %559 = vmatprep.subr.bf16.mxu1 %v871_v7  ;;  %v874_v9 = vld [vmem:[%s982_s29 + $0x64] ss:$8 sps:$4 sm:$0xff]   ;;  %v876_v11 = vld [vmem:[%s982_s29 + $0x60] ss:$8 sps:$4 sm:$0xff]   ;;  %v877_v12 = vld [vmem:[%s982_s29 + $0x54] ss:$8 sps:$4 sm:$0xff]   ;;  %v778_v32 = vcombine.low %v314_v5, %v314_v5 }
  0x13   : > { %560 = vmatpush1.bf16.msra.mxu1 %v873_v8  ;;  %v854_v13 = vld [vmem:[%s966_s22 + $0x44] ss:$8 sps:$4 sm:$0xff]   ;;  %v879_v14 = vld [vmem:[%s982_s29 + $0x50] ss:$8 sps:$4 sm:$0xff]   ;;  %v882_v16 = vld [vmem:[%s982_s29 + $0x40] ss:$8 sps:$4 sm:$0xff]  }
  0x14   : > { %466 = vmatprep.mubr.bf16.mxu0 %v779_v6  ;;  %561 = vmatprep.subr.bf16.mxu1 %v874_v9  ;;  %v880_v15 = vld [vmem:[%s982_s29 + $0x44] ss:$8 sps:$4 sm:$0xff]   ;;  %v856_v17 = vld [vmem:[%s966_s22 + $0x40] ss:$8 sps:$4 sm:$0xff]   ;;  %v883_v18 = vld [vmem:[%s982_s29 + $0x34] ss:$8 sps:$4 sm:$0xff]  }
  0x15   : > { %v857_v19 = vld [vmem:[%s966_s22 + $0x34] ss:$8 sps:$4 sm:$0xff]   ;;  %v885_v20 = vld [vmem:[%s982_s29 + $0x30] ss:$8 sps:$4 sm:$0xff]   ;;  %v886_v21 = vld [vmem:[%s982_s29 + $0x24] ss:$8 sps:$4 sm:$0xff]  }
  0x16   : > { %v888_v22 = vld [vmem:[%s982_s29 + $0x20] ss:$8 sps:$4 sm:$0xff]   ;;  %v859_v23 = vld [vmem:[%s966_s22 + $0x30] ss:$8 sps:$4 sm:$0xff]   ;;  %v889_v24 = vld [vmem:[%s982_s29 + $0x14] ss:$8 sps:$4 sm:$0xff]  }
  0x17   : > { %562 = vmatpush1.bf16.msra.mxu1 %v876_v11  ;;  %v860_v25 = vld [vmem:[%s966_s22 + $0x24] ss:$8 sps:$4 sm:$0xff]   ;;  %v891_v26 = vld [vmem:[%s982_s29 + $0x10] ss:$8 sps:$4 sm:$0xff]   ;;  %v862_v27 = vld [vmem:[%s966_s22 + $0x20] ss:$8 sps:$4 sm:$0xff]  }
  0x18   : > { %563 = vmatprep.subr.bf16.mxu1 %v877_v12  ;;  %v863_v28 = vld [vmem:[%s966_s22 + $0x14] ss:$8 sps:$4 sm:$0xff]   ;;  %v865_v29 = vld [vmem:[%s966_s22 + $0x10] ss:$8 sps:$4 sm:$0xff]   ;;  %v866_v30 = vld [vmem:[%s966_s22 + $0x4] ss:$8 sps:$4 sm:$0xff]  }
  0x19   : > { %437 = vmatpush1.bf16.xpose.msra.mxu0 %v850_v3  ;;  %v868_v31 = vld [vmem:[%s966_s22] ss:$8 sps:$4 sm:$0xff]   ;;  %v892_v33 = vld [vmem:[%s982_s29 + $0x4] ss:$8 sps:$4 sm:$0xff]  }
  0x1a   : > { %438 = vmatprep.subr.bf16.mxu0 %v851_v4  ;;  %v894_v34 = vld [vmem:[%s982_s29] ss:$8 sps:$4 sm:$0xff]  }
  0x1b   : > { %564 = vmatpush1.bf16.msra.mxu1 %v879_v14 }
  0x1c   : > { %565 = vmatprep.subr.bf16.mxu1 %v880_v15 }
  0x1f   : > { %566 = vmatpush1.bf16.msra.mxu1 %v882_v16 }
  0x20   : > { %567 = vmatprep.subr.bf16.mxu1 %v883_v18 }
  0x21   : > { %439 = vmatpush1.bf16.xpose.msra.mxu0 %v853_v10 }
  0x22   : > { %440 = vmatprep.subr.bf16.mxu0 %v854_v13 }
  0x23   : > { %568 = vmatpush1.bf16.msra.mxu1 %v885_v20 }
  0x24   : > { %569 = vmatprep.subr.bf16.mxu1 %v886_v21 }
  0x27   : > { %570 = vmatpush1.bf16.msra.mxu1 %v888_v22 }
  0x28   : > { %571 = vmatprep.subr.bf16.mxu1 %v889_v24 }
  0x29   : > { %441 = vmatpush1.bf16.xpose.msra.mxu0 %v856_v17 }
  0x2a   : > { %442 = vmatprep.subr.bf16.mxu0 %v857_v19 }
  0x2b   : > { %572 = vmatpush1.bf16.msra.mxu1 %v891_v26 }
  0x2c   : > { %573 = vmatprep.subr.bf16.mxu1 %v892_v33 }
  0x2f   : > { %574 = vmatpush1.bf16.msra.mxu1 %v894_v34 }
  0x31   : > { %443 = vmatpush1.bf16.xpose.msra.mxu0 %v859_v23 }
  0x32   : > { %444 = vmatprep.subr.bf16.mxu0 %v860_v25 }
  0x39   : > { %445 = vmatpush1.bf16.xpose.msra.mxu0 %v862_v27 }
  0x3a   : > { %446 = vmatprep.subr.bf16.mxu0 %v863_v28 }
  0x41   : > { %447 = vmatpush1.bf16.xpose.msra.mxu0 %v865_v29 }
  0x42   : > { %448 = vmatprep.subr.bf16.mxu0 %v866_v30 }
  0x49   : > { %449 = vmatpush1.bf16.xpose.msra.mxu0 %v868_v31 }
  0x50   : > { %467 = vmatmul.mubr.bf16.vlgmr.msra.gmra.mxu0 %v778_v32 }
 0x110   : > { %v468_v36 = vpop.f32.mrf.mxu0 }
 0x111   : > { %v474_v37 = vmul.f32 0.07071068, %v468_v36 }
 0x112   : > { %v470_v38 = vpop.f32.mrf.mxu0 }
 0x113   : > { %475 = vst [vmem:[%s301_s6] sm:$0xff] %v474_v37  ;;  %v478_v39 = vpack.c.bf16 %v474_v37, %v474_v37 }
 0x114   : > { %v471_v40 = vpop.f32.mrf.mxu0 }
 0x115   : > { %592 = vmatmul.mubr.bf16.vlgmr.msra.gmra.mxu1 %v478_v39 }
 0x116   : > { %v472_v41 = vpop.f32.mrf.mxu0 }
 0x1d5   : > { %v593_v42 = vpop.f32.mrf.mxu1 }
 0x1d7   : > { %v595_v43 = vpop.f32.mrf.mxu1 }
 0x1d8   : > { %v819_v44 = vpack.c.bf16 %v595_v43, %v593_v42 }
 0x1d9   : > { %v597_v45 = vpop.f32.mrf.mxu1 }
 0x1da   : > { %617 = vst [vmem:[%s306_s9] sm:$0xff] %v819_v44 }
 0x1db   : > { %v598_v46 = vpop.f32.mrf.mxu1 }
 0x1dc PF: > { %s15_s17 = sadd.s32 1, %s917_s17   ;;  %s1033_s15 = smov %s913_s16 }
 0x1dd   : > { %p12_p5 = scmp.ge.s32.totalorder %s15_s17, 4   ;;  %s1034_s16 = smov %s1036_s18 }
 0x1df   :  { %14 = sbr.rel (!%p12_p5) target bundleno = 2 (0x2), region = 88 }

// kernel: pretrained_encoder_tir_forward.25
= control target key start
LH: loop header
LB: loop body
LE: loop exit
PB: predicated region body
PF: predicated region fallthrough
CT: control target
= control target key end

     0   :  { %s371_s1 = inlined_call_operand.vmem [shape: bf16[256,128], index: 1, kind: input, shape index: {}]   ;;  %s372_s0 = inlined_call_operand.vmem [shape: bf16[16,256], index: 0, kind: input, shape index: {}]   ;;  %s373_s2 = inlined_call_operand.vmem [shape: f32[1,128], index: 2, kind: input, shape index: {}]   ;;  %s374_s3 = inlined_call_operand.vmem [shape: f32[16,128], index: 3, kind: output, shape index: {}]  }
   0x1   :  { %v269_v0 = vld [vmem:[%s371_s1 + $0x78] sm:$0xff]   ;;  %v271_v2 = vld [vmem:[%s371_s1 + $0x70] sm:$0xff]   ;;  %v273_v4 = vld [vmem:[%s371_s1 + $0x68] sm:$0xff]  }
   0x2   :  { %v270_v1 = vld [vmem:[%s371_s1 + $0x38] sm:$0xff]   ;;  %247 = vmatprep.subr.bf16.mxu0 %v269_v0  ;;  %v272_v3 = vld [vmem:[%s371_s1 + $0x30] sm:$0xff]   ;;  %v274_v5 = vld [vmem:[%s371_s1 + $0x28] sm:$0xff]  }
   0x3   :  { %248 = vmatpush3.bf16.msra.mxu0 %v270_v1  ;;  %v275_v6 = vld [vmem:[%s371_s1 + $0x60] sm:$0xff]   ;;  %v277_v8 = vld [vmem:[%s371_s1 + $0x58] sm:$0xff]   ;;  %v279_v10 = vld [vmem:[%s371_s1 + $0x50] sm:$0xff]  }
   0x4   :  { %249 = vmatprep.subr.bf16.mxu0 %v271_v2  ;;  %v276_v7 = vld [vmem:[%s371_s1 + $0x20] sm:$0xff]   ;;  %v278_v9 = vld [vmem:[%s371_s1 + $0x18] sm:$0xff]   ;;  %v280_v12 = vld [vmem:[%s371_s1 + $0x10] sm:$0xff]  }
   0x5   :  { %v287_v11 = vld [vmem:[%s372_s0 + $0x4] ss:$8 sps:$4 sm:$0xff]   ;;  %v285_v17 = vld [vmem:[%s372_s0] ss:$8 sps:$4 sm:$0xff]  }
   0x6   :  { %195 = vmatprep.mubr.bf16.mxu0 %v287_v11  ;;  %v281_v13 = vld [vmem:[%s371_s1 + $0x48] sm:$0xff]   ;;  %v283_v15 = vld [vmem:[%s371_s1 + $0x40] sm:$0xff]  }
   0x7   :  { %250 = vmatpush3.bf16.msra.mxu0 %v272_v3  ;;  %v282_v14 = vld [vmem:[%s371_s1 + $0x8] sm:$0xff]   ;;  %v284_v16 = vld [vmem:[%s371_s1] sm:$0xff]  }
   0x8   :  { %251 = vmatprep.subr.bf16.mxu0 %v273_v4  ;;  %v246_v20 = vld [vmem:[%s373_s2] ss:$0 sm:$0xff] }
   0xb   :  { %252 = vmatpush3.bf16.msra.mxu0 %v274_v5 }
   0xc   :  { %253 = vmatprep.subr.bf16.mxu0 %v275_v6 }
   0xf   :  { %254 = vmatpush3.bf16.msra.mxu0 %v276_v7 }
  0x10   :  { %255 = vmatprep.subr.bf16.mxu0 %v277_v8 }
  0x13   :  { %256 = vmatpush3.bf16.msra.mxu0 %v278_v9 }
  0x14   :  { %257 = vmatprep.subr.bf16.mxu0 %v279_v10 }
  0x17   :  { %258 = vmatpush3.bf16.msra.mxu0 %v280_v12 }
  0x18   :  { %259 = vmatprep.subr.bf16.mxu0 %v281_v13 }
  0x1b   :  { %260 = vmatpush3.bf16.msra.mxu0 %v282_v14 }
  0x1c   :  { %261 = vmatprep.subr.bf16.mxu0 %v283_v15 }
  0x1f   :  { %262 = vmatpush3.bf16.msra.mxu0 %v284_v16 }
  0x22   :  { %196 = vmatmul.mubr.bf16.vlgmr.msra.gmra.mxu0 %v285_v17 }
  0xe2   :  { %v263_v18 = vpop.f32.mrf.mxu0 }
  0xe4   :  { %v264_v19 = vpop.f32.mrf.mxu0 }
  0xe5   :  { %v265_v21 = vadd.f32 %v264_v19, %v263_v18 }
  0xe6   :  { %v266_v22 = vpop.f32.mrf.mxu0 }
  0xe7   :  { %v220_v23 = vadd.f32 %v265_v21, %v246_v20 }
  0xe8   :  { %v267_v24 = vpop.f32.mrf.mxu0 }
  0xe9   :  { %222 = vst [vmem:[%s374_s3] sm:$0xff] %v220_v23  ;;  %v268_v25 = vadd.f32 %v267_v24, %v266_v22 }
  0xeb   :  { %v221_v26 = vadd.f32 %v268_v25, %v246_v20 }
  0xed   :  { %223 = vst [vmem:[%s374_s3 + $0x8] sm:$0xff] %v221_v26 }

// kernel: pretrained_encoder_tir_forward.26
= control target key start
LH: loop header
LB: loop body
LE: loop exit
PB: predicated region body
PF: predicated region fallthrough
CT: control target
= control target key end

     0   :  { %v227_v0 = vmov 0.0   ;;  %vm228_vm0 = vmmov 0   ;;  %s282_s1 = inlined_call_operand.vmem [shape: bf16[128,128], index: 1, kind: input, shape index: {}]   ;;  %s283_s0 = inlined_call_operand.vmem [shape: bf16[16,128], index: 0, kind: input, shape index: {}]   ;;  %s284_s2 = inlined_call_operand.vmem [shape: f32[1,128], index: 2, kind: input, shape index: {}]   ;;  %s285_s3 = inlined_call_operand.vmem [shape: bf16[16,128], index: 3, kind: output, shape index: {}]  }
   0x1   :  { %196 = vmatprep.subr.bf16.mxu0 %v227_v0  ;;  %v218_v1 = vld [vmem:[%s282_s1 + $0x38] sm:$0xff]   ;;  %212 = vmatprep.mubr.msk.bf16.mxu0 %vm228_vm0, %v227_v0  ;;  %v219_v2 = vld [vmem:[%s282_s1 + $0x30] sm:$0xff]   ;;  %v220_v3 = vld [vmem:[%s282_s1 + $0x28] sm:$0xff]  }
   0x2   :  { %197 = vmatpush3.bf16.msra.mxu0 %v218_v1  ;;  %v221_v4 = vld [vmem:[%s282_s1 + $0x20] sm:$0xff]   ;;  %v222_v5 = vld [vmem:[%s282_s1 + $0x18] sm:$0xff]   ;;  %v223_v6 = vld [vmem:[%s282_s1 + $0x10] sm:$0xff]  }
   0x3   :  { %198 = vmatprep.subr.bf16.mxu0 %v227_v0  ;;  %v224_v7 = vld [vmem:[%s282_s1 + $0x8] sm:$0xff]   ;;  %v225_v8 = vld [vmem:[%s282_s1] sm:$0xff]  }
   0x4   :  { %v226_v9 = vld [vmem:[%s283_s0] sm:$0xff]  }
   0x5   :  { %v177_v11 = vld [vmem:[%s284_s2] ss:$0 sm:$0xff] }
   0x6   :  { %199 = vmatpush3.bf16.msra.mxu0 %v219_v2 }
   0x7   :  { %200 = vmatprep.subr.bf16.mxu0 %v227_v0 }
   0xa   :  { %201 = vmatpush3.bf16.msra.mxu0 %v220_v3 }
   0xb   :  { %202 = vmatprep.subr.bf16.mxu0 %v227_v0 }
   0xe   :  { %203 = vmatpush3.bf16.msra.mxu0 %v221_v4 }
   0xf   :  { %204 = vmatprep.subr.bf16.mxu0 %v227_v0 }
  0x12   :  { %205 = vmatpush3.bf16.msra.mxu0 %v222_v5 }
  0x13   :  { %206 = vmatprep.subr.bf16.mxu0 %v227_v0 }
  0x16   :  { %207 = vmatpush3.bf16.msra.mxu0 %v223_v6 }
  0x17   :  { %208 = vmatprep.subr.bf16.mxu0 %v227_v0 }
  0x1a   :  { %209 = vmatpush3.bf16.msra.mxu0 %v224_v7 }
  0x1b   :  { %210 = vmatprep.subr.bf16.mxu0 %v227_v0 }
  0x1e   :  { %211 = vmatpush3.bf16.msra.mxu0 %v225_v8 }
  0x21   :  { %213 = vmatmul.mubr.bf16.vlgmr.msra.gmra.mxu0 %v226_v9 }
  0xe1   :  { %v129_v10 = vpop.f32.mrf.mxu0 }
  0xe2   :  { %v152_v14 = vadd.f32 %v177_v11, %v129_v10 }
  0xe3   :  { %v214_v12 = vpop.f32.mrf.mxu0 }
  0xe5   :  { %v132_v13 = vpop.f32.mrf.mxu0 }
  0xe6   :  { %v153_v15 = vadd.f32 %v177_v11, %v132_v13 }
  0xe7   :  { %v215_v16 = vpop.f32.mrf.mxu0 }
  0xe8   :  { %v185_v17 = vpack.c.bf16 %v153_v15, %v152_v14 }
  0xea   :  { %186 = vst [vmem:[%s285_s3] sm:$0xff] %v185_v17  }

// kernel: pretrained_encoder_tir_forward.27
= control target key start
LH: loop header
LB: loop body
LE: loop exit
PB: predicated region body
PF: predicated region fallthrough
CT: control target
= control target key end

     0   :  { %s705_s15 = smov 0   ;;  %s707_s16 = smov 0   ;;  %s776_s0 = inlined_call_operand.vmem [shape: bf16[2,4,8,8], index: 0, kind: input, shape index: {}]   ;;  %s777_s1 = inlined_call_operand.vmem [shape: bf16[2,4,8,8], index: 1, kind: input, shape index: {}]   ;;  %s778_s2 = inlined_call_operand.vmem [shape: bf16[2,4,8,8], index: 2, kind: input, shape index: {}]   ;;  %s779_s3 = inlined_call_operand.vmem [shape: f32[2,1,8], index: 3, kind: input, shape index: {}]   ;;  %s780_s4 = inlined_call_operand.vmem [shape: bf16[2,4,8,8], index: 4, kind: output, shape index: {}]  }
   0x1   :  { %s709_s17 = smov 0   ;;  %s711_s18 = smov 0  }
   0x2   :  { %s713_s19 = smov 0  }
   0x3 LB: > { %s23_s20 = sadd.s32 1, %s668_s17  ;;  %s26_s21 = sadd.s32 1, %s672_s18  ;;  %s676_s19 = sphi %s713_s19, %s14_s19   ;;  %s672_s18 = sphi %s711_s18, %s784_s18   ;;  %s668_s17 = sphi %s709_s17, %s783_s17   ;;  %s664_s16 = sphi %s707_s16, %s782_s16   ;;  %s660_s15 = sphi %s705_s15, %s781_s15  }
   0x4   : > { %p24_p0 = scmp.ge.s32.totalorder %s23_s20, 4  ;;  %p562_p1 = scmp.ge.s32.totalorder %s676_s19, 1 }
   0x5   : > { %p219_p2 = scmp.lt.s32.totalorder %s676_s19, 9 }
   0x6   : > { %s786_s20 = smov (%p24_p0, %s23_s20), 0  ;;  %s788_s21 = smov (!%p24_p0, %s26_s21), %s672_s18 }
   0x7   : > { %p220_p3 = pnand %p562_p1, %p219_p2  ;;  %p28_p4 = scmp.ge.s32.totalorder %s788_s21, 2 }
   0x8   : > { %p270_p5 = scmp.lt.s32.totalorder (!%p220_p3), %s664_s16, 1  ;;  %p272_p6 = scmp.lt.s32.totalorder (!%p220_p3), %s660_s15, 3 }
   0x9   : > { %s790_s21 = smov (%p28_p4, %s788_s21), 0  ;;  %223 = sbr.rel (%p220_p3) target bundleno = 738 (0x2e2), region = 36 }
   0xe   : > { %v678_v0 = vmov 0.0   ;;  %vm679_vm0 = vmmov 0   ;;  %s792_s16 = smov (!%p270_p5, %s664_s16), 1  ;;  %s794_s15 = smov (!%p272_p6, %s660_s15), 3  ;;  %vm310_vm1 = vcmask 64512   ;;  %vm380_vm2 = vcmask 1043456  }
   0xf   : > { %580 = vmatprep.subr.bf16.mxu0 %v678_v0  ;;  %582 = vmatprep.mubr.msk.bf16.mxu0 %vm679_vm0, %v678_v0  ;;  %s563_s22 = sshll.u32 %s792_s16, 2  ;;  %s296_s7 = scalar_lea.vmem %s779_s3, %s792_s16  ;;  %vm425_vm3 = vcmask 60416  }
  0x10   : > { %586 = vmatprep.subr.bf16.mxu1 %v678_v0  ;;  %588 = vmatprep.mubr.msk.bf16.mxu1 %vm679_vm0, %v678_v0  ;;  %s275_s23 = sadd.s32 %s563_s22, %s794_s15  ;;  %v572_v5 = vld [vmem:[%s296_s7] ss:$0 sm:$0xff] }
  0x11   : > { %s735_s24 = sshll.u32 %s275_s23, 2 }
  0x12   : > { %s285_s27 = scalar_lea.vmem %s777_s1, %s735_s24  ;;  %s277_s30 = scalar_lea.vmem %s776_s0, %s735_s24 }
  0x13   : > { %v307_v1 = vld [vmem:[%s285_s27] sm:$0xf]  ;;  %s293_s10 = scalar_lea.vmem %s778_s2, %s735_s24  ;;  %s304_s13 = scalar_lea.vmem %s780_s4, %s735_s24 }
  0x14   : > { %v315_v2 = vsel %vm310_vm1, %v307_v1, 0  ;;  %v306_v3 = vld [vmem:[%s277_s30] sm:$0xf] }
  0x15   : > { %581 = vmatpush3.bf16.xpose.msra.mxu0 %v315_v2  ;;  %v308_v17 = vld [vmem:[%s293_s10] sm:$0xf] }
  0x16   : > { %v382_v18 = vsel %vm380_vm2, %v308_v17, 0 }
  0x17   : > { %587 = vmatpush3.bf16.msra.mxu1 %v382_v18 }
  0x1c   : > { %583 = vmatmul.mubr.msk.bf16.vlgmr.msra.gmra.mxu0 %vm310_vm1, %v306_v3 }
  0xdc   : > { %v351_v4 = vpop.f32.mrf.mxu0 }
  0xdd   : > { %v357_v6 = vmul.f32 0.35355338, %v351_v4 }
  0xde   : > { %v584_v7 = vpop.f32.mrf.mxu0 }
  0xdf   : > { %v364_v8 = vadd.f32 %v572_v5, %v357_v6 }
  0xe0   : > { %v354_v9 = vpop.f32.mrf.mxu0 }
  0xe1   : > { %v365_v10 = vsel %vm310_vm1, %v364_v8, -inf }
  0xe2   : > { %366 = vmax.xlane.f32.xlu0 %v365_v10  ;;  %v585_v11 = vpop.f32.mrf.mxu0 }
 0x16b   : > { %v367_v12 = vpop.xlane.xlu0 %366 }
 0x16c   : > { %v368_v13 = vsub.f32 %v364_v8, %v367_v12 }
 0x16e   : > { %v369_v14 = vmul.f32 1.442695, %v368_v13 }
 0x170   : > { %634 = vpow2.f32 %v369_v14 }
 0x17d   : > { %v635_v15 = vpop.eup %634 }
 0x17e   : > { %v371_v16 = vsel %vm310_vm1, %v635_v15, 0.0 }
 0x17f   : > { %372 = vadd.xlane.f32.xlu0 %v371_v16 }
 0x208   : > { %v373_v19 = vpop.xlane.xlu0 %372 }
 0x209   : > { %636 = vrcp.f32 %v373_v19 }
 0x216   : > { %v637_v20 = vpop.eup %636 }
 0x217   : > { %v375_v21 = vmul.f32 %v637_v20, %v635_v15 }
 0x219   : > { %v376_v22 = vpack.c.bf16 %v375_v21, %v375_v21 }
 0x21b   : > { %589 = vmatmul.mubr.msk.bf16.vlgmr.msra.gmra.mxu1 %vm310_vm1, %v376_v22 }
 0x2db   : > { %v418_v23 = vpop.f32.mrf.mxu1 }
 0x2dc   : > { %v424_v24 = vpack.c.bf16 %v418_v23, %v418_v23 }
 0x2dd   : > { %v590_v25 = vpop.f32.mrf.mxu1 }
 0x2de   : > { %426 = vst.msk [vmem:[%s304_s13] sm:$0xf] %vm425_vm3, %v424_v24 }
 0x2df   : > { %v421_v26 = vpop.f32.mrf.mxu1 }
 0x2e1   : > { %v591_v27 = vpop.f32.mrf.mxu1 }
 0x2e2 PF: > { %s14_s19 = sadd.s32 1, %s676_s19   ;;  %s781_s15 = smov %s668_s17 }
 0x2e3   : > { %p11_p7 = scmp.ge.s32.totalorder %s14_s19, 10   ;;  %s782_s16 = smov %s672_s18 }
 0x2e4   : > { %s783_s17 = smov %s786_s20  ;;  %s784_s18 = smov %s790_s21 }
 0x2e5   :  { %13 = sbr.rel (!%p11_p7) target bundleno = 3 (0x3), region = 75 }

// kernel: pretrained_encoder_tir_forward.28
= control target key start
LH: loop header
LB: loop body
LE: loop exit
PB: predicated region body
PF: predicated region fallthrough
CT: control target
= control target key end

     0   :  { %v302_v0 = vmov 0.0   ;;  %vm303_vm0 = vmmov 0   ;;  %v169_v10 = vlaneseq  ;;  %s381_s1 = inlined_call_operand.vmem [shape: bf16[128,128], index: 1, kind: input, shape index: {}]   ;;  %s382_s0 = inlined_call_operand.vmem [shape: bf16[16,128], index: 0, kind: input, shape index: {}]   ;;  %s383_s3 = inlined_call_operand.vmem [shape: bf16[16,128], index: 3, kind: input, shape index: {}]   ;;  %s384_s2 = inlined_call_operand.vmem [shape: f32[1,128], index: 2, kind: input, shape index: {}]   ;;  %s385_s4 = inlined_call_operand.vmem [shape: f32[1,128], index: 4, kind: input, shape index: {}]   ;;  %s386_s5 = inlined_call_operand.vmem [shape: f32[1,128], index: 5, kind: input, shape index: {}]   ;;  %s387_s6 = inlined_call_operand.vmem [shape: bf16[16,128], index: 6, kind: output, shape index: {}]  }
   0x1   :  { %267 = vmatprep.subr.bf16.mxu0 %v302_v0  ;;  %v289_v1 = vld [vmem:[%s381_s1 + $0x38] sm:$0xff]   ;;  %283 = vmatprep.mubr.msk.bf16.mxu0 %vm303_vm0, %v302_v0  ;;  %v290_v2 = vld [vmem:[%s381_s1 + $0x30] sm:$0xff]   ;;  %v291_v3 = vld [vmem:[%s381_s1 + $0x28] sm:$0xff]  }
   0x2   :  { %268 = vmatpush3.bf16.msra.mxu0 %v289_v1  ;;  %v292_v4 = vld [vmem:[%s381_s1 + $0x20] sm:$0xff]   ;;  %v293_v5 = vld [vmem:[%s381_s1 + $0x18] sm:$0xff]   ;;  %v294_v6 = vld [vmem:[%s381_s1 + $0x10] sm:$0xff]   ;;  %v170_v11 = vand.u32 127, %v169_v10 }
   0x3   :  { %269 = vmatprep.subr.bf16.mxu0 %v302_v0  ;;  %v295_v7 = vld [vmem:[%s381_s1 + $0x8] sm:$0xff]   ;;  %v296_v8 = vld [vmem:[%s381_s1] sm:$0xff]  }
   0x4   :  { %v297_v9 = vld [vmem:[%s382_s0] sm:$0xff]   ;;  %vm171_vm1 = vcmp.lt.s32.totalorder %v170_v11, 32 }
   0x5   :  { %v250_v12 = vld [vmem:[%s383_s3] sm:$0xff]   ;;  %v242_v18 = vsel %vm171_vm1, 1.0, %v302_v0 }
   0x6   :  { %270 = vmatpush3.bf16.msra.mxu0 %v290_v2  ;;  %v241_v13 = vld [vmem:[%s384_s2] ss:$0 sm:$0xff]  ;;  %v251_v14 = vunpack.c.l.bf16 %v250_v12  ;;  %v252_v19 = vunpack.c.h.bf16 %v250_v12 }
   0x7   :  { %271 = vmatprep.subr.bf16.mxu0 %v302_v0  ;;  %v243_v45 = vld [vmem:[%s385_s4] ss:$0 sm:$0xff] }
   0x8   :  { %v244_v49 = vld [vmem:[%s386_s5] ss:$0 sm:$0xff] }
   0xa   :  { %272 = vmatpush3.bf16.msra.mxu0 %v291_v3 }
   0xb   :  { %273 = vmatprep.subr.bf16.mxu0 %v302_v0 }
   0xe   :  { %274 = vmatpush3.bf16.msra.mxu0 %v292_v4 }
   0xf   :  { %275 = vmatprep.subr.bf16.mxu0 %v302_v0 }
  0x12   :  { %276 = vmatpush3.bf16.msra.mxu0 %v293_v5 }
  0x13   :  { %277 = vmatprep.subr.bf16.mxu0 %v302_v0 }
  0x16   :  { %278 = vmatpush3.bf16.msra.mxu0 %v294_v6 }
  0x17   :  { %279 = vmatprep.subr.bf16.mxu0 %v302_v0 }
  0x1a   :  { %280 = vmatpush3.bf16.msra.mxu0 %v295_v7 }
  0x1b   :  { %281 = vmatprep.subr.bf16.mxu0 %v302_v0 }
  0x1e   :  { %282 = vmatpush3.bf16.msra.mxu0 %v296_v8 }
  0x21   :  { %284 = vmatmul.mubr.bf16.vlgmr.msra.gmra.mxu0 %v297_v9 }
  0xe1   :  { %v138_v15 = vpop.f32.mrf.mxu0 }
  0xe2   :  { %v161_v16 = vadd.f32 %v241_v13, %v138_v15 }
  0xe3   :  { %v285_v17 = vpop.f32.mrf.mxu0 }
  0xe4   :  { %v167_v20 = vadd.f32 %v251_v14, %v161_v16 }
  0xe5   :  { %v141_v21 = vpop.f32.mrf.mxu0 }
  0xe6   :  { %v162_v22 = vadd.f32 %v241_v13, %v141_v21  ;;  %v174_v23 = vmul.f32 %v242_v18, %v167_v20 }
  0xe7   :  { %v286_v24 = vpop.f32.mrf.mxu0 }
  0xe8   :  { %v168_v25 = vadd.f32 %v252_v19, %v162_v22  ;;  %176 = vadd.xlane.f32.xlu0 %v174_v23 }
  0xea   :  { %v175_v26 = vmul.f32 %v242_v18, %v168_v25 }
  0xec   :  { %178 = vadd.xlane.f32.xlu0 %v175_v26 }
 0x171   :  { %v177_v27 = vpop.xlane.xlu0 %176 }
 0x172   :  { %v180_v28 = vmul.f32 0.03125, %v177_v27 }
 0x174   :  { %v182_v29 = vsub.f32 %v167_v20, %v180_v28 }
 0x175   :  { %v179_v30 = vpop.xlane.xlu0 %178 }
 0x176   :  { %v181_v31 = vmul.f32 0.03125, %v179_v30  ;;  %v184_v32 = vmul.f32 %v242_v18, %v182_v29 }
 0x178   :  { %v183_v33 = vsub.f32 %v168_v25, %v181_v31  ;;  %v186_v34 = vmul.f32 %v184_v32, %v184_v32 }
 0x17a   :  { %188 = vadd.xlane.f32.xlu1 %v186_v34  ;;  %v185_v35 = vmul.f32 %v242_v18, %v183_v33 }
 0x17c   :  { %v187_v36 = vmul.f32 %v185_v35, %v185_v35 }
 0x17e   :  { %190 = vadd.xlane.f32.xlu1 %v187_v36 }
 0x203   :  { %v189_v37 = vpop.xlane.xlu1 %188 }
 0x204   :  { %v192_v38 = vmul.f32 0.03125, %v189_v37 }
 0x206   :  { %v194_v39 = vadd.f32 1e-12, %v192_v38 }
 0x207   :  { %v191_v40 = vpop.xlane.xlu1 %190 }
 0x208   :  { %298 = vrsqrt.f32 %v194_v39  ;;  %v193_v41 = vmul.f32 0.03125, %v191_v40 }
 0x20a   :  { %v195_v42 = vadd.f32 1e-12, %v193_v41 }
 0x20c   :  { %300 = vrsqrt.f32 %v195_v42 }
 0x215   :  { %v299_v43 = vpop.eup %298 }
 0x216   :  { %v198_v44 = vmul.f32 %v299_v43, %v182_v29 }
 0x218   :  { %v207_v47 = vmul.f32 %v243_v45, %v198_v44 }
 0x219   :  { %v301_v46 = vpop.eup %300 }
 0x21a   :  { %v199_v48 = vmul.f32 %v301_v46, %v183_v33  ;;  %v216_v51 = vadd.f32 %v244_v49, %v207_v47 }
 0x21c   :  { %v208_v50 = vmul.f32 %v243_v45, %v199_v48 }
 0x21e   :  { %v217_v52 = vadd.f32 %v244_v49, %v208_v50 }
 0x220   :  { %v256_v53 = vpack.c.bf16 %v217_v52, %v216_v51 }
 0x222   :  { %257 = vst [vmem:[%s387_s6] sm:$0xff] %v256_v53  }

// kernel: pretrained_encoder_tir_forward.29
= control target key start
LH: loop header
LB: loop body
LE: loop exit
PB: predicated region body
PF: predicated region fallthrough
CT: control target
= control target key end

     0   :  { %v289_v0 = vmov 0.0   ;;  %vm290_vm0 = vmmov 0   ;;  %s344_s1 = inlined_call_operand.vmem [shape: bf16[128,128], index: 1, kind: input, shape index: {}]   ;;  %s345_s0 = inlined_call_operand.vmem [shape: bf16[16,128], index: 0, kind: input, shape index: {}]   ;;  %s346_s2 = inlined_call_operand.vmem [shape: f32[1,128], index: 2, kind: input, shape index: {}]   ;;  %s347_s3 = inlined_call_operand.vmem [shape: bf16[16,128], index: 3, kind: output, shape index: {}]  }
   0x1   :  { %250 = vmatprep.subr.bf16.mxu0 %v289_v0  ;;  %v272_v1 = vld [vmem:[%s344_s1 + $0x38] sm:$0xff]   ;;  %266 = vmatprep.mubr.msk.bf16.mxu0 %vm290_vm0, %v289_v0  ;;  %v273_v2 = vld [vmem:[%s344_s1 + $0x30] sm:$0xff]   ;;  %v274_v3 = vld [vmem:[%s344_s1 + $0x28] sm:$0xff]  }
   0x2   :  { %251 = vmatpush3.bf16.msra.mxu0 %v272_v1  ;;  %v275_v4 = vld [vmem:[%s344_s1 + $0x20] sm:$0xff]   ;;  %v276_v5 = vld [vmem:[%s344_s1 + $0x18] sm:$0xff]   ;;  %v277_v6 = vld [vmem:[%s344_s1 + $0x10] sm:$0xff]  }
   0x3   :  { %252 = vmatprep.subr.bf16.mxu0 %v289_v0  ;;  %v278_v7 = vld [vmem:[%s344_s1 + $0x8] sm:$0xff]   ;;  %v279_v8 = vld [vmem:[%s344_s1] sm:$0xff]  }
   0x4   :  { %v280_v9 = vld [vmem:[%s345_s0] sm:$0xff]  }
   0x5   :  { %v231_v10 = vld [vmem:[%s346_s2] ss:$0 sm:$0xff] }
   0x6   :  { %253 = vmatpush3.bf16.msra.mxu0 %v273_v2 }
   0x7   :  { %254 = vmatprep.subr.bf16.mxu0 %v289_v0 }
   0xa   :  { %255 = vmatpush3.bf16.msra.mxu0 %v274_v3 }
   0xb   :  { %256 = vmatprep.subr.bf16.mxu0 %v289_v0 }
   0xe   :  { %257 = vmatpush3.bf16.msra.mxu0 %v275_v4 }
   0xf   :  { %258 = vmatprep.subr.bf16.mxu0 %v289_v0 }
  0x12   :  { %259 = vmatpush3.bf16.msra.mxu0 %v276_v5 }
  0x13   :  { %260 = vmatprep.subr.bf16.mxu0 %v289_v0 }
  0x16   :  { %261 = vmatpush3.bf16.msra.mxu0 %v277_v6 }
  0x17   :  { %262 = vmatprep.subr.bf16.mxu0 %v289_v0 }
  0x1a   :  { %263 = vmatpush3.bf16.msra.mxu0 %v278_v7 }
  0x1b   :  { %264 = vmatprep.subr.bf16.mxu0 %v289_v0 }
  0x1e   :  { %265 = vmatpush3.bf16.msra.mxu0 %v279_v8 }
  0x21   :  { %267 = vmatmul.mubr.bf16.vlgmr.msra.gmra.mxu0 %v280_v9 }
  0xe1   :  { %v129_v11 = vpop.f32.mrf.mxu0 }
  0xe2   :  { %v152_v12 = vadd.f32 %v231_v10, %v129_v11 }
  0xe3   :  { %v268_v13 = vpop.f32.mrf.mxu0 }
  0xe4   :  { %v154_v14 = vmul.f32 0.70710677, %v152_v12  ;;  %v202_v62 = vmul.f32 0.5, %v152_v12 }
  0xe5   :  { %v132_v15 = vpop.f32.mrf.mxu0 }
  0xe6   :  { %v156_v16 = vand.u32 2147483647, %v154_v14  ;;  %v153_v17 = vadd.f32 %v231_v10, %v132_v15  ;;  %vm196_vm1 = vcmp.ge.f32.partialorder %v154_v14, 0.0 }
  0xe7   :  { %v269_v18 = vpop.f32.mrf.mxu0 }
  0xe8   :  { %v158_v19 = vmul.f32 0.3275911, %v156_v16  ;;  %v155_v20 = vmul.f32 0.70710677, %v153_v17  ;;  %v184_v25 = vsub.f32 0.0, %v156_v16  ;;  %v203_v63 = vmul.f32 0.5, %v153_v17 }
  0xea   :  { %v160_v21 = vadd.f32 1.0, %v158_v19  ;;  %v157_v22 = vand.u32 2147483647, %v155_v20  ;;  %v186_v26 = vmul.f32 %v184_v25, %v156_v16  ;;  %vm197_vm2 = vcmp.ge.f32.partialorder %v155_v20, 0.0 }
  0xec   :  { %281 = vrcp.f32 %v160_v21  ;;  %v159_v23 = vmul.f32 0.3275911, %v157_v22  ;;  %v185_v27 = vsub.f32 0.0, %v157_v22  ;;  %v188_v30 = vmul.f32 1.442695, %v186_v26 }
  0xee   :  { %v161_v24 = vadd.f32 1.0, %v159_v23  ;;  %v187_v31 = vmul.f32 %v185_v27, %v157_v22 }
  0xf0   :  { %283 = vrcp.f32 %v161_v24  ;;  %v190_v36 = vmul.f32 1.442695, %v187_v31 }
  0xf1   :  { %285 = vpow2.f32 %v188_v30 }
  0xf2   :  { %287 = vpow2.f32 %v190_v36 }
  0xf9   :  { %v282_v28 = vpop.eup %281 }
  0xfa   :  { %v166_v29 = vmul.f32 1.0614054, %v282_v28 }
  0xfc   :  { %v168_v32 = vadd.f32 -1.4531521, %v166_v29 }
  0xfd   :  { %v284_v33 = vpop.eup %283 }
  0xfe   :  { %v170_v34 = vmul.f32 %v282_v28, %v168_v32  ;;  %v167_v35 = vmul.f32 1.0614054, %v284_v33  ;;  %v286_v49 = vpop.eup %285 }
  0xff   :  { %v288_v54 = vpop.eup %287 }
 0x100   :  { %v172_v37 = vadd.f32 1.4214138, %v170_v34  ;;  %v169_v38 = vadd.f32 -1.4531521, %v167_v35 }
 0x102   :  { %v174_v39 = vmul.f32 %v282_v28, %v172_v37  ;;  %v171_v40 = vmul.f32 %v284_v33, %v169_v38 }
 0x104   :  { %v176_v41 = vadd.f32 -0.28449672, %v174_v39  ;;  %v173_v42 = vadd.f32 1.4214138, %v171_v40 }
 0x106   :  { %v178_v43 = vmul.f32 %v282_v28, %v176_v41  ;;  %v175_v44 = vmul.f32 %v284_v33, %v173_v42 }
 0x108   :  { %v180_v45 = vadd.f32 0.2548296, %v178_v43  ;;  %v177_v46 = vadd.f32 -0.28449672, %v175_v44 }
 0x10a   :  { %v182_v47 = vmul.f32 %v282_v28, %v180_v45  ;;  %v179_v48 = vmul.f32 %v284_v33, %v177_v46 }
 0x10c   :  { %v192_v50 = vmul.f32 %v286_v49, %v182_v47  ;;  %v181_v51 = vadd.f32 0.2548296, %v179_v48 }
 0x10e   :  { %v194_v52 = vsub.f32 1.0, %v192_v50  ;;  %v183_v53 = vmul.f32 %v284_v33, %v181_v51 }
 0x110   :  { %v198_v55 = vsub.f32 0.0, %v194_v52  ;;  %v193_v56 = vmul.f32 %v288_v54, %v183_v53 }
 0x112   :  { %v200_v57 = vsel %vm196_vm1, %v194_v52, %v198_v55  ;;  %v195_v58 = vsub.f32 1.0, %v193_v56 }
 0x113   :  { %v204_v60 = vadd.f32 1.0, %v200_v57 }
 0x114   :  { %v199_v59 = vsub.f32 0.0, %v195_v58 }
 0x115   :  { %v206_v1 = vmul.f32 %v204_v60, %v202_v62 }
 0x116   :  { %v201_v61 = vsel %vm197_vm2, %v195_v58, %v199_v59 }
 0x117   :  { %v205_v0 = vadd.f32 1.0, %v201_v61 }
 0x119   :  { %v207_v2 = vmul.f32 %v205_v0, %v203_v63 }
 0x11b   :  { %v239_v3 = vpack.c.bf16 %v207_v2, %v206_v1 }
 0x11d   :  { %240 = vst [vmem:[%s347_s3] sm:$0xff] %v239_v3  }

// kernel: pretrained_encoder_tir_forward.30
= control target key start
LH: loop header
LB: loop body
LE: loop exit
PB: predicated region body
PF: predicated region fallthrough
CT: control target
= control target key end

     0   :  { %v285_v0 = vmov 0.0   ;;  %vm286_vm0 = vmmov 0   ;;  %v169_v10 = vlaneseq  ;;  %s367_s1 = inlined_call_operand.vmem [shape: bf16[128,128], index: 1, kind: input, shape index: {}]   ;;  %s368_s0 = inlined_call_operand.vmem [shape: bf16[16,128], index: 0, kind: input, shape index: {}]   ;;  %s369_s3 = inlined_call_operand.vmem [shape: bf16[16,128], index: 3, kind: input, shape index: {}]   ;;  %s370_s2 = inlined_call_operand.vmem [shape: f32[1,128], index: 2, kind: input, shape index: {}]   ;;  %s371_s4 = inlined_call_operand.vmem [shape: f32[1,128], index: 4, kind: input, shape index: {}]   ;;  %s372_s5 = inlined_call_operand.vmem [shape: f32[1,128], index: 5, kind: input, shape index: {}]   ;;  %s373_s6 = inlined_call_operand.vmem [shape: f32[16,128], index: 6, kind: output, shape index: {}]  }
   0x1   :  { %250 = vmatprep.subr.bf16.mxu0 %v285_v0  ;;  %v272_v1 = vld [vmem:[%s367_s1 + $0x38] sm:$0xff]   ;;  %266 = vmatprep.mubr.msk.bf16.mxu0 %vm286_vm0, %v285_v0  ;;  %v273_v2 = vld [vmem:[%s367_s1 + $0x30] sm:$0xff]   ;;  %v274_v3 = vld [vmem:[%s367_s1 + $0x28] sm:$0xff]  }
   0x2   :  { %251 = vmatpush3.bf16.msra.mxu0 %v272_v1  ;;  %v275_v4 = vld [vmem:[%s367_s1 + $0x20] sm:$0xff]   ;;  %v276_v5 = vld [vmem:[%s367_s1 + $0x18] sm:$0xff]   ;;  %v277_v6 = vld [vmem:[%s367_s1 + $0x10] sm:$0xff]   ;;  %v170_v11 = vand.u32 127, %v169_v10 }
   0x3   :  { %252 = vmatprep.subr.bf16.mxu0 %v285_v0  ;;  %v278_v7 = vld [vmem:[%s367_s1 + $0x8] sm:$0xff]   ;;  %v279_v8 = vld [vmem:[%s367_s1] sm:$0xff]  }
   0x4   :  { %v280_v9 = vld [vmem:[%s368_s0] sm:$0xff]   ;;  %vm171_vm1 = vcmp.lt.s32.totalorder %v170_v11, 32 }
   0x5   :  { %v238_v12 = vld [vmem:[%s369_s3] sm:$0xff]   ;;  %v234_v18 = vsel %vm171_vm1, 1.0, %v285_v0 }
   0x6   :  { %253 = vmatpush3.bf16.msra.mxu0 %v273_v2  ;;  %v233_v13 = vld [vmem:[%s370_s2] ss:$0 sm:$0xff]  ;;  %v239_v14 = vunpack.c.l.bf16 %v238_v12  ;;  %v240_v19 = vunpack.c.h.bf16 %v238_v12 }
   0x7   :  { %254 = vmatprep.subr.bf16.mxu0 %v285_v0  ;;  %v235_v44 = vld [vmem:[%s371_s4] ss:$0 sm:$0xff] }
   0x8   :  { %v236_v46 = vld [vmem:[%s372_s5] ss:$0 sm:$0xff] }
   0xa   :  { %255 = vmatpush3.bf16.msra.mxu0 %v274_v3 }
   0xb   :  { %256 = vmatprep.subr.bf16.mxu0 %v285_v0 }
   0xe   :  { %257 = vmatpush3.bf16.msra.mxu0 %v275_v4 }
   0xf   :  { %258 = vmatprep.subr.bf16.mxu0 %v285_v0 }
  0x12   :  { %259 = vmatpush3.bf16.msra.mxu0 %v276_v5 }
  0x13   :  { %260 = vmatprep.subr.bf16.mxu0 %v285_v0 }
  0x16   :  { %261 = vmatpush3.bf16.msra.mxu0 %v277_v6 }
  0x17   :  { %262 = vmatprep.subr.bf16.mxu0 %v285_v0 }
  0x1a   :  { %263 = vmatpush3.bf16.msra.mxu0 %v278_v7 }
  0x1b   :  { %264 = vmatprep.subr.bf16.mxu0 %v285_v0 }
  0x1e   :  { %265 = vmatpush3.bf16.msra.mxu0 %v279_v8 }
  0x21   :  { %267 = vmatmul.mubr.bf16.vlgmr.msra.gmra.mxu0 %v280_v9 }
  0xe1   :  { %v138_v15 = vpop.f32.mrf.mxu0 }
  0xe2   :  { %v161_v16 = vadd.f32 %v233_v13, %v138_v15 }
  0xe3   :  { %v268_v17 = vpop.f32.mrf.mxu0 }
  0xe4   :  { %v167_v20 = vadd.f32 %v239_v14, %v161_v16 }
  0xe5   :  { %v141_v21 = vpop.f32.mrf.mxu0 }
  0xe6   :  { %v162_v22 = vadd.f32 %v233_v13, %v141_v21  ;;  %v174_v23 = vmul.f32 %v234_v18, %v167_v20 }
  0xe7   :  { %v269_v24 = vpop.f32.mrf.mxu0 }
  0xe8   :  { %v168_v25 = vadd.f32 %v240_v19, %v162_v22  ;;  %176 = vadd.xlane.f32.xlu0 %v174_v23 }
  0xea   :  { %v175_v26 = vmul.f32 %v234_v18, %v168_v25 }
  0xec   :  { %178 = vadd.xlane.f32.xlu0 %v175_v26 }
 0x171   :  { %v177_v27 = vpop.xlane.xlu0 %176 }
 0x172   :  { %v180_v28 = vmul.f32 0.03125, %v177_v27 }
 0x174   :  { %v182_v29 = vsub.f32 %v167_v20, %v180_v28 }
 0x175   :  { %v179_v30 = vpop.xlane.xlu0 %178 }
 0x176   :  { %v181_v31 = vmul.f32 0.03125, %v179_v30  ;;  %v184_v32 = vmul.f32 %v234_v18, %v182_v29 }
 0x178   :  { %v183_v33 = vsub.f32 %v168_v25, %v181_v31  ;;  %v186_v34 = vmul.f32 %v184_v32, %v184_v32 }
 0x17a   :  { %188 = vadd.xlane.f32.xlu1 %v186_v34  ;;  %v185_v35 = vmul.f32 %v234_v18, %v183_v33 }
 0x17c   :  { %v187_v36 = vmul.f32 %v185_v35, %v185_v35 }
 0x17e   :  { %190 = vadd.xlane.f32.xlu1 %v187_v36 }
 0x203   :  { %v189_v37 = vpop.xlane.xlu1 %188 }
 0x204   :  { %v192_v38 = vmul.f32 0.03125, %v189_v37 }
 0x206   :  { %v194_v39 = vadd.f32 1e-12, %v192_v38 }
 0x207   :  { %v191_v40 = vpop.xlane.xlu1 %190 }
 0x208   :  { %281 = vrsqrt.f32 %v194_v39  ;;  %v193_v41 = vmul.f32 0.03125, %v191_v40 }
 0x20a   :  { %v195_v42 = vadd.f32 1e-12, %v193_v41 }
 0x20c   :  { %283 = vrsqrt.f32 %v195_v42 }
 0x215   :  { %v282_v43 = vpop.eup %281 }
 0x216   :  { %v198_v45 = vmul.f32 %v282_v43, %v182_v29 }
 0x218   :  { %v207_v47 = vmul.f32 %v235_v44, %v198_v45 }
 0x219   :  { %v284_v48 = vpop.eup %283 }
 0x21a   :  { %v216_v49 = vadd.f32 %v236_v46, %v207_v47  ;;  %v199_v50 = vmul.f32 %v284_v48, %v183_v33 }
 0x21c   :  { %218 = vst [vmem:[%s373_s6] sm:$0xff] %v216_v49  ;;  %v208_v51 = vmul.f32 %v235_v44, %v199_v50 }
 0x21e   :  { %v217_v52 = vadd.f32 %v236_v46, %v208_v51 }
 0x220   :  { %219 = vst [vmem:[%s373_s6 + $0x8] sm:$0xff] %v217_v52 }

</bundles_post_ra>
